<compile_context>
chip_gen: v7x
topology: tpu7x:2x2x1
jax: 0.10.0
libtpu: 0.0.40
codegen_flags: <defaults>
</compile_context>

<pallas_src>
import math
import functools

import jax
import jax.numpy as jnp
from jax import lax
from jax.experimental import pallas as pl
from jax.experimental.pallas import tpu as pltpu


_VMEM_LIMIT = 48 * 1024 * 1024  # scoped-VMEM budget; safe on v7x (64 MiB phys)


# ------------------------------ device helpers -------------------------------

@functools.lru_cache(maxsize=1)
def _device_kind():
    try:
        return jax.devices()[0].device_kind.lower()
    except Exception:  # pragma: no cover
        return ""


@functools.lru_cache(maxsize=1)
def _exp_dtype():
    """bf16 exp rides the EUP at ~2x rate on v6e/v7x; v5e and older have no
    bf16 EUP path, so keep f32 there."""
    kind = _device_kind()
    if any(v in kind for v in ("v2", "v3", "v4", "v5")):
        return jnp.float32
    return jnp.bfloat16


@functools.lru_cache(maxsize=1)
def _flash_tile_targets():
    """(tq_target, tk_target): v5e keeps the smaller q tile (spill/store-slot
    pressure from the f32 score tile); v6e/v7x take the bigger tile to halve
    KV re-streaming and per-step overhead."""
    kind = _device_kind()
    if any(v in kind for v in ("v2", "v3", "v4", "v5")):
        return 256, 512
    return 512, 512


# ------------------------------ tiling helpers -------------------------------

def _tile_sublane(dim, target):
    """Largest divisor of `dim` <= target that is a multiple of 8 (legal
    second-to-last block dim); falls back to the full dim."""
    if dim <= target:
        return dim
    for t in range(target, 7, -1):
        if dim % t == 0 and t % 8 == 0:
            return t
    return dim


def _tile_lane(dim, target):
    """Largest divisor of `dim` <= target that is a multiple of 128 (lane-dense
    last block dim); falls back to the full dim."""
    if dim <= target:
        return dim
    start = target - (target % 128)
    for t in range(start, 127, -128):
        if dim % t == 0:
            return t
    return dim


def _heads_per_step(num_heads, head_dim):
    """Smallest hp dividing num_heads with hp*head_dim a multiple of 128
    (lane-dense blocks straight out of the (B, N, 3C) qkv buffer), or None."""
    for hp in range(1, num_heads + 1):
        if num_heads % hp == 0 and (hp * head_dim) % 128 == 0:
            return hp
    return None


# ------------------------------ linear kernels -------------------------------

def _linear_kernel_factory(use_bias):
    if use_bias:
        def kernel(x_ref, w_ref, b_ref, o_ref):
            x = x_ref[...].astype(jnp.bfloat16)          # (tm, Cin)
            w = w_ref[...].astype(jnp.bfloat16)          # (tn, Cin)
            # y = x @ w.T : contract Cin of both operands directly -- the MXU
            # consumes the "transposed" operand natively, nothing materialized.
            y = lax.dot_general(x, w, (((1,), (1,)), ((), ())),
                                preferred_element_type=jnp.float32)
            y = y + b_ref[...].astype(jnp.float32)       # (1, tn) broadcast
            o_ref[...] = y.astype(o_ref.dtype)
    else:
        def kernel(x_ref, w_ref, o_ref):
            x = x_ref[...].astype(jnp.bfloat16)
            w = w_ref[...].astype(jnp.bfloat16)
            y = lax.dot_general(x, w, (((1,), (1,)), ((), ())),
                                preferred_element_type=jnp.float32)
            o_ref[...] = y.astype(o_ref.dtype)
    return kernel


def _linear(x2d, w, b, out_dtype, tm_target=512, tn_target=512):
    """y = x2d @ w.T (+ b).  x2d: (M, Cin); w: (Cout, Cin); b: (Cout,) or None."""
    M, Cin = x2d.shape
    Cout = w.shape[0]
    tm = _tile_sublane(M, tm_target)       # big tm cuts weight re-streaming
    tn = _tile_lane(Cout, tn_target)       # lane-dense output blocks

    in_specs = [
        pl.BlockSpec((tm, Cin), lambda i, j: (i, 0)),
        pl.BlockSpec((tn, Cin), lambda i, j: (j, 0)),
    ]
    args = [x2d, w]
    if b is not None:
        in_specs.append(pl.BlockSpec((1, tn), lambda i, j: (0, j)))
        args.append(b.reshape(1, Cout))

    return pl.pallas_call(
        _linear_kernel_factory(b is not None),
        out_shape=jax.ShapeDtypeStruct((M, Cout), out_dtype),
        grid_spec=pltpu.PrefetchScalarGridSpec(
            num_scalar_prefetch=0,
            grid=(M // tm, Cout // tn),
            in_specs=in_specs,
            out_specs=pl.BlockSpec((tm, tn), lambda i, j: (i, j)),
        ),
        compiler_params=pltpu.CompilerParams(
            dimension_semantics=("parallel", "parallel"),
            vmem_limit_bytes=_VMEM_LIMIT),
    )(*args)


# --------------------------- flash attention kernel --------------------------

def _flash_kernel_factory(hp, hd, exp_dtype, kv_axis):
    """Online-softmax flash step over `hp` heads packed along the last block
    dim (width hp*hd).  Softmax scale is already folded into the Q weights."""

    def kernel(q_ref, k_ref, v_ref, o_ref, m_sc, l_sc, acc_sc):
        kv = pl.program_id(kv_axis)

        @pl.when(kv == 0)
        def _():
            m_sc[...] = jnp.full(m_sc.shape, -jnp.inf, dtype=m_sc.dtype)
            l_sc[...] = jnp.zeros(l_sc.shape, dtype=l_sc.dtype)
            acc_sc[...] = jnp.zeros(acc_sc.shape, dtype=acc_sc.dtype)

        q = q_ref[0].astype(jnp.bfloat16)    # (tq, hp*hd), scale pre-folded
        k = k_ref[0].astype(jnp.bfloat16)    # (tk, hp*hd)
        v = v_ref[0].astype(jnp.bfloat16)    # (tk, hp*hd)

        for h in range(hp):                  # static unroll (hp in {1, 2, 4})
            sl = slice(h * hd, (h + 1) * hd)
            # Scores: contract the head dim directly (no k.T / XLU pass).
            s = lax.dot_general(q[:, sl], k[:, sl], (((1,), (1,)), ((), ())),
                                preferred_element_type=jnp.float32)  # (tq, tk)
            m_prev = m_sc[h]                                         # (tq, 1)
            m_new = jnp.maximum(m_prev, s.max(axis=-1, keepdims=True))
            alpha = jnp.exp(m_prev - m_new)                          # f32, tiny
            # Main exp on the EUP; bf16 path on v6e/v7x, f32 on v5e.
            p = jnp.exp((s - m_new).astype(exp_dtype))               # (tq, tk)
            l_sc[h] = alpha * l_sc[h] + jnp.sum(
                p, axis=-1, dtype=jnp.float32, keepdims=True)
            acc_sc[h] = alpha * acc_sc[h] + jnp.dot(
                p.astype(jnp.bfloat16), v[:, sl],
                preferred_element_type=jnp.float32)
            m_sc[h] = m_new

        @pl.when(kv == pl.num_programs(kv_axis) - 1)
        def _():
            for h in range(hp):
                inv_l = pl.reciprocal(l_sc[h], approx=True)   # EUP slot, ~free
                o_ref[0, :, h * hd:(h + 1) * hd] = (
                    acc_sc[h] * inv_l).astype(o_ref.dtype)

    return kernel


def _flash_attention_fused(qkv, hp, num_heads, hd, exp_dtype):
    """Transpose-free flash attention.

    qkv: (B, N, 3C) straight out of the QKV projection.  Grid is
    (B, head_group, qi, kv); each step reads the (tq/tk, hp*hd) column blocks
    of q/k/v for its head group directly from the qkv buffer and writes the
    attention output straight into (B, N, C) layout.
    """
    B, N, C3 = qkv.shape
    C = C3 // 3
    G = num_heads // hp                 # head groups per example
    W = hp * hd                         # lane-dense block width (mult of 128)
    tq_t, tk_t = _flash_tile_targets()
    tq = _tile_sublane(N, tq_t)
    tk = _tile_sublane(N, tk_t)

    return pl.pallas_call(
        _flash_kernel_factory(hp, hd, exp_dtype, kv_axis=3),
        out_shape=jax.ShapeDtypeStruct((B, N, C), qkv.dtype),
        grid_spec=pltpu.PrefetchScalarGridSpec(
            num_scalar_prefetch=0,
            grid=(B, G, N // tq, N // tk),
            in_specs=[
                # q cols at block g, k at G+g, v at 2G+g of the 3C axis.
                pl.BlockSpec((1, tq, W), lambda b, g, qi, kv: (b, qi, g)),
                pl.BlockSpec((1, tk, W), lambda b, g, qi, kv: (b, kv, G + g)),
                pl.BlockSpec((1, tk, W), lambda b, g, qi, kv: (b, kv, 2 * G + g)),
            ],
            out_specs=pl.BlockSpec((1, tq, W), lambda b, g, qi, kv: (b, qi, g)),
            scratch_shapes=[
                pltpu.VMEM((hp, tq, 1), jnp.float32),    # running max  m
                pltpu.VMEM((hp, tq, 1), jnp.float32),    # running sum  l
                pltpu.VMEM((hp, tq, hd), jnp.float32),   # output accumulator
            ],
        ),
        compiler_params=pltpu.CompilerParams(
            dimension_semantics=("parallel", "parallel", "parallel", "arbitrary"),
            vmem_limit_bytes=_VMEM_LIMIT),
    )(qkv, qkv, qkv)


def _flash_attention_strided(q, k, v, exp_dtype):
    """Fallback path (hd*H has no lane-dense grouping): q, k, v already split
    per head as (B*H, N, hd); blocks use the full hd as the last dim."""
    BH, N, hd = q.shape
    tq_t, tk_t = _flash_tile_targets()
    tq = _tile_sublane(N, tq_t)
    tk = _tile_sublane(N, tk_t)

    return pl.pallas_call(
        _flash_kernel_factory(1, hd, exp_dtype, kv_axis=2),
        out_shape=jax.ShapeDtypeStruct((BH, N, hd), q.dtype),
        grid_spec=pltpu.PrefetchScalarGridSpec(
            num_scalar_prefetch=0,
            grid=(BH, N // tq, N // tk),
            in_specs=[
                pl.BlockSpec((1, tq, hd), lambda bh, qi, kv: (bh, qi, 0)),
                pl.BlockSpec((1, tk, hd), lambda bh, qi, kv: (bh, kv, 0)),
                pl.BlockSpec((1, tk, hd), lambda bh, qi, kv: (bh, kv, 0)),
            ],
            out_specs=pl.BlockSpec((1, tq, hd), lambda bh, qi, kv: (bh, qi, 0)),
            scratch_shapes=[
                pltpu.VMEM((1, tq, 1), jnp.float32),
                pltpu.VMEM((1, tq, 1), jnp.float32),
                pltpu.VMEM((1, tq, hd), jnp.float32),
            ],
        ),
        compiler_params=pltpu.CompilerParams(
            dimension_semantics=("parallel", "parallel", "arbitrary"),
            vmem_limit_bytes=_VMEM_LIMIT),
    )(q, k, v)


# ------------------------------- module forward -------------------------------

def attention_forward(x, w_qkv, w_proj, b_proj, num_heads):
    """PyTorch Attention.forward.  x: (B, N, C); w_qkv: (3C, C);
    w_proj: (C, C); b_proj: (C,)."""
    B, N, C = x.shape
    hd = C // num_heads
    scale = 1.0 / math.sqrt(hd)
    exp_dtype = _exp_dtype()

    # Fold the softmax scale into the Q rows of the qkv weight (done once in
    # XLA) and pre-cast weights + activations to bf16 (halves DMA traffic; the
    # MXU consumes bf16 either way).
    w_qkv_b = w_qkv.at[:C].multiply(scale).astype(jnp.bfloat16)
    w_proj_b = w_proj.astype(jnp.bfloat16)
    x_b = x.astype(jnp.bfloat16)

    # (1) QKV projection (no bias); keep the intermediate in bf16.
    qkv = _linear(x_b.reshape(B * N, C), w_qkv_b, None, out_dtype=jnp.bfloat16)

    hp = _heads_per_step(num_heads, hd)
    if hp is not None:
        # (2) Fused path: head split/merge live in the BlockSpec index maps;
        # no XLA transposes, output lands directly in (B, N, C) layout.
        attn = _flash_attention_fused(qkv.reshape(B, N, 3 * C),
                                      hp, num_heads, hd, exp_dtype)
        attn2d = attn.reshape(B * N, C)
    else:
        # TODO(synk): head widths where hp*hd can never reach a 128-lane block
        # (hd * num_heads not a multiple of 128) keep the explicit XLA head
        # split/merge transposes of the original version.
        qkv5 = qkv.reshape(B, N, 3, num_heads, hd)
        qkv5 = jnp.transpose(qkv5, (2, 0, 3, 1, 4)).reshape(3, B * num_heads, N, hd)
        attn = _flash_attention_strided(qkv5[0], qkv5[1], qkv5[2], exp_dtype)
        attn = attn.reshape(B, num_heads, N, hd)
        attn2d = jnp.transpose(attn, (0, 2, 1, 3)).reshape(B * N, C)

    # (3) Output projection with bias (proj_bias=True default).
    y = _linear(attn2d, w_proj_b, b_proj, out_dtype=x.dtype)
    return y.reshape(B, N, C)


# --------------------------------- reference ---------------------------------

def attention_reference(x, w_qkv, w_proj, b_proj, num_heads):
    """Pure-JAX f32 reference mirroring the PyTorch module forward."""
    B, N, C = x.shape
    hd = C // num_heads
    qkv = jnp.einsum('bnc,oc->bno', x, w_qkv)                 # (B, N, 3C)
    qkv = qkv.reshape(B, N, 3, num_heads, hd)
    qkv = jnp.transpose(qkv, (2, 0, 3, 1, 4))                 # (3, B, H, N, hd)
    q, k, v = qkv[0], qkv[1], qkv[2]
    scale = 1.0 / math.sqrt(hd)
    attn = jnp.einsum('bhqd,bhkd->bhqk', q, k) * scale
    attn = jax.nn.softmax(attn, axis=-1)
    out = jnp.einsum('bhqk,bhkd->bhqd', attn, v)              # (B, H, N, hd)
    out = jnp.transpose(out, (0, 2, 1, 3)).reshape(B, N, C)
    return jnp.einsum('bnc,oc->bno', out, w_proj) + b_proj


if __name__ == "__main__":
    configs = [
        # (B, N, C, num_heads)   hd = C // num_heads
        (2, 128, 256, 2),   # hd=128: fused path, 1 head per step
        (2, 128, 128, 2),   # hd=64 : fused path, 2 heads per step (lane-dense)
        (2, 64, 64, 8),     # hd=8  : fallback path (explicit head transpose)
    ]
    key = jax.random.PRNGKey(0)
    for (B, N, C, H) in configs:
        key, kx, kq, kp, kb = jax.random.split(key, 5)
        x = jax.random.normal(kx, (B, N, C), dtype=jnp.float32)
        # Deterministic synthetic parameters (no checkpoint load).
        w_qkv = jax.random.normal(kq, (3 * C, C), dtype=jnp.float32) / math.sqrt(C)
        w_proj = jax.random.normal(kp, (C, C), dtype=jnp.float32) / math.sqrt(C)
        b_proj = jax.random.normal(kb, (C,), dtype=jnp.float32) * 0.01

        fwd = jax.jit(functools.partial(attention_forward, num_heads=H))
        out = jax.block_until_ready(fwd(x, w_qkv, w_proj, b_proj))

        ref = attention_reference(x, w_qkv, w_proj, b_proj, H)
        assert out.shape == (B, N, C)
        # Kernels feed the MXU bf16 operands with f32 accumulation -> compare
        # against the f32 reference with bf16-level tolerance.
        max_err = float(jnp.max(jnp.abs(out - ref)))
        assert jnp.allclose(out, ref, atol=5e-2, rtol=5e-2), (
            f"mismatch vs reference (B={B}, N={N}, C={C}, H={H}): "
            f"max abs err {max_err:.4f}")

    print("KERNEL_OK")
</pallas_src>

<mosaic_0001>
module attributes {stable_mosaic.version = 11 : i64} {
  func.func @kernel(%arg0: i32, %arg1: i32, %arg2: memref<256x256xbf16, #tpu.memory_space<vmem>>, %arg3: memref<384x256xbf16, #tpu.memory_space<vmem>>, %arg4: memref<256x384xbf16, #tpu.memory_space<vmem>>) attributes {dimension_semantics = [#tpu.dimension_semantics<parallel>, #tpu.dimension_semantics<parallel>], iteration_bounds = array<i64: 1, 2>, scalar_prefetch = 0 : i64, scratch_operands = 0 : i64, tpu.core_type = #tpu.core_type<tc>, window_params = [{transform_indices = @transform_0, window_bounds = array<i64: 256, 256>}, {transform_indices = @transform_1, window_bounds = array<i64: 384, 256>}, {transform_indices = @transform_2, window_bounds = array<i64: 256, 384>}]} {
    %c0 = arith.constant 0 : index
    %c0_0 = arith.constant 0 : index
    %0 = vector.load %arg2[%c0, %c0_0] : memref<256x256xbf16, #tpu.memory_space<vmem>>, vector<256x256xbf16>
    %c0_1 = arith.constant 0 : index
    %c0_2 = arith.constant 0 : index
    %1 = vector.load %arg3[%c0_1, %c0_2] : memref<384x256xbf16, #tpu.memory_space<vmem>>, vector<384x256xbf16>
    %cst = arith.constant dense<0.000000e+00> : vector<256x384xf32>
    %2 = tpu.matmul %0, %1, %cst {dimension_numbers = #tpu.dot_dimension_numbers<[1], [1], [0], [0], [0, 0, 1, 0], [], []>} : vector<256x256xbf16>, vector<384x256xbf16>, vector<256x384xf32> -> vector<256x384xf32>
    %3 = arith.truncf %2 : vector<256x384xf32> to vector<256x384xbf16>
    %c0_3 = arith.constant 0 : index
    %c0_4 = arith.constant 0 : index
    %4 = vector.load %arg4[%c0_3, %c0_4] : memref<256x384xbf16, #tpu.memory_space<vmem>>, vector<256x384xbf16>
    tpu.vector_store %arg4[%c0_3, %c0_4], %3 {strides = array<i32>} : memref<256x384xbf16, #tpu.memory_space<vmem>>, vector<256x384xbf16>,
    return
  }
  func.func @transform_0(%arg0: i32, %arg1: i32) -> (i32, i32) {
    %c0_i32 = arith.constant 0 : i32
    %c0_i32_0 = arith.constant 0 : i32
    return %arg0, %c0_i32 : i32, i32
  }
  func.func @transform_1(%arg0: i32, %arg1: i32) -> (i32, i32) {
    %c0_i32 = arith.constant 0 : i32
    %c0_i32_0 = arith.constant 0 : i32
    return %arg1, %c0_i32 : i32, i32
  }
  func.func @transform_2(%arg0: i32, %arg1: i32) -> (i32, i32) {
    %c0_i32 = arith.constant 0 : i32
    return %arg0, %arg1 : i32, i32
  }
}

module attributes {stable_mosaic.version = 11 : i64} {
  func.func @kernel(%arg0: i32, %arg1: i32, %arg2: i32, %arg3: i32, %arg4: memref<1x128x128xbf16, #tpu.memory_space<vmem>>, %arg5: memref<1x128x128xbf16, #tpu.memory_space<vmem>>, %arg6: memref<1x128x128xbf16, #tpu.memory_space<vmem>>, %arg7: memref<1x128x128xbf16, #tpu.memory_space<vmem>>, %arg8: memref<1x128x1xf32, #tpu.memory_space<vmem>>, %arg9: memref<1x128x1xf32, #tpu.memory_space<vmem>>, %arg10: memref<1x128x128xf32, #tpu.memory_space<vmem>>) attributes {dimension_semantics = [#tpu.dimension_semantics<parallel>, #tpu.dimension_semantics<parallel>, #tpu.dimension_semantics<parallel>, #tpu.dimension_semantics<arbitrary>], iteration_bounds = array<i64: 2, 2, 1, 1>, scalar_prefetch = 0 : i64, scratch_operands = 3 : i64, tpu.core_type = #tpu.core_type<tc>, window_params = [{transform_indices = @transform_0, window_bounds = array<i64: 1, 128, 128>}, {transform_indices = @transform_1, window_bounds = array<i64: 1, 128, 128>}, {transform_indices = @transform_2, window_bounds = array<i64: 1, 128, 128>}, {transform_indices = @transform_3, window_bounds = array<i64: 1, 128, 128>}]} {
    %c0_i32 = arith.constant 0 : i32
    %0 = arith.cmpi eq, %arg3, %c0_i32 : i32
    %1 = arith.extui %0 : i1 to i32
    %c0_i32_0 = arith.constant 0 : i32
    %2 = arith.cmpi ne, %1, %c0_i32_0 : i32
    scf.if %2 {
      %cst_32 = arith.constant 0xFF800000 : f32
      %46 = vector.broadcast %cst_32 : f32 to vector<1x128x1xf32>
      %c0_33 = arith.constant 0 : index
      %c0_34 = arith.constant 0 : index
      %c0_35 = arith.constant 0 : index
      %47 = vector.load %arg8[%c0_33, %c0_34, %c0_35] : memref<1x128x1xf32, #tpu.memory_space<vmem>>, vector<1x128x1xf32>
      tpu.vector_store %arg8[%c0_33, %c0_34, %c0_35], %46 {strides = array<i32>} : memref<1x128x1xf32, #tpu.memory_space<vmem>>, vector<1x128x1xf32>,
      %cst_36 = arith.constant 0.000000e+00 : f32
      %48 = vector.broadcast %cst_36 : f32 to vector<1x128x1xf32>
      %c0_37 = arith.constant 0 : index
      %c0_38 = arith.constant 0 : index
      %c0_39 = arith.constant 0 : index
      %49 = vector.load %arg9[%c0_37, %c0_38, %c0_39] : memref<1x128x1xf32, #tpu.memory_space<vmem>>, vector<1x128x1xf32>
      tpu.vector_store %arg9[%c0_37, %c0_38, %c0_39], %48 {strides = array<i32>} : memref<1x128x1xf32, #tpu.memory_space<vmem>>, vector<1x128x1xf32>,
      %cst_40 = arith.constant 0.000000e+00 : f32
      %50 = vector.broadcast %cst_40 : f32 to vector<1x128x128xf32>
      %c0_41 = arith.constant 0 : index
      %c0_42 = arith.constant 0 : index
      %c0_43 = arith.constant 0 : index
      %51 = vector.load %arg10[%c0_41, %c0_42, %c0_43] : memref<1x128x128xf32, #tpu.memory_space<vmem>>, vector<1x128x128xf32>
      tpu.vector_store %arg10[%c0_41, %c0_42, %c0_43], %50 {strides = array<i32>} : memref<1x128x128xf32, #tpu.memory_space<vmem>>, vector<1x128x128xf32>,
    } else {
    }
    %c0 = arith.constant 0 : index
    %c0_1 = arith.constant 0 : index
    %c0_2 = arith.constant 0 : index
    %3 = vector.load %arg4[%c0, %c0_1, %c0_2] : memref<1x128x128xbf16, #tpu.memory_space<vmem>>, vector<1x128x128xbf16>
    %4 = vector.shape_cast %3 : vector<1x128x128xbf16> to vector<128x128xbf16>
    %c0_3 = arith.constant 0 : index
    %c0_4 = arith.constant 0 : index
    %c0_5 = arith.constant 0 : index
    %5 = vector.load %arg5[%c0_3, %c0_4, %c0_5] : memref<1x128x128xbf16, #tpu.memory_space<vmem>>, vector<1x128x128xbf16>
    %6 = vector.shape_cast %5 : vector<1x128x128xbf16> to vector<128x128xbf16>
    %c0_6 = arith.constant 0 : index
    %c0_7 = arith.constant 0 : index
    %c0_8 = arith.constant 0 : index
    %7 = vector.load %arg6[%c0_6, %c0_7, %c0_8] : memref<1x128x128xbf16, #tpu.memory_space<vmem>>, vector<1x128x128xbf16>
    %8 = vector.shape_cast %7 : vector<1x128x128xbf16> to vector<128x128xbf16>
    %cst = arith.constant dense<0.000000e+00> : vector<128x128xf32>
    %9 = tpu.matmul %4, %6, %cst {dimension_numbers = #tpu.dot_dimension_numbers<[1], [1], [0], [0], [0, 0, 1, 0], [], []>} : vector<128x128xbf16>, vector<128x128xbf16>, vector<128x128xf32> -> vector<128x128xf32>
    %c0_9 = arith.constant 0 : index
    %c0_10 = arith.constant 0 : index
    %c0_11 = arith.constant 0 : index
    %10 = vector.load %arg8[%c0_9, %c0_10, %c0_11] : memref<1x128x1xf32, #tpu.memory_space<vmem>>, vector<1x128x1xf32>
    %11 = vector.shape_cast %10 : vector<1x128x1xf32> to vector<128x1xf32>
    %cst_12 = arith.constant dense<0xFF800000> : vector<128xf32>
    %12 = vector.multi_reduction <maximumf>, %9, %cst_12 [1] : vector<128x128xf32> to vector<128xf32>
    %13 = vector.shape_cast %12 : vector<128xf32> to vector<128x1xf32>
    %14 = arith.maximumf %11, %13 : vector<128x1xf32>
    %15 = arith.subf %11, %14 : vector<128x1xf32>
    %16 = math.exp %15 : vector<128x1xf32>
    %17 = vector.broadcast %14 : vector<128x1xf32> to vector<128x128xf32>
    %18 = arith.subf %9, %17 : vector<128x128xf32>
    %19 = arith.truncf %18 : vector<128x128xf32> to vector<128x128xbf16>
    %20 = math.exp %19 : vector<128x128xbf16>
    %c0_13 = arith.constant 0 : index
    %c0_14 = arith.constant 0 : index
    %c0_15 = arith.constant 0 : index
    %21 = vector.load %arg9[%c0_13, %c0_14, %c0_15] : memref<1x128x1xf32, #tpu.memory_space<vmem>>, vector<1x128x1xf32>
    %22 = vector.shape_cast %21 : vector<1x128x1xf32> to vector<128x1xf32>
    %23 = arith.mulf %16, %22 : vector<128x1xf32>
    %24 = arith.extf %20 : vector<128x128xbf16> to vector<128x128xf32>
    %cst_16 = arith.constant dense<0.000000e+00> : vector<128xf32>
    %25 = vector.multi_reduction <add>, %24, %cst_16 [1] : vector<128x128xf32> to vector<128xf32>
    %26 = vector.shape_cast %25 : vector<128xf32> to vector<128x1xf32>
    %27 = arith.addf %23, %26 : vector<128x1xf32>
    %c0_17 = arith.constant 0 : index
    %c0_18 = arith.constant 0 : index
    %c0_19 = arith.constant 0 : index
    %28 = vector.load %arg9[%c0_17, %c0_18, %c0_19] : memref<1x128x1xf32, #tpu.memory_space<vmem>>, vector<1x128x1xf32>
    %29 = vector.shape_cast %28 : vector<1x128x1xf32> to vector<128x1xf32>
    %30 = vector.shape_cast %27 : vector<128x1xf32> to vector<1x128x1xf32>
    tpu.vector_store %arg9[%c0_17, %c0_18, %c0_19], %30 {strides = array<i32>} : memref<1x128x1xf32, #tpu.memory_space<vmem>>, vector<1x128x1xf32>,
    %c0_20 = arith.constant 0 : index
    %c0_21 = arith.constant 0 : index
    %c0_22 = arith.constant 0 : index
    %31 = vector.load %arg10[%c0_20, %c0_21, %c0_22] : memref<1x128x128xf32, #tpu.memory_space<vmem>>, vector<1x128x128xf32>
    %32 = vector.shape_cast %31 : vector<1x128x128xf32> to vector<128x128xf32>
    %33 = vector.broadcast %16 : vector<128x1xf32> to vector<128x128xf32>
    %34 = arith.mulf %33, %32 : vector<128x128xf32>
    %cst_23 = arith.constant dense<0.000000e+00> : vector<128x128xf32>
    %35 = tpu.matmul %20, %8, %cst_23 {dimension_numbers = #tpu.dot_dimension_numbers<[1], [0], [0], [1], [0, 0, 1, 1], [], []>} : vector<128x128xbf16>, vector<128x128xbf16>, vector<128x128xf32> -> vector<128x128xf32>
    %36 = arith.addf %34, %35 : vector<128x128xf32>
    %c0_24 = arith.constant 0 : index
    %c0_25 = arith.constant 0 : index
    %c0_26 = arith.constant 0 : index
    %37 = vector.load %arg10[%c0_24, %c0_25, %c0_26] : memref<1x128x128xf32, #tpu.memory_space<vmem>>, vector<1x128x128xf32>
    %38 = vector.shape_cast %37 : vector<1x128x128xf32> to vector<128x128xf32>
    %39 = vector.shape_cast %36 : vector<128x128xf32> to vector<1x128x128xf32>
    tpu.vector_store %arg10[%c0_24, %c0_25, %c0_26], %39 {strides = array<i32>} : memref<1x128x128xf32, #tpu.memory_space<vmem>>, vector<1x128x128xf32>,
    %c0_27 = arith.constant 0 : index
    %c0_28 = arith.constant 0 : index
    %c0_29 = arith.constant 0 : index
    %40 = vector.load %arg8[%c0_27, %c0_28, %c0_29] : memref<1x128x1xf32, #tpu.memory_space<vmem>>, vector<1x128x1xf32>
    %41 = vector.shape_cast %40 : vector<1x128x1xf32> to vector<128x1xf32>
    %42 = vector.shape_cast %14 : vector<128x1xf32> to vector<1x128x1xf32>
    tpu.vector_store %arg8[%c0_27, %c0_28, %c0_29], %42 {strides = array<i32>} : memref<1x128x1xf32, #tpu.memory_space<vmem>>, vector<1x128x1xf32>,
    %c0_i32_30 = arith.constant 0 : i32
    %43 = arith.cmpi eq, %arg3, %c0_i32_30 : i32
    %44 = arith.extui %43 : i1 to i32
    %c0_i32_31 = arith.constant 0 : i32
    %45 = arith.cmpi ne, %44, %c0_i32_31 : i32
    scf.if %45 {
      %c0_32 = arith.constant 0 : index
      %c0_33 = arith.constant 0 : index
      %c0_34 = arith.constant 0 : index
      %46 = vector.load %arg9[%c0_32, %c0_33, %c0_34] : memref<1x128x1xf32, #tpu.memory_space<vmem>>, vector<1x128x1xf32>
      %47 = vector.shape_cast %46 : vector<1x128x1xf32> to vector<128x1xf32>
      %48 = tpu.reciprocal %47 {approx = true} : vector<128x1xf32> -> vector<128x1xf32>
      %c0_35 = arith.constant 0 : index
      %c0_36 = arith.constant 0 : index
      %c0_37 = arith.constant 0 : index
      %49 = vector.load %arg10[%c0_35, %c0_36, %c0_37] : memref<1x128x128xf32, #tpu.memory_space<vmem>>, vector<1x128x128xf32>
      %50 = vector.shape_cast %49 : vector<1x128x128xf32> to vector<128x128xf32>
      %51 = vector.broadcast %48 : vector<128x1xf32> to vector<128x128xf32>
      %52 = arith.mulf %50, %51 : vector<128x128xf32>
      %53 = arith.truncf %52 : vector<128x128xf32> to vector<128x128xbf16>
      %c0_38 = arith.constant 0 : index
      %c0_39 = arith.constant 0 : index
      %c0_40 = arith.constant 0 : index
      %54 = vector.load %arg7[%c0_38, %c0_39, %c0_40] : memref<1x128x128xbf16, #tpu.memory_space<vmem>>, vector<1x128x128xbf16>
      %55 = vector.shape_cast %54 : vector<1x128x128xbf16> to vector<128x128xbf16>
      %56 = vector.shape_cast %53 : vector<128x128xbf16> to vector<1x128x128xbf16>
      tpu.vector_store %arg7[%c0_38, %c0_39, %c0_40], %56 {strides = array<i32>} : memref<1x128x128xbf16, #tpu.memory_space<vmem>>, vector<1x128x128xbf16>,
    } else {
    }
    return
  }
  func.func @transform_0(%arg0: i32, %arg1: i32, %arg2: i32, %arg3: i32) -> (i32, i32, i32) {
    %c0_i32 = arith.constant 0 : i32
    return %arg0, %arg2, %arg1 : i32, i32, i32
  }
  func.func @transform_1(%arg0: i32, %arg1: i32, %arg2: i32, %arg3: i32) -> (i32, i32, i32) {
    %c2_i32 = arith.constant 2 : i32
    %0 = arith.addi %c2_i32, %arg1 : i32
    %c0_i32 = arith.constant 0 : i32
    return %arg0, %arg3, %0 : i32, i32, i32
  }
  func.func @transform_2(%arg0: i32, %arg1: i32, %arg2: i32, %arg3: i32) -> (i32, i32, i32) {
    %c4_i32 = arith.constant 4 : i32
    %0 = arith.addi %c4_i32, %arg1 : i32
    %c0_i32 = arith.constant 0 : i32
    return %arg0, %arg3, %0 : i32, i32, i32
  }
  func.func @transform_3(%arg0: i32, %arg1: i32, %arg2: i32, %arg3: i32) -> (i32, i32, i32) {
    %c0_i32 = arith.constant 0 : i32
    return %arg0, %arg2, %arg1 : i32, i32, i32
  }
}

module attributes {stable_mosaic.version = 11 : i64} {
  func.func @kernel(%arg0: i32, %arg1: i32, %arg2: memref<256x256xbf16, #tpu.memory_space<vmem>>, %arg3: memref<256x256xbf16, #tpu.memory_space<vmem>>, %arg4: memref<1x256xf32, #tpu.memory_space<vmem>>, %arg5: memref<256x256xf32, #tpu.memory_space<vmem>>) attributes {dimension_semantics = [#tpu.dimension_semantics<parallel>, #tpu.dimension_semantics<parallel>], iteration_bounds = array<i64: 1, 1>, scalar_prefetch = 0 : i64, scratch_operands = 0 : i64, tpu.core_type = #tpu.core_type<tc>, window_params = [{transform_indices = @transform_0, window_bounds = array<i64: 256, 256>}, {transform_indices = @transform_1, window_bounds = array<i64: 256, 256>}, {transform_indices = @transform_2, window_bounds = array<i64: 1, 256>}, {transform_indices = @transform_3, window_bounds = array<i64: 256, 256>}]} {
    %c0 = arith.constant 0 : index
    %c0_0 = arith.constant 0 : index
    %0 = vector.load %arg2[%c0, %c0_0] : memref<256x256xbf16, #tpu.memory_space<vmem>>, vector<256x256xbf16>
    %c0_1 = arith.constant 0 : index
    %c0_2 = arith.constant 0 : index
    %1 = vector.load %arg3[%c0_1, %c0_2] : memref<256x256xbf16, #tpu.memory_space<vmem>>, vector<256x256xbf16>
    %cst = arith.constant dense<0.000000e+00> : vector<256x256xf32>
    %2 = tpu.matmul %0, %1, %cst {dimension_numbers = #tpu.dot_dimension_numbers<[1], [1], [0], [0], [0, 0, 1, 0], [], []>} : vector<256x256xbf16>, vector<256x256xbf16>, vector<256x256xf32> -> vector<256x256xf32>
    %c0_3 = arith.constant 0 : index
    %c0_4 = arith.constant 0 : index
    %3 = vector.load %arg4[%c0_3, %c0_4] : memref<1x256xf32, #tpu.memory_space<vmem>>, vector<1x256xf32>
    %4 = vector.broadcast %3 : vector<1x256xf32> to vector<256x256xf32>
    %5 = arith.addf %2, %4 : vector<256x256xf32>
    %c0_5 = arith.constant 0 : index
    %c0_6 = arith.constant 0 : index
    %6 = vector.load %arg5[%c0_5, %c0_6] : memref<256x256xf32, #tpu.memory_space<vmem>>, vector<256x256xf32>
    tpu.vector_store %arg5[%c0_5, %c0_6], %5 {strides = array<i32>} : memref<256x256xf32, #tpu.memory_space<vmem>>, vector<256x256xf32>,
    return
  }
  func.func @transform_0(%arg0: i32, %arg1: i32) -> (i32, i32) {
    %c0_i32 = arith.constant 0 : i32
    %c0_i32_0 = arith.constant 0 : i32
    return %arg0, %c0_i32 : i32, i32
  }
  func.func @transform_1(%arg0: i32, %arg1: i32) -> (i32, i32) {
    %c0_i32 = arith.constant 0 : i32
    %c0_i32_0 = arith.constant 0 : i32
    return %arg1, %c0_i32 : i32, i32
  }
  func.func @transform_2(%arg0: i32, %arg1: i32) -> (i32, i32) {
    %c0_i32 = arith.constant 0 : i32
    %c0_i32_0 = arith.constant 0 : i32
    return %c0_i32, %arg1 : i32, i32
  }
  func.func @transform_3(%arg0: i32, %arg1: i32) -> (i32, i32) {
    %c0_i32 = arith.constant 0 : i32
    return %arg0, %arg1 : i32, i32
  }
}

</mosaic_0001>

<bundles_post_ra>
// kernel: attention_forward.3
= control target key start
LH: loop header
LB: loop body
LE: loop exit
PB: predicated region body
PF: predicated region fallthrough
CT: control target
= control target key end

     0   :  { %s2150_s9 = smov 0   ;;  %s2152_s10 = smov 0   ;;  %s2561_s0 = inlined_call_operand.vmem [shape: bf16[256,256], index: 0, kind: input, shape index: {}]   ;;  %s2562_s1 = inlined_call_operand.vmem [shape: bf16[768,256], index: 1, kind: input, shape index: {}]   ;;  %s2563_s2 = inlined_call_operand.vmem [shape: bf16[256,768], index: 2, kind: output, shape index: {}]  }
   0x1   :  { %s2154_s11 = smov 0   ;;  %s2156_s12 = smov 0  }
   0x2   :  { %s2158_s13 = smov 0  }
   0x3 LB: > { %s1649_s14 = sadd.s32 4294967295, %s2133_s13   ;;  %s21_s15 = sadd.s32 1, %s2129_s12  ;;  %s2133_s13 = sphi %s2158_s13, %s12_s13   ;;  %s2129_s12 = sphi %s2156_s12, %s2568_s12   ;;  %s2125_s11 = sphi %s2154_s11, %s2567_s11   ;;  %s2121_s10 = sphi %s2152_s10, %s2566_s10   ;;  %s2117_s9 = sphi %s2150_s9, %s2565_s9  }
   0x4   : > { %p22_p0 = scmp.ge.s32.totalorder %s21_s15, 2  ;;  %s85_s16 = sadd.s32 1, %s2121_s10 }
   0x5   : > { %p95_p1 = scmp.ne.s32.totalorder %s2121_s10, %s2117_s9  ;;  %p96_p2 = scmp.eq.s32.totalorder %s1649_s14, 1 }
   0x6   : > { %s2570_s15 = smov (%p22_p0, %s21_s15), 0  ;;  %p1654_p4 = scmp.ge.s32.totalorder %s2133_s13, 1 }
   0x7   : > { %p2182_p3 = por %p96_p2, %p95_p1  ;;  %s81_s18 = ssub.s32 %s2129_s12, %s2570_s15 }
   0x8   : > { %p140_p5 = scmp.lt.s32.totalorder %s2133_s13, 3  ;;  %p83_p6 = scmp.eq.s32.totalorder %s81_s18, 0 }
   0xa   : > { %p141_p7 = pnand %p1654_p4, %p140_p5 }
   0xb   : > { %s2191_s19 = scalar_select %p83_p6, %s2121_s10, %s85_s16  }
   0xc   : > { %144 = sbr.rel (%p141_p7) target bundleno = 497 (0x1f1), region = 28  ;;  %v2049_v0 = vld [vmem:[%s2561_s0 + $0x4] ss:$8 sps:$4 sm:$0xff] (!%p141_p7)   ;;  %v2047_v38 = vld [vmem:[%s2561_s0] ss:$8 sps:$4 sm:$0xff] (!%p141_p7)   ;;  %s165_s30 = sand.u32 (!%p141_p7), 1, %s2117_s9  }
   0xd   : > { %s175_s20 = smul.u32 (!%p141_p7), 48, %s2125_s11  ;;  %890 = vmatprep.mubr.bf16.mxu1 (!%p141_p7), %v2049_v0  ;;  %697 = vmatprep.mubr.bf16.mxu0 (!%p141_p7), %v2049_v0  ;;  %v2050_v39 = vld [vmem:[%s2561_s0 + $0x14] ss:$8 sps:$4 sm:$0xff] (!%p141_p7)   ;;  %v2052_v42 = vld [vmem:[%s2561_s0 + $0x10] ss:$8 sps:$4 sm:$0xff] (!%p141_p7)  }
   0xe   : > { %v2053_v43 = vld [vmem:[%s2561_s0 + $0x24] ss:$8 sps:$4 sm:$0xff] (!%p141_p7)   ;;  %v2055_v46 = vld [vmem:[%s2561_s0 + $0x20] ss:$8 sps:$4 sm:$0xff] (!%p141_p7)   ;;  %v2056_v47 = vld [vmem:[%s2561_s0 + $0x34] ss:$8 sps:$4 sm:$0xff] (!%p141_p7)  }
   0xf   : > { %p176_p8 = scmp.lt.s32.totalorder (!%p141_p7), %s175_s20, 95  ;;  %v2058_v50 = vld [vmem:[%s2561_s0 + $0x30] ss:$8 sps:$4 sm:$0xff] (!%p141_p7)   ;;  %v2059_v51 = vld [vmem:[%s2561_s0 + $0x44] ss:$8 sps:$4 sm:$0xff] (!%p141_p7)   ;;  %s1934_s3 = smul.u32 (!%p141_p7), 384, %s165_s30 }
  0x10   : > { %v2061_v54 = vld [vmem:[%s2561_s0 + $0x40] ss:$8 sps:$4 sm:$0xff] (!%p141_p7)   ;;  %v2062_v55 = vld [vmem:[%s2561_s0 + $0x54] ss:$8 sps:$4 sm:$0xff] (!%p141_p7)   ;;  %v2064_v58 = vld [vmem:[%s2561_s0 + $0x50] ss:$8 sps:$4 sm:$0xff] (!%p141_p7)  }
  0x11   : > { %v2065_v59 = vld [vmem:[%s2561_s0 + $0x64] ss:$8 sps:$4 sm:$0xff] (!%p141_p7)   ;;  %v2067_v61 = vld [vmem:[%s2561_s0 + $0x60] ss:$8 sps:$4 sm:$0xff] (!%p141_p7)   ;;  %v2068_v62 = vld [vmem:[%s2561_s0 + $0x74] ss:$8 sps:$4 sm:$0xff] (!%p141_p7)  }
  0x12   : > { %v2070_v63 = vld [vmem:[%s2561_s0 + $0x70] ss:$8 sps:$4 sm:$0xff] (!%p141_p7)   ;;  %v2071_v0 = vld [vmem:[%s2561_s0 + $0x84] ss:$8 sps:$4 sm:$0xff] (!%p141_p7)   ;;  %s2344_s4 = scalar_lea.vmem (!%p141_p7), [#allocation2], %s1934_s3 }
  0x13   : > { %s2572_s20 = smov (!%p176_p8, %s175_s20), 95  ;;  %s1933_s9 = smul.u32 (%p2182_p3), 12, %s2125_s11 }
  0x14   : > { %s1868_s23 = sshll.u32 %s2572_s20, 3 }
  0x15   : > { %s2200_s26 = scalar_lea.vmem %s2562_s1, %s1868_s23  ;;  %s2422_s6 = scalar_lea.vmem (%p2182_p3), %s2563_s2, %s1933_s9 }
  0x16   : > { %v1975_v1 = vld [vmem:[%s2200_s26 + $0x4] ss:$8 sps:$4 sm:$0xff]   ;;  %v1977_v2 = vld [vmem:[%s2200_s26] ss:$8 sps:$4 sm:$0xff]   ;;  %v1978_v3 = vld [vmem:[%s2200_s26 + $0x14] ss:$8 sps:$4 sm:$0xff]  }
  0x17   : > { %665 = vmatprep.subr.bf16.mxu0 %v1975_v1  ;;  %v1980_v4 = vld [vmem:[%s2200_s26 + $0x10] ss:$8 sps:$4 sm:$0xff]   ;;  %v1981_v5 = vld [vmem:[%s2200_s26 + $0x24] ss:$8 sps:$4 sm:$0xff]   ;;  %v2001_v7 = vld [vmem:[%s2200_s26 + $0x100] ss:$8 sps:$4 sm:$0xff]  }
  0x18   : > { %666 = vmatpush1.bf16.xpose.msra.mxu0 %v1977_v2  ;;  %v1999_v6 = vld [vmem:[%s2200_s26 + $0x104] ss:$8 sps:$4 sm:$0xff]   ;;  %v2005_v8 = vld [vmem:[%s2200_s26 + $0x114] ss:$8 sps:$4 sm:$0xff]   ;;  %v1983_v9 = vld [vmem:[%s2200_s26 + $0x20] ss:$8 sps:$4 sm:$0xff]  }
  0x19   : > { %667 = vmatprep.subr.bf16.mxu0 %v1978_v3  ;;  %858 = vmatprep.subr.bf16.mxu1 %v1999_v6  ;;  %v1984_v10 = vld [vmem:[%s2200_s26 + $0x34] ss:$8 sps:$4 sm:$0xff]   ;;  %v2007_v11 = vld [vmem:[%s2200_s26 + $0x110] ss:$8 sps:$4 sm:$0xff]   ;;  %v2011_v12 = vld [vmem:[%s2200_s26 + $0x124] ss:$8 sps:$4 sm:$0xff]  }
  0x1a   : > { %859 = vmatpush1.bf16.xpose.msra.mxu1 %v2001_v7  ;;  %v1986_v13 = vld [vmem:[%s2200_s26 + $0x30] ss:$8 sps:$4 sm:$0xff]   ;;  %v1987_v14 = vld [vmem:[%s2200_s26 + $0x44] ss:$8 sps:$4 sm:$0xff]   ;;  %v2013_v15 = vld [vmem:[%s2200_s26 + $0x120] ss:$8 sps:$4 sm:$0xff]  }
  0x1b   : > { %860 = vmatprep.subr.bf16.mxu1 %v2005_v8  ;;  %v2017_v16 = vld [vmem:[%s2200_s26 + $0x134] ss:$8 sps:$4 sm:$0xff]   ;;  %v1989_v17 = vld [vmem:[%s2200_s26 + $0x40] ss:$8 sps:$4 sm:$0xff]   ;;  %v2019_v19 = vld [vmem:[%s2200_s26 + $0x130] ss:$8 sps:$4 sm:$0xff]  }
  0x1c   : > { %v1990_v18 = vld [vmem:[%s2200_s26 + $0x54] ss:$8 sps:$4 sm:$0xff]   ;;  %v2023_v20 = vld [vmem:[%s2200_s26 + $0x144] ss:$8 sps:$4 sm:$0xff]   ;;  %v1992_v21 = vld [vmem:[%s2200_s26 + $0x50] ss:$8 sps:$4 sm:$0xff]  }
  0x1d   : > { %v1993_v22 = vld [vmem:[%s2200_s26 + $0x64] ss:$8 sps:$4 sm:$0xff]   ;;  %v2025_v23 = vld [vmem:[%s2200_s26 + $0x140] ss:$8 sps:$4 sm:$0xff]   ;;  %v2029_v24 = vld [vmem:[%s2200_s26 + $0x154] ss:$8 sps:$4 sm:$0xff]  }
  0x1e   : > { %v1995_v25 = vld [vmem:[%s2200_s26 + $0x60] ss:$8 sps:$4 sm:$0xff]   ;;  %v1996_v26 = vld [vmem:[%s2200_s26 + $0x74] ss:$8 sps:$4 sm:$0xff]   ;;  %v2031_v27 = vld [vmem:[%s2200_s26 + $0x150] ss:$8 sps:$4 sm:$0xff]  }
  0x1f   : > { %v2035_v28 = vld [vmem:[%s2200_s26 + $0x164] ss:$8 sps:$4 sm:$0xff]   ;;  %v1998_v29 = vld [vmem:[%s2200_s26 + $0x70] ss:$8 sps:$4 sm:$0xff]   ;;  %v2037_v31 = vld [vmem:[%s2200_s26 + $0x160] ss:$8 sps:$4 sm:$0xff]  }
  0x20   : > { %668 = vmatpush1.bf16.xpose.msra.mxu0 %v1980_v4  ;;  %v2002_v30 = vld [vmem:[%s2200_s26 + $0x84] ss:$8 sps:$4 sm:$0xff]   ;;  %v2041_v32 = vld [vmem:[%s2200_s26 + $0x174] ss:$8 sps:$4 sm:$0xff]   ;;  %v2004_v33 = vld [vmem:[%s2200_s26 + $0x80] ss:$8 sps:$4 sm:$0xff]  }
  0x21   : > { %669 = vmatprep.subr.bf16.mxu0 %v1981_v5  ;;  %v2008_v34 = vld [vmem:[%s2200_s26 + $0x94] ss:$8 sps:$4 sm:$0xff]   ;;  %v2043_v35 = vld [vmem:[%s2200_s26 + $0x170] ss:$8 sps:$4 sm:$0xff]   ;;  %v2014_v37 = vld [vmem:[%s2200_s26 + $0xa4] ss:$8 sps:$4 sm:$0xff]  }
  0x22   : > { %861 = vmatpush1.bf16.xpose.msra.mxu1 %v2007_v11  ;;  %v2010_v36 = vld [vmem:[%s2200_s26 + $0x90] ss:$8 sps:$4 sm:$0xff]   ;;  %v2016_v40 = vld [vmem:[%s2200_s26 + $0xa0] ss:$8 sps:$4 sm:$0xff]   ;;  %v2020_v41 = vld [vmem:[%s2200_s26 + $0xb4] ss:$8 sps:$4 sm:$0xff]  }
  0x23   : > { %862 = vmatprep.subr.bf16.mxu1 %v2011_v12  ;;  %v2022_v44 = vld [vmem:[%s2200_s26 + $0xb0] ss:$8 sps:$4 sm:$0xff]   ;;  %v2026_v45 = vld [vmem:[%s2200_s26 + $0xc4] ss:$8 sps:$4 sm:$0xff]   ;;  %v2028_v48 = vld [vmem:[%s2200_s26 + $0xc0] ss:$8 sps:$4 sm:$0xff]  }
  0x24   : > { %v2032_v49 = vld [vmem:[%s2200_s26 + $0xd4] ss:$8 sps:$4 sm:$0xff]   ;;  %v2034_v52 = vld [vmem:[%s2200_s26 + $0xd0] ss:$8 sps:$4 sm:$0xff]   ;;  %v2038_v53 = vld [vmem:[%s2200_s26 + $0xe4] ss:$8 sps:$4 sm:$0xff]  }
  0x25   : > { %v2040_v56 = vld [vmem:[%s2200_s26 + $0xe0] ss:$8 sps:$4 sm:$0xff]   ;;  %v2044_v57 = vld [vmem:[%s2200_s26 + $0xf4] ss:$8 sps:$4 sm:$0xff]   ;;  %v2046_v60 = vld [vmem:[%s2200_s26 + $0xf0] ss:$8 sps:$4 sm:$0xff]  }
  0x26   : > { %v2073_v1 = vld [vmem:[%s2561_s0 + $0x80] ss:$8 sps:$4 sm:$0xff]   ;;  %v2074_v2 = vld [vmem:[%s2561_s0 + $0x94] ss:$8 sps:$4 sm:$0xff]   ;;  %v2076_v3 = vld [vmem:[%s2561_s0 + $0x90] ss:$8 sps:$4 sm:$0xff]  }
  0x27   : > { %v2077_v4 = vld [vmem:[%s2561_s0 + $0xa4] ss:$8 sps:$4 sm:$0xff]   ;;  %v2079_v5 = vld [vmem:[%s2561_s0 + $0xa0] ss:$8 sps:$4 sm:$0xff]   ;;  %v2080_v6 = vld [vmem:[%s2561_s0 + $0xb4] ss:$8 sps:$4 sm:$0xff]  }
  0x28   : > { %670 = vmatpush1.bf16.xpose.msra.mxu0 %v1983_v9  ;;  %v2082_v7 = vld [vmem:[%s2561_s0 + $0xb0] ss:$8 sps:$4 sm:$0xff]   ;;  %v2083_v8 = vld [vmem:[%s2561_s0 + $0xc4] ss:$8 sps:$4 sm:$0xff]   ;;  %v2085_v9 = vld [vmem:[%s2561_s0 + $0xc0] ss:$8 sps:$4 sm:$0xff]  }
  0x29   : > { %671 = vmatprep.subr.bf16.mxu0 %v1984_v10  ;;  %v2086_v10 = vld [vmem:[%s2561_s0 + $0xd4] ss:$8 sps:$4 sm:$0xff]   ;;  %v2088_v11 = vld [vmem:[%s2561_s0 + $0xd0] ss:$8 sps:$4 sm:$0xff]   ;;  %v2089_v12 = vld [vmem:[%s2561_s0 + $0xe4] ss:$8 sps:$4 sm:$0xff]  }
  0x2a   : > { %863 = vmatpush1.bf16.xpose.msra.mxu1 %v2013_v15  ;;  %v2094_v15 = vld [vmem:[%s2561_s0 + $0xf0] ss:$8 sps:$4 sm:$0xff]  }
  0x2b   : > { %864 = vmatprep.subr.bf16.mxu1 %v2017_v16 }
  0x30   : > { %672 = vmatpush1.bf16.xpose.msra.mxu0 %v1986_v13  ;;  %v2091_v13 = vld [vmem:[%s2561_s0 + $0xe0] ss:$8 sps:$4 sm:$0xff]  }
  0x31   : > { %673 = vmatprep.subr.bf16.mxu0 %v1987_v14  ;;  %v2092_v14 = vld [vmem:[%s2561_s0 + $0xf4] ss:$8 sps:$4 sm:$0xff]  }
  0x32   : > { %865 = vmatpush1.bf16.xpose.msra.mxu1 %v2019_v19 }
  0x33   : > { %866 = vmatprep.subr.bf16.mxu1 %v2023_v20 }
  0x38   : > { %674 = vmatpush1.bf16.xpose.msra.mxu0 %v1989_v17 }
  0x39   : > { %675 = vmatprep.subr.bf16.mxu0 %v1990_v18 }
  0x3a   : > { %867 = vmatpush1.bf16.xpose.msra.mxu1 %v2025_v23 }
  0x3b   : > { %868 = vmatprep.subr.bf16.mxu1 %v2029_v24 }
  0x40   : > { %676 = vmatpush1.bf16.xpose.msra.mxu0 %v1992_v21 }
  0x41   : > { %677 = vmatprep.subr.bf16.mxu0 %v1993_v22 }
  0x42   : > { %869 = vmatpush1.bf16.xpose.msra.mxu1 %v2031_v27 }
  0x43   : > { %870 = vmatprep.subr.bf16.mxu1 %v2035_v28 }
  0x48   : > { %678 = vmatpush1.bf16.xpose.msra.mxu0 %v1995_v25 }
  0x49   : > { %679 = vmatprep.subr.bf16.mxu0 %v1996_v26 }
  0x4a   : > { %871 = vmatpush1.bf16.xpose.msra.mxu1 %v2037_v31 }
  0x4b   : > { %872 = vmatprep.subr.bf16.mxu1 %v2041_v32 }
  0x50   : > { %680 = vmatpush1.bf16.xpose.msra.mxu0 %v1998_v29 }
  0x51   : > { %681 = vmatprep.subr.bf16.mxu0 %v2002_v30 }
  0x52   : > { %873 = vmatpush1.bf16.xpose.msra.mxu1 %v2043_v35 }
  0x58   : > { %682 = vmatpush1.bf16.xpose.msra.mxu0 %v2004_v33 }
  0x59   : > { %683 = vmatprep.subr.bf16.mxu0 %v2008_v34  ;;  %891 = vmatmul.mubr.bf16.vlgmr.msra.gmra.mrb[0].mxu1 %v2047_v38 }
  0x5a   : > { %898 = vmatprep.mubr.bf16.mxu1 %v2050_v39 }
  0x60   : > { %684 = vmatpush1.bf16.xpose.msra.mxu0 %v2010_v36 }
  0x61   : > { %685 = vmatprep.subr.bf16.mxu0 %v2014_v37  ;;  %899 = vmatmul.mubr.bf16.gmra.mrb[4].mxu1 %v2052_v42 }
  0x62   : > { %906 = vmatprep.mubr.bf16.mxu1 %v2053_v43 }
  0x68   : > { %686 = vmatpush1.bf16.xpose.msra.mxu0 %v2016_v40 }
  0x69   : > { %687 = vmatprep.subr.bf16.mxu0 %v2020_v41  ;;  %907 = vmatmul.mubr.bf16.gmra.mrb[8].mxu1 %v2055_v46 }
  0x6a   : > { %914 = vmatprep.mubr.bf16.mxu1 %v2056_v47 }
  0x70   : > { %688 = vmatpush1.bf16.xpose.msra.mxu0 %v2022_v44 }
  0x71   : > { %689 = vmatprep.subr.bf16.mxu0 %v2026_v45  ;;  %915 = vmatmul.mubr.bf16.gmra.mrb[12].mxu1 %v2058_v50 }
  0x72   : > { %922 = vmatprep.mubr.bf16.mxu1 %v2059_v51 }
  0x78   : > { %690 = vmatpush1.bf16.xpose.msra.mxu0 %v2028_v48 }
  0x79   : > { %691 = vmatprep.subr.bf16.mxu0 %v2032_v49  ;;  %923 = vmatmul.mubr.bf16.gmra.mrb[16].mxu1 %v2061_v54 }
  0x7a   : > { %930 = vmatprep.mubr.bf16.mxu1 %v2062_v55 }
  0x80   : > { %692 = vmatpush1.bf16.xpose.msra.mxu0 %v2034_v52 }
  0x81   : > { %693 = vmatprep.subr.bf16.mxu0 %v2038_v53  ;;  %931 = vmatmul.mubr.bf16.gmra.mrb[20].mxu1 %v2064_v58 }
  0x82   : > { %938 = vmatprep.mubr.bf16.mxu1 %v2065_v59 }
  0x88   : > { %694 = vmatpush1.bf16.xpose.msra.mxu0 %v2040_v56 }
  0x89   : > { %695 = vmatprep.subr.bf16.mxu0 %v2044_v57  ;;  %939 = vmatmul.mubr.bf16.gmra.mrb[24].mxu1 %v2067_v61 }
  0x8a   : > { %946 = vmatprep.mubr.bf16.mxu1 %v2068_v62 }
  0x90   : > { %696 = vmatpush1.bf16.xpose.msra.mxu0 %v2046_v60 }
  0x91   : > { %947 = vmatmul.mubr.bf16.gmra.mrb[28].mxu1 %v2070_v63 }
  0x92   : > { %954 = vmatprep.mubr.bf16.mxu1 %v2071_v0 }
  0x97   : > { %698 = vmatmul.mubr.bf16.vlgmr.msra.gmra.mrb[0].mxu0 %v2047_v38 }
  0x98   : > { %707 = vmatprep.mubr.bf16.mxu0 %v2050_v39 }
  0x99   : > { %955 = vmatmul.mubr.bf16.gmra.mrb[32].mxu1 %v2073_v1 }
  0x9a   : > { %962 = vmatprep.mubr.bf16.mxu1 %v2074_v2 }
  0x9f   : > { %708 = vmatmul.mubr.bf16.gmra.mrb[4].mxu0 %v2052_v42 }
  0xa0   : > { %717 = vmatprep.mubr.bf16.mxu0 %v2053_v43 }
  0xa1   : > { %963 = vmatmul.mubr.bf16.gmra.mrb[36].mxu1 %v2076_v3 }
  0xa2   : > { %970 = vmatprep.mubr.bf16.mxu1 %v2077_v4 }
  0xa7   : > { %718 = vmatmul.mubr.bf16.gmra.mrb[8].mxu0 %v2055_v46 }
  0xa8   : > { %727 = vmatprep.mubr.bf16.mxu0 %v2056_v47 }
  0xa9   : > { %971 = vmatmul.mubr.bf16.gmra.mrb[40].mxu1 %v2079_v5 }
  0xaa   : > { %978 = vmatprep.mubr.bf16.mxu1 %v2080_v6 }
  0xaf   : > { %728 = vmatmul.mubr.bf16.gmra.mrb[12].mxu0 %v2058_v50 }
  0xb0   : > { %737 = vmatprep.mubr.bf16.mxu0 %v2059_v51 }
  0xb1   : > { %979 = vmatmul.mubr.bf16.gmra.mrb[44].mxu1 %v2082_v7 }
  0xb2   : > { %986 = vmatprep.mubr.bf16.mxu1 %v2083_v8 }
  0xb7   : > { %738 = vmatmul.mubr.bf16.gmra.mrb[16].mxu0 %v2061_v54 }
  0xb8   : > { %747 = vmatprep.mubr.bf16.mxu0 %v2062_v55 }
  0xb9   : > { %987 = vmatmul.mubr.bf16.gmra.mrb[48].mxu1 %v2085_v9 }
  0xba   : > { %994 = vmatprep.mubr.bf16.mxu1 %v2086_v10 }
  0xbf   : > { %748 = vmatmul.mubr.bf16.gmra.mrb[20].mxu0 %v2064_v58 }
  0xc0   : > { %757 = vmatprep.mubr.bf16.mxu0 %v2065_v59 }
  0xc1   : > { %995 = vmatmul.mubr.bf16.gmra.mrb[52].mxu1 %v2088_v11 }
  0xc2   : > { %1002 = vmatprep.mubr.bf16.mxu1 %v2089_v12 }
  0xc7   : > { %758 = vmatmul.mubr.bf16.gmra.mrb[24].mxu0 %v2067_v61 }
  0xc8   : > { %767 = vmatprep.mubr.bf16.mxu0 %v2068_v62 }
  0xc9   : > { %1003 = vmatmul.mubr.bf16.gmra.mrb[56].mxu1 %v2091_v13 }
  0xca   : > { %1010 = vmatprep.mubr.bf16.mxu1 %v2092_v14 }
  0xcf   : > { %768 = vmatmul.mubr.bf16.gmra.mrb[28].mxu0 %v2070_v63 }
  0xd0   : > { %777 = vmatprep.mubr.bf16.mxu0 %v2071_v0 }
  0xd1   : > { %1011 = vmatmul.mubr.bf16.gmra.mrb[60].mxu1 %v2094_v15 }
  0xd7   : > { %778 = vmatmul.mubr.bf16.gmra.mrb[32].mxu0 %v2073_v1 }
  0xd8   : > { %787 = vmatprep.mubr.bf16.mxu0 %v2074_v2 }
  0xdf   : > { %788 = vmatmul.mubr.bf16.gmra.mrb[36].mxu0 %v2076_v3 }
  0xe0   : > { %797 = vmatprep.mubr.bf16.mxu0 %v2077_v4 }
  0xe7   : > { %798 = vmatmul.mubr.bf16.gmra.mrb[40].mxu0 %v2079_v5 }
  0xe8   : > { %807 = vmatprep.mubr.bf16.mxu0 %v2080_v6 }
  0xef   : > { %808 = vmatmul.mubr.bf16.gmra.mrb[44].mxu0 %v2082_v7 }
  0xf0   : > { %817 = vmatprep.mubr.bf16.mxu0 %v2083_v8 }
  0xf7   : > { %818 = vmatmul.mubr.bf16.gmra.mrb[48].mxu0 %v2085_v9 }
  0xf8   : > { %827 = vmatprep.mubr.bf16.mxu0 %v2086_v10 }
  0xff   : > { %828 = vmatmul.mubr.bf16.gmra.mrb[52].mxu0 %v2088_v11 }
 0x100   : > { %837 = vmatprep.mubr.bf16.mxu0 %v2089_v12 }
 0x107   : > { %838 = vmatmul.mubr.bf16.gmra.mrb[56].mxu0 %v2091_v13 }
 0x108   : > { %847 = vmatprep.mubr.bf16.mxu0 %v2092_v14 }
 0x10f   : > { %848 = vmatmul.mubr.bf16.gmra.mrb[60].mxu0 %v2094_v15 }
 0x12c   : > { %v892_v16 = vpop.f32.mrb[0].mxu1 }
 0x12d   : > { %v1870_v17 = vpack.c.bf16 %v892_v16, %v892_v16  ;;  %v894_v18 = vpop.f32.mrb[1].mxu1 }
 0x12e   : > { %v895_v19 = vpop.f32.mrb[2].mxu1 }
 0x12f   : > { %1340 = vst [vmem:[%s2344_s4 + $0x8] sm:$0xf] %v1870_v17  ;;  %v1872_v20 = vpack.c.bf16 %v895_v19, %v895_v19  ;;  %v897_v21 = vpop.f32.mrb[3].mxu1 }
 0x131   : > { %1342 = vst [vmem:[%s2344_s4 + $0x14] sm:$0xf] %v1872_v20 }
 0x134   : > { %v900_v22 = vpop.f32.mrb[4].mxu1 }
 0x135   : > { %v1874_v23 = vpack.c.bf16 %v900_v22, %v900_v22  ;;  %v902_v24 = vpop.f32.mrb[5].mxu1 }
 0x136   : > { %v903_v25 = vpop.f32.mrb[6].mxu1 }
 0x137   : > { %1344 = vst [vmem:[%s2344_s4 + $0x20] sm:$0xf] %v1874_v23  ;;  %v1876_v26 = vpack.c.bf16 %v903_v25, %v903_v25  ;;  %v905_v27 = vpop.f32.mrb[7].mxu1 }
 0x139   : > { %1346 = vst [vmem:[%s2344_s4 + $0x2c] sm:$0xf] %v1876_v26 }
 0x13c   : > { %v908_v28 = vpop.f32.mrb[8].mxu1 }
 0x13d   : > { %v1878_v29 = vpack.c.bf16 %v908_v28, %v908_v28  ;;  %v910_v30 = vpop.f32.mrb[9].mxu1 }
 0x13e   : > { %v911_v31 = vpop.f32.mrb[10].mxu1 }
 0x13f   : > { %1348 = vst [vmem:[%s2344_s4 + $0x38] sm:$0xf] %v1878_v29  ;;  %v1880_v32 = vpack.c.bf16 %v911_v31, %v911_v31  ;;  %v913_v33 = vpop.f32.mrb[11].mxu1 }
 0x141   : > { %1350 = vst [vmem:[%s2344_s4 + $0x44] sm:$0xf] %v1880_v32 }
 0x144   : > { %v916_v34 = vpop.f32.mrb[12].mxu1 }
 0x145   : > { %v1882_v35 = vpack.c.bf16 %v916_v34, %v916_v34  ;;  %v918_v36 = vpop.f32.mrb[13].mxu1 }
 0x146   : > { %v919_v37 = vpop.f32.mrb[14].mxu1 }
 0x147   : > { %1352 = vst [vmem:[%s2344_s4 + $0x50] sm:$0xf] %v1882_v35  ;;  %v1884_v38 = vpack.c.bf16 %v919_v37, %v919_v37  ;;  %v921_v39 = vpop.f32.mrb[15].mxu1 }
 0x149   : > { %1354 = vst [vmem:[%s2344_s4 + $0x5c] sm:$0xf] %v1884_v38 }
 0x14c   : > { %v924_v40 = vpop.f32.mrb[16].mxu1 }
 0x14d   : > { %v1886_v41 = vpack.c.bf16 %v924_v40, %v924_v40  ;;  %v926_v42 = vpop.f32.mrb[17].mxu1 }
 0x14e   : > { %v927_v43 = vpop.f32.mrb[18].mxu1 }
 0x14f   : > { %1356 = vst [vmem:[%s2344_s4 + $0x68] sm:$0xf] %v1886_v41  ;;  %v1888_v44 = vpack.c.bf16 %v927_v43, %v927_v43  ;;  %v929_v45 = vpop.f32.mrb[19].mxu1 }
 0x151   : > { %1358 = vst [vmem:[%s2344_s4 + $0x74] sm:$0xf] %v1888_v44 }
 0x154   : > { %v932_v46 = vpop.f32.mrb[20].mxu1 }
 0x155   : > { %v1890_v47 = vpack.c.bf16 %v932_v46, %v932_v46  ;;  %v934_v48 = vpop.f32.mrb[21].mxu1 }
 0x156   : > { %v935_v49 = vpop.f32.mrb[22].mxu1 }
 0x157   : > { %1360 = vst [vmem:[%s2344_s4 + $0x80] sm:$0xf] %v1890_v47  ;;  %v1892_v50 = vpack.c.bf16 %v935_v49, %v935_v49  ;;  %v937_v51 = vpop.f32.mrb[23].mxu1 }
 0x159   : > { %1362 = vst [vmem:[%s2344_s4 + $0x8c] sm:$0xf] %v1892_v50 }
 0x15c   : > { %v940_v52 = vpop.f32.mrb[24].mxu1 }
 0x15d   : > { %v1894_v53 = vpack.c.bf16 %v940_v52, %v940_v52  ;;  %v942_v54 = vpop.f32.mrb[25].mxu1 }
 0x15e   : > { %v943_v55 = vpop.f32.mrb[26].mxu1 }
 0x15f   : > { %1364 = vst [vmem:[%s2344_s4 + $0x98] sm:$0xf] %v1894_v53  ;;  %v1896_v56 = vpack.c.bf16 %v943_v55, %v943_v55  ;;  %v945_v57 = vpop.f32.mrb[27].mxu1 }
 0x161   : > { %1366 = vst [vmem:[%s2344_s4 + $0xa4] sm:$0xf] %v1896_v56 }
 0x164   : > { %v948_v63 = vpop.f32.mrb[28].mxu1 }
 0x165   : > { %v1898_v1 = vpack.c.bf16 %v948_v63, %v948_v63  ;;  %v950_v2 = vpop.f32.mrb[29].mxu1 }
 0x166   : > { %v951_v3 = vpop.f32.mrb[30].mxu1 }
 0x167   : > { %1368 = vst [vmem:[%s2344_s4 + $0xb0] sm:$0xf] %v1898_v1  ;;  %v1900_v4 = vpack.c.bf16 %v951_v3, %v951_v3  ;;  %v953_v5 = vpop.f32.mrb[31].mxu1 }
 0x169   : > { %1370 = vst [vmem:[%s2344_s4 + $0xbc] sm:$0xf] %v1900_v4 }
 0x16a   : > { %v699_v58 = vpop.f32.mrb[0].mxu0 }
 0x16b   : > { %v701_v59 = vpop.f32.mrb[1].mxu0 }
 0x16c   : > { %v1869_v60 = vpack.c.bf16 %v701_v59, %v699_v58  ;;  %v703_v61 = vpop.f32.mrb[2].mxu0  ;;  %v956_v11 = vpop.f32.mrb[32].mxu1 }
 0x16d   : > { %v705_v62 = vpop.f32.mrb[3].mxu0  ;;  %v1902_v13 = vpack.c.bf16 %v956_v11, %v956_v11  ;;  %v958_v14 = vpop.f32.mrb[33].mxu1 }
 0x16e   : > { %1339 = vst [vmem:[%s2344_s4] sm:$0xff] %v1869_v60  ;;  %v1871_v0 = vpack.c.bf16 %v705_v62, %v703_v61  ;;  %v959_v15 = vpop.f32.mrb[34].mxu1 }
 0x16f   : > { %1372 = vst [vmem:[%s2344_s4 + $0xc8] sm:$0xf] %v1902_v13  ;;  %v1904_v16 = vpack.c.bf16 %v959_v15, %v959_v15  ;;  %v961_v17 = vpop.f32.mrb[35].mxu1 }
 0x170   : > { %1341 = vst [vmem:[%s2344_s4 + $0xc] sm:$0xff] %v1871_v0 }
 0x171   : > { %1374 = vst [vmem:[%s2344_s4 + $0xd4] sm:$0xf] %v1904_v16 }
 0x172   : > { %v709_v6 = vpop.f32.mrb[4].mxu0 }
 0x173   : > { %v711_v7 = vpop.f32.mrb[5].mxu0 }
 0x174   : > { %v1873_v8 = vpack.c.bf16 %v711_v7, %v709_v6  ;;  %v713_v9 = vpop.f32.mrb[6].mxu0  ;;  %v964_v23 = vpop.f32.mrb[36].mxu1 }
 0x175   : > { %v715_v10 = vpop.f32.mrb[7].mxu0  ;;  %v1906_v25 = vpack.c.bf16 %v964_v23, %v964_v23  ;;  %v966_v26 = vpop.f32.mrb[37].mxu1 }
 0x176   : > { %1343 = vst [vmem:[%s2344_s4 + $0x18] sm:$0xff] %v1873_v8  ;;  %v1875_v12 = vpack.c.bf16 %v715_v10, %v713_v9  ;;  %v967_v27 = vpop.f32.mrb[38].mxu1 }
 0x177   : > { %1376 = vst [vmem:[%s2344_s4 + $0xe0] sm:$0xf] %v1906_v25  ;;  %v1908_v28 = vpack.c.bf16 %v967_v27, %v967_v27  ;;  %v969_v29 = vpop.f32.mrb[39].mxu1 }
 0x178   : > { %1345 = vst [vmem:[%s2344_s4 + $0x24] sm:$0xff] %v1875_v12 }
 0x179   : > { %1378 = vst [vmem:[%s2344_s4 + $0xec] sm:$0xf] %v1908_v28 }
 0x17a   : > { %v719_v18 = vpop.f32.mrb[8].mxu0 }
 0x17b   : > { %v721_v19 = vpop.f32.mrb[9].mxu0 }
 0x17c   : > { %v1877_v20 = vpack.c.bf16 %v721_v19, %v719_v18  ;;  %v723_v21 = vpop.f32.mrb[10].mxu0  ;;  %v972_v35 = vpop.f32.mrb[40].mxu1 }
 0x17d   : > { %v725_v22 = vpop.f32.mrb[11].mxu0  ;;  %v1910_v37 = vpack.c.bf16 %v972_v35, %v972_v35  ;;  %v974_v38 = vpop.f32.mrb[41].mxu1 }
 0x17e   : > { %1347 = vst [vmem:[%s2344_s4 + $0x30] sm:$0xff] %v1877_v20  ;;  %v1879_v24 = vpack.c.bf16 %v725_v22, %v723_v21  ;;  %v975_v39 = vpop.f32.mrb[42].mxu1 }
 0x17f   : > { %1380 = vst [vmem:[%s2344_s4 + $0xf8] sm:$0xf] %v1910_v37  ;;  %v1912_v40 = vpack.c.bf16 %v975_v39, %v975_v39  ;;  %v977_v41 = vpop.f32.mrb[43].mxu1 }
 0x180   : > { %1349 = vst [vmem:[%s2344_s4 + $0x3c] sm:$0xff] %v1879_v24 }
 0x181   : > { %1382 = vst [vmem:[%s2344_s4 + $0x104] sm:$0xf] %v1912_v40 }
 0x182   : > { %v729_v30 = vpop.f32.mrb[12].mxu0 }
 0x183   : > { %v731_v31 = vpop.f32.mrb[13].mxu0 }
 0x184   : > { %v1881_v32 = vpack.c.bf16 %v731_v31, %v729_v30  ;;  %v733_v33 = vpop.f32.mrb[14].mxu0  ;;  %v980_v47 = vpop.f32.mrb[44].mxu1 }
 0x185   : > { %v735_v34 = vpop.f32.mrb[15].mxu0  ;;  %v1914_v49 = vpack.c.bf16 %v980_v47, %v980_v47  ;;  %v982_v50 = vpop.f32.mrb[45].mxu1 }
 0x186   : > { %1351 = vst [vmem:[%s2344_s4 + $0x48] sm:$0xff] %v1881_v32  ;;  %v1883_v36 = vpack.c.bf16 %v735_v34, %v733_v33  ;;  %v983_v51 = vpop.f32.mrb[46].mxu1 }
 0x187   : > { %1384 = vst [vmem:[%s2344_s4 + $0x110] sm:$0xf] %v1914_v49  ;;  %v1916_v52 = vpack.c.bf16 %v983_v51, %v983_v51  ;;  %v985_v53 = vpop.f32.mrb[47].mxu1 }
 0x188   : > { %1353 = vst [vmem:[%s2344_s4 + $0x54] sm:$0xff] %v1883_v36 }
 0x189   : > { %1386 = vst [vmem:[%s2344_s4 + $0x11c] sm:$0xf] %v1916_v52 }
 0x18a   : > { %v739_v42 = vpop.f32.mrb[16].mxu0 }
 0x18b   : > { %v741_v43 = vpop.f32.mrb[17].mxu0 }
 0x18c   : > { %v1885_v44 = vpack.c.bf16 %v741_v43, %v739_v42  ;;  %v743_v45 = vpop.f32.mrb[18].mxu0  ;;  %v988_v59 = vpop.f32.mrb[48].mxu1 }
 0x18d   : > { %v745_v46 = vpop.f32.mrb[19].mxu0  ;;  %v1918_v61 = vpack.c.bf16 %v988_v59, %v988_v59  ;;  %v990_v62 = vpop.f32.mrb[49].mxu1 }
 0x18e   : > { %1355 = vst [vmem:[%s2344_s4 + $0x60] sm:$0xff] %v1885_v44  ;;  %v1887_v48 = vpack.c.bf16 %v745_v46, %v743_v45  ;;  %v991_v63 = vpop.f32.mrb[50].mxu1 }
 0x18f   : > { %1388 = vst [vmem:[%s2344_s4 + $0x128] sm:$0xf] %v1918_v61  ;;  %v1920_v0 = vpack.c.bf16 %v991_v63, %v991_v63  ;;  %v993_v1 = vpop.f32.mrb[51].mxu1 }
 0x190   : > { %1357 = vst [vmem:[%s2344_s4 + $0x6c] sm:$0xff] %v1887_v48 }
 0x191   : > { %1390 = vst [vmem:[%s2344_s4 + $0x134] sm:$0xf] %v1920_v0 }
 0x192   : > { %v749_v54 = vpop.f32.mrb[20].mxu0 }
 0x193   : > { %v751_v55 = vpop.f32.mrb[21].mxu0 }
 0x194   : > { %v1889_v56 = vpack.c.bf16 %v751_v55, %v749_v54  ;;  %v753_v57 = vpop.f32.mrb[22].mxu0  ;;  %v996_v7 = vpop.f32.mrb[52].mxu1 }
 0x195   : > { %v755_v58 = vpop.f32.mrb[23].mxu0  ;;  %v1922_v9 = vpack.c.bf16 %v996_v7, %v996_v7  ;;  %v998_v10 = vpop.f32.mrb[53].mxu1 }
 0x196   : > { %1359 = vst [vmem:[%s2344_s4 + $0x78] sm:$0xff] %v1889_v56  ;;  %v1891_v60 = vpack.c.bf16 %v755_v58, %v753_v57  ;;  %v999_v11 = vpop.f32.mrb[54].mxu1 }
 0x197   : > { %1392 = vst [vmem:[%s2344_s4 + $0x140] sm:$0xf] %v1922_v9  ;;  %v1924_v12 = vpack.c.bf16 %v999_v11, %v999_v11  ;;  %v1001_v13 = vpop.f32.mrb[55].mxu1 }
 0x198   : > { %1361 = vst [vmem:[%s2344_s4 + $0x84] sm:$0xff] %v1891_v60 }
 0x199   : > { %1394 = vst [vmem:[%s2344_s4 + $0x14c] sm:$0xf] %v1924_v12 }
 0x19a   : > { %v759_v2 = vpop.f32.mrb[24].mxu0 }
 0x19b   : > { %v761_v3 = vpop.f32.mrb[25].mxu0 }
 0x19c   : > { %v1893_v4 = vpack.c.bf16 %v761_v3, %v759_v2  ;;  %v763_v5 = vpop.f32.mrb[26].mxu0  ;;  %v1004_v19 = vpop.f32.mrb[56].mxu1 }
 0x19d   : > { %v765_v6 = vpop.f32.mrb[27].mxu0  ;;  %v1926_v21 = vpack.c.bf16 %v1004_v19, %v1004_v19  ;;  %v1006_v22 = vpop.f32.mrb[57].mxu1  ;;  %v1436_v19 = vld [vmem:[%s2344_s4 + $0x24] sm:$0xff] (%p2182_p3) }
 0x19e   : > { %1363 = vst [vmem:[%s2344_s4 + $0x90] sm:$0xff] %v1893_v4  ;;  %v1895_v8 = vpack.c.bf16 %v765_v6, %v763_v5  ;;  %v1007_v23 = vpop.f32.mrb[58].mxu1  ;;  %v1442_v22 = vld [vmem:[%s2344_s4 + $0x48] sm:$0xff] (%p2182_p3)  ;;  %1437 = vst [vmem:[%s2422_s6 + $0x48] sm:$0xff] (%p2182_p3), %v1436_v19 }
 0x19f   : > { %1396 = vst [vmem:[%s2344_s4 + $0x158] sm:$0xf] %v1926_v21  ;;  %v1928_v24 = vpack.c.bf16 %v1007_v23, %v1007_v23  ;;  %v1009_v25 = vpop.f32.mrb[59].mxu1  ;;  %v1440_v21 = vld [vmem:[%s2344_s4 + $0x3c] sm:$0xff] (%p2182_p3)  ;;  %v1444_v23 = vld [vmem:[%s2344_s4 + $0x54] sm:$0xff] (%p2182_p3)  ;;  %1443 = vst [vmem:[%s2422_s6 + $0x90] sm:$0xff] (%p2182_p3), %v1442_v22 }
 0x1a0   : > { %1365 = vst [vmem:[%s2344_s4 + $0x9c] sm:$0xff] %v1895_v8  ;;  %1441 = vst [vmem:[%s2422_s6 + $0x78] sm:$0xff] (%p2182_p3), %v1440_v21  ;;  %v1448_v25 = vld [vmem:[%s2344_s4 + $0x6c] sm:$0xff] (%p2182_p3) }
 0x1a1   : > { %1398 = vst [vmem:[%s2344_s4 + $0x164] sm:$0xf] %v1928_v24  ;;  %v1446_v24 = vld [vmem:[%s2344_s4 + $0x60] sm:$0xff] (%p2182_p3)  ;;  %1445 = vst [vmem:[%s2422_s6 + $0xa8] sm:$0xff] (%p2182_p3), %v1444_v23 }
 0x1a2   : > { %v769_v14 = vpop.f32.mrb[28].mxu0  ;;  %1447 = vst [vmem:[%s2422_s6 + $0xc0] sm:$0xff] (%p2182_p3), %v1446_v24  ;;  %1449 = vst [vmem:[%s2422_s6 + $0xd8] sm:$0xff] (%p2182_p3), %v1448_v25 }
 0x1a3   : > { %v771_v15 = vpop.f32.mrb[29].mxu0 }
 0x1a4   : > { %v1897_v16 = vpack.c.bf16 %v771_v15, %v769_v14  ;;  %v773_v17 = vpop.f32.mrb[30].mxu0  ;;  %v1012_v31 = vpop.f32.mrb[60].mxu1 }
 0x1a5   : > { %v775_v18 = vpop.f32.mrb[31].mxu0  ;;  %v1930_v33 = vpack.c.bf16 %v1012_v31, %v1012_v31  ;;  %v1014_v34 = vpop.f32.mrb[61].mxu1 }
 0x1a6   : > { %1367 = vst [vmem:[%s2344_s4 + $0xa8] sm:$0xff] %v1897_v16  ;;  %v1899_v20 = vpack.c.bf16 %v775_v18, %v773_v17  ;;  %v1015_v35 = vpop.f32.mrb[62].mxu1  ;;  %v1430_v16 = vld [vmem:[%s2344_s4] sm:$0xff] (%p2182_p3)  ;;  %v1432_v17 = vld [vmem:[%s2344_s4 + $0xc] sm:$0xff] (%p2182_p3)  ;;  %v1434_v18 = vld [vmem:[%s2344_s4 + $0x18] sm:$0xff] (%p2182_p3) }
 0x1a7   : > { %1400 = vst [vmem:[%s2344_s4 + $0x170] sm:$0xf] %v1930_v33  ;;  %v1932_v36 = vpack.c.bf16 %v1015_v35, %v1015_v35  ;;  %v1017_v37 = vpop.f32.mrb[63].mxu1  ;;  %1431 = vst [vmem:[%s2422_s6] sm:$0xff] (%p2182_p3), %v1430_v16 }
 0x1a8   : > { %1369 = vst [vmem:[%s2344_s4 + $0xb4] sm:$0xff] %v1899_v20  ;;  %v1438_v20 = vld [vmem:[%s2344_s4 + $0x30] sm:$0xff] (%p2182_p3)  ;;  %1433 = vst [vmem:[%s2422_s6 + $0x18] sm:$0xff] (%p2182_p3), %v1432_v17 }
 0x1a9   : > { %1402 = vst [vmem:[%s2344_s4 + $0x17c] sm:$0xf] %v1932_v36  ;;  %1435 = vst [vmem:[%s2422_s6 + $0x30] sm:$0xff] (%p2182_p3), %v1434_v18 }
 0x1aa   : > { %v779_v26 = vpop.f32.mrb[32].mxu0  ;;  %1439 = vst [vmem:[%s2422_s6 + $0x60] sm:$0xff] (%p2182_p3), %v1438_v20 }
 0x1ab   : > { %v781_v27 = vpop.f32.mrb[33].mxu0 }
 0x1ac   : > { %v1901_v28 = vpack.c.bf16 %v781_v27, %v779_v26  ;;  %v783_v29 = vpop.f32.mrb[34].mxu0  ;;  %v1450_v26 = vld [vmem:[%s2344_s4 + $0x78] sm:$0xff] (%p2182_p3)  ;;  %v1452_v27 = vld [vmem:[%s2344_s4 + $0x84] sm:$0xff] (%p2182_p3) }
 0x1ad   : > { %v785_v30 = vpop.f32.mrb[35].mxu0  ;;  %1451 = vst [vmem:[%s2422_s6 + $0xf0] sm:$0xff] (%p2182_p3), %v1450_v26  ;;  %1453 = vst [vmem:[%s2422_s6 + $0x108] sm:$0xff] (%p2182_p3), %v1452_v27 }
 0x1ae   : > { %1371 = vst [vmem:[%s2344_s4 + $0xc0] sm:$0xff] %v1901_v28  ;;  %v1903_v32 = vpack.c.bf16 %v785_v30, %v783_v29  ;;  %v1454_v28 = vld [vmem:[%s2344_s4 + $0x90] sm:$0xff] (%p2182_p3)  ;;  %v1456_v29 = vld [vmem:[%s2344_s4 + $0x9c] sm:$0xff] (%p2182_p3)  ;;  %v1458_v30 = vld [vmem:[%s2344_s4 + $0xa8] sm:$0xff] (%p2182_p3) }
 0x1af   : > { %1455 = vst [vmem:[%s2422_s6 + $0x120] sm:$0xff] (%p2182_p3), %v1454_v28  ;;  %1457 = vst [vmem:[%s2422_s6 + $0x138] sm:$0xff] (%p2182_p3), %v1456_v29  ;;  %v1460_v31 = vld [vmem:[%s2344_s4 + $0xb4] sm:$0xff] (%p2182_p3) }
 0x1b0   : > { %1373 = vst [vmem:[%s2344_s4 + $0xcc] sm:$0xff] %v1903_v32  ;;  %1459 = vst [vmem:[%s2422_s6 + $0x150] sm:$0xff] (%p2182_p3), %v1458_v30 }
 0x1b1   : > { %1461 = vst [vmem:[%s2422_s6 + $0x168] sm:$0xff] (%p2182_p3), %v1460_v31 }
 0x1b2   : > { %v789_v38 = vpop.f32.mrb[36].mxu0 }
 0x1b3   : > { %v791_v39 = vpop.f32.mrb[37].mxu0 }
 0x1b4   : > { %v1905_v40 = vpack.c.bf16 %v791_v39, %v789_v38  ;;  %v793_v41 = vpop.f32.mrb[38].mxu0 }
 0x1b5   : > { %v795_v42 = vpop.f32.mrb[39].mxu0  ;;  %v1462_v32 = vld [vmem:[%s2344_s4 + $0xc0] sm:$0xff] (%p2182_p3) }
 0x1b6   : > { %1375 = vst [vmem:[%s2344_s4 + $0xd8] sm:$0xff] %v1905_v40  ;;  %v1907_v43 = vpack.c.bf16 %v795_v42, %v793_v41  ;;  %1463 = vst [vmem:[%s2422_s6 + $0x180] sm:$0xff] (%p2182_p3), %v1462_v32 }
 0x1b7   : > { %v1464_v33 = vld [vmem:[%s2344_s4 + $0xcc] sm:$0xff] (%p2182_p3) }
 0x1b8   : > { %1377 = vst [vmem:[%s2344_s4 + $0xe4] sm:$0xff] %v1907_v43  ;;  %1465 = vst [vmem:[%s2422_s6 + $0x198] sm:$0xff] (%p2182_p3), %v1464_v33 }
 0x1ba   : > { %v799_v44 = vpop.f32.mrb[40].mxu0 }
 0x1bb   : > { %v801_v45 = vpop.f32.mrb[41].mxu0 }
 0x1bc   : > { %v1909_v46 = vpack.c.bf16 %v801_v45, %v799_v44  ;;  %v803_v47 = vpop.f32.mrb[42].mxu0 }
 0x1bd   : > { %v805_v48 = vpop.f32.mrb[43].mxu0  ;;  %v1466_v34 = vld [vmem:[%s2344_s4 + $0xd8] sm:$0xff] (%p2182_p3) }
 0x1be   : > { %1379 = vst [vmem:[%s2344_s4 + $0xf0] sm:$0xff] %v1909_v46  ;;  %v1911_v49 = vpack.c.bf16 %v805_v48, %v803_v47  ;;  %1467 = vst [vmem:[%s2422_s6 + $0x1b0] sm:$0xff] (%p2182_p3), %v1466_v34  ;;  %v1802_v48 = vld [vmem:[%s2344_s4 + $0x8] sm:$0xf] (%p2182_p3) }
 0x1bf   : > { %v1468_v35 = vld [vmem:[%s2344_s4 + $0xe4] sm:$0xff] (%p2182_p3)  ;;  %1803 = vst [vmem:[%s2422_s6 + $0x8] sm:$0xf] (%p2182_p3), %v1802_v48 }
 0x1c0   : > { %1381 = vst [vmem:[%s2344_s4 + $0xfc] sm:$0xff] %v1911_v49  ;;  %1469 = vst [vmem:[%s2422_s6 + $0x1c8] sm:$0xff] (%p2182_p3), %v1468_v35  ;;  %v1804_v49 = vld [vmem:[%s2344_s4 + $0x14] sm:$0xf] (%p2182_p3) }
 0x1c1   : > { %1805 = vst [vmem:[%s2422_s6 + $0x20] sm:$0xf] (%p2182_p3), %v1804_v49 }
 0x1c2   : > { %v809_v50 = vpop.f32.mrb[44].mxu0 }
 0x1c3   : > { %v811_v51 = vpop.f32.mrb[45].mxu0 }
 0x1c4   : > { %v1913_v52 = vpack.c.bf16 %v811_v51, %v809_v50  ;;  %v813_v53 = vpop.f32.mrb[46].mxu0  ;;  %v1806_v50 = vld [vmem:[%s2344_s4 + $0x20] sm:$0xf] (%p2182_p3)  ;;  %v1808_v51 = vld [vmem:[%s2344_s4 + $0x2c] sm:$0xf] (%p2182_p3) }
 0x1c5   : > { %v815_v54 = vpop.f32.mrb[47].mxu0  ;;  %v1470_v36 = vld [vmem:[%s2344_s4 + $0xf0] sm:$0xff] (%p2182_p3)  ;;  %1807 = vst [vmem:[%s2422_s6 + $0x38] sm:$0xf] (%p2182_p3), %v1806_v50  ;;  %1809 = vst [vmem:[%s2422_s6 + $0x50] sm:$0xf] (%p2182_p3), %v1808_v51 }
 0x1c6   : > { %1383 = vst [vmem:[%s2344_s4 + $0x108] sm:$0xff] %v1913_v52  ;;  %v1915_v55 = vpack.c.bf16 %v815_v54, %v813_v53  ;;  %1471 = vst [vmem:[%s2422_s6 + $0x1e0] sm:$0xff] (%p2182_p3), %v1470_v36  ;;  %v1810_v52 = vld [vmem:[%s2344_s4 + $0x38] sm:$0xf] (%p2182_p3)  ;;  %v1812_v53 = vld [vmem:[%s2344_s4 + $0x44] sm:$0xf] (%p2182_p3) }
 0x1c7   : > { %v1472_v37 = vld [vmem:[%s2344_s4 + $0xfc] sm:$0xff] (%p2182_p3)  ;;  %v1814_v54 = vld [vmem:[%s2344_s4 + $0x50] sm:$0xf] (%p2182_p3)  ;;  %1811 = vst [vmem:[%s2422_s6 + $0x68] sm:$0xf] (%p2182_p3), %v1810_v52 }
 0x1c8   : > { %1385 = vst [vmem:[%s2344_s4 + $0x114] sm:$0xff] %v1915_v55  ;;  %1473 = vst [vmem:[%s2422_s6 + $0x1f8] sm:$0xff] (%p2182_p3), %v1472_v37  ;;  %v1816_v55 = vld [vmem:[%s2344_s4 + $0x5c] sm:$0xf] (%p2182_p3) }
 0x1c9   : > { %1813 = vst [vmem:[%s2422_s6 + $0x80] sm:$0xf] (%p2182_p3), %v1812_v53  ;;  %1815 = vst [vmem:[%s2422_s6 + $0x98] sm:$0xf] (%p2182_p3), %v1814_v54 }
 0x1ca   : > { %v819_v56 = vpop.f32.mrb[48].mxu0  ;;  %1817 = vst [vmem:[%s2422_s6 + $0xb0] sm:$0xf] (%p2182_p3), %v1816_v55 }
 0x1cb   : > { %v821_v57 = vpop.f32.mrb[49].mxu0 }
 0x1cc   : > { %v1917_v58 = vpack.c.bf16 %v821_v57, %v819_v56  ;;  %v823_v59 = vpop.f32.mrb[50].mxu0  ;;  %v1818_v56 = vld [vmem:[%s2344_s4 + $0x68] sm:$0xf] (%p2182_p3)  ;;  %v1820_v57 = vld [vmem:[%s2344_s4 + $0x74] sm:$0xf] (%p2182_p3) }
 0x1cd   : > { %v825_v60 = vpop.f32.mrb[51].mxu0  ;;  %v1474_v38 = vld [vmem:[%s2344_s4 + $0x108] sm:$0xff] (%p2182_p3)  ;;  %1819 = vst [vmem:[%s2422_s6 + $0xc8] sm:$0xf] (%p2182_p3), %v1818_v56  ;;  %1821 = vst [vmem:[%s2422_s6 + $0xe0] sm:$0xf] (%p2182_p3), %v1820_v57 }
 0x1ce   : > { %1387 = vst [vmem:[%s2344_s4 + $0x120] sm:$0xff] %v1917_v58  ;;  %v1919_v61 = vpack.c.bf16 %v825_v60, %v823_v59  ;;  %1475 = vst [vmem:[%s2422_s6 + $0x210] sm:$0xff] (%p2182_p3), %v1474_v38  ;;  %v1822_v58 = vld [vmem:[%s2344_s4 + $0x80] sm:$0xf] (%p2182_p3)  ;;  %v1824_v59 = vld [vmem:[%s2344_s4 + $0x8c] sm:$0xf] (%p2182_p3) }
 0x1cf   : > { %v1476_v39 = vld [vmem:[%s2344_s4 + $0x114] sm:$0xff] (%p2182_p3)  ;;  %1823 = vst [vmem:[%s2422_s6 + $0xf8] sm:$0xf] (%p2182_p3), %v1822_v58  ;;  %1825 = vst [vmem:[%s2422_s6 + $0x110] sm:$0xf] (%p2182_p3), %v1824_v59 }
 0x1d0   : > { %1389 = vst [vmem:[%s2344_s4 + $0x12c] sm:$0xff] %v1919_v61  ;;  %1477 = vst [vmem:[%s2422_s6 + $0x228] sm:$0xff] (%p2182_p3), %v1476_v39  ;;  %v1826_v60 = vld [vmem:[%s2344_s4 + $0x98] sm:$0xf] (%p2182_p3)  ;;  %v1828_v61 = vld [vmem:[%s2344_s4 + $0xa4] sm:$0xf] (%p2182_p3) }
 0x1d1   : > { %1827 = vst [vmem:[%s2422_s6 + $0x128] sm:$0xf] (%p2182_p3), %v1826_v60  ;;  %1829 = vst [vmem:[%s2422_s6 + $0x140] sm:$0xf] (%p2182_p3), %v1828_v61 }
 0x1d2   : > { %v829_v62 = vpop.f32.mrb[52].mxu0 }
 0x1d3   : > { %v831_v63 = vpop.f32.mrb[53].mxu0 }
 0x1d4   : > { %v1921_v0 = vpack.c.bf16 %v831_v63, %v829_v62  ;;  %v833_v1 = vpop.f32.mrb[54].mxu0  ;;  %v1830_v62 = vld [vmem:[%s2344_s4 + $0xb0] sm:$0xf] (%p2182_p3)  ;;  %v1832_v63 = vld [vmem:[%s2344_s4 + $0xbc] sm:$0xf] (%p2182_p3) }
 0x1d5   : > { %v835_v2 = vpop.f32.mrb[55].mxu0  ;;  %v1478_v40 = vld [vmem:[%s2344_s4 + $0x120] sm:$0xff] (%p2182_p3)  ;;  %1831 = vst [vmem:[%s2422_s6 + $0x158] sm:$0xf] (%p2182_p3), %v1830_v62  ;;  %1833 = vst [vmem:[%s2422_s6 + $0x170] sm:$0xf] (%p2182_p3), %v1832_v63 }
 0x1d6   : > { %1391 = vst [vmem:[%s2344_s4 + $0x138] sm:$0xff] %v1921_v0  ;;  %v1923_v3 = vpack.c.bf16 %v835_v2, %v833_v1  ;;  %1479 = vst [vmem:[%s2422_s6 + $0x240] sm:$0xff] (%p2182_p3), %v1478_v40  ;;  %v1834_v0 = vld [vmem:[%s2344_s4 + $0xc8] sm:$0xf] (%p2182_p3)  ;;  %v1836_v1 = vld [vmem:[%s2344_s4 + $0xd4] sm:$0xf] (%p2182_p3) }
 0x1d7   : > { %v1480_v41 = vld [vmem:[%s2344_s4 + $0x12c] sm:$0xff] (%p2182_p3)  ;;  %v1838_v2 = vld [vmem:[%s2344_s4 + $0xe0] sm:$0xf] (%p2182_p3)  ;;  %1835 = vst [vmem:[%s2422_s6 + $0x188] sm:$0xf] (%p2182_p3), %v1834_v0 }
 0x1d8   : > { %1393 = vst [vmem:[%s2344_s4 + $0x144] sm:$0xff] %v1923_v3  ;;  %1481 = vst [vmem:[%s2422_s6 + $0x258] sm:$0xff] (%p2182_p3), %v1480_v41  ;;  %v1840_v3 = vld [vmem:[%s2344_s4 + $0xec] sm:$0xf] (%p2182_p3) }
 0x1d9   : > { %1837 = vst [vmem:[%s2422_s6 + $0x1a0] sm:$0xf] (%p2182_p3), %v1836_v1  ;;  %1839 = vst [vmem:[%s2422_s6 + $0x1b8] sm:$0xf] (%p2182_p3), %v1838_v2 }
 0x1da   : > { %v839_v4 = vpop.f32.mrb[56].mxu0  ;;  %1841 = vst [vmem:[%s2422_s6 + $0x1d0] sm:$0xf] (%p2182_p3), %v1840_v3 }
 0x1db   : > { %v841_v5 = vpop.f32.mrb[57].mxu0 }
 0x1dc   : > { %v1925_v6 = vpack.c.bf16 %v841_v5, %v839_v4  ;;  %v843_v7 = vpop.f32.mrb[58].mxu0  ;;  %v1842_v4 = vld [vmem:[%s2344_s4 + $0xf8] sm:$0xf] (%p2182_p3)  ;;  %v1844_v5 = vld [vmem:[%s2344_s4 + $0x104] sm:$0xf] (%p2182_p3) }
 0x1dd   : > { %v845_v8 = vpop.f32.mrb[59].mxu0  ;;  %v1482_v42 = vld [vmem:[%s2344_s4 + $0x138] sm:$0xff] (%p2182_p3)  ;;  %1843 = vst [vmem:[%s2422_s6 + $0x1e8] sm:$0xf] (%p2182_p3), %v1842_v4  ;;  %1845 = vst [vmem:[%s2422_s6 + $0x200] sm:$0xf] (%p2182_p3), %v1844_v5 }
 0x1de   : > { %1395 = vst [vmem:[%s2344_s4 + $0x150] sm:$0xff] %v1925_v6  ;;  %v1927_v9 = vpack.c.bf16 %v845_v8, %v843_v7  ;;  %1483 = vst [vmem:[%s2422_s6 + $0x270] sm:$0xff] (%p2182_p3), %v1482_v42  ;;  %v1846_v6 = vld [vmem:[%s2344_s4 + $0x110] sm:$0xf] (%p2182_p3)  ;;  %v1848_v7 = vld [vmem:[%s2344_s4 + $0x11c] sm:$0xf] (%p2182_p3) }
 0x1df   : > { %v1484_v43 = vld [vmem:[%s2344_s4 + $0x144] sm:$0xff] (%p2182_p3)  ;;  %1847 = vst [vmem:[%s2422_s6 + $0x218] sm:$0xf] (%p2182_p3), %v1846_v6  ;;  %1849 = vst [vmem:[%s2422_s6 + $0x230] sm:$0xf] (%p2182_p3), %v1848_v7 }
 0x1e0   : > { %1397 = vst [vmem:[%s2344_s4 + $0x15c] sm:$0xff] %v1927_v9  ;;  %1485 = vst [vmem:[%s2422_s6 + $0x288] sm:$0xff] (%p2182_p3), %v1484_v43  ;;  %v1850_v8 = vld [vmem:[%s2344_s4 + $0x128] sm:$0xf] (%p2182_p3)  ;;  %v1852_v9 = vld [vmem:[%s2344_s4 + $0x134] sm:$0xf] (%p2182_p3) }
 0x1e1   : > { %1851 = vst [vmem:[%s2422_s6 + $0x248] sm:$0xf] (%p2182_p3), %v1850_v8  ;;  %1853 = vst [vmem:[%s2422_s6 + $0x260] sm:$0xf] (%p2182_p3), %v1852_v9 }
 0x1e2   : > { %v849_v10 = vpop.f32.mrb[60].mxu0  ;;  %1409 = sbr.rel (!%p2182_p3) target bundleno = 497 (0x1f1), region = 32 }
 0x1e3   : > { %v851_v11 = vpop.f32.mrb[61].mxu0 }
 0x1e4   : > { %v1929_v12 = vpack.c.bf16 %v851_v11, %v849_v10  ;;  %v853_v13 = vpop.f32.mrb[62].mxu0  ;;  %v1854_v10 = vld [vmem:[%s2344_s4 + $0x140] sm:$0xf] (%p2182_p3)  ;;  %v1856_v11 = vld [vmem:[%s2344_s4 + $0x14c] sm:$0xf] (%p2182_p3) }
 0x1e5   : > { %v855_v14 = vpop.f32.mrb[63].mxu0  ;;  %v1486_v44 = vld [vmem:[%s2344_s4 + $0x150] sm:$0xff] (%p2182_p3)  ;;  %1855 = vst [vmem:[%s2422_s6 + $0x278] sm:$0xf] (%p2182_p3), %v1854_v10  ;;  %1857 = vst [vmem:[%s2422_s6 + $0x290] sm:$0xf] (%p2182_p3), %v1856_v11 }
 0x1e6   : > { %1399 = vst [vmem:[%s2344_s4 + $0x168] sm:$0xff] %v1929_v12  ;;  %v1931_v15 = vpack.c.bf16 %v855_v14, %v853_v13  ;;  %1487 = vst [vmem:[%s2422_s6 + $0x2a0] sm:$0xff] (%p2182_p3), %v1486_v44  ;;  %v1858_v12 = vld [vmem:[%s2344_s4 + $0x158] sm:$0xf] (%p2182_p3)  ;;  %v1860_v13 = vld [vmem:[%s2344_s4 + $0x164] sm:$0xf] (%p2182_p3) }
 0x1e7   : > { %v1488_v45 = vld [vmem:[%s2344_s4 + $0x15c] sm:$0xff] (%p2182_p3)  ;;  %v1862_v14 = vld [vmem:[%s2344_s4 + $0x170] sm:$0xf] (%p2182_p3)  ;;  %1859 = vst [vmem:[%s2422_s6 + $0x2a8] sm:$0xf] (%p2182_p3), %v1858_v12 }
 0x1e8   : > { %1401 = vst [vmem:[%s2344_s4 + $0x174] sm:$0xff] %v1931_v15  ;;  %1489 = vst [vmem:[%s2422_s6 + $0x2b8] sm:$0xff] (%p2182_p3), %v1488_v45  ;;  %v1864_v15 = vld [vmem:[%s2344_s4 + $0x17c] sm:$0xf] (%p2182_p3) }
 0x1e9   : > { %1861 = vst [vmem:[%s2422_s6 + $0x2c0] sm:$0xf] %v1860_v13  ;;  %1863 = vst [vmem:[%s2422_s6 + $0x2d8] sm:$0xf] %v1862_v14 }
 0x1ea   : > { %1865 = vst [vmem:[%s2422_s6 + $0x2f0] sm:$0xf] %v1864_v15 }
 0x1ed   : > { %v1490_v46 = vld [vmem:[%s2344_s4 + $0x168] sm:$0xff] }
 0x1ee   : > { %1491 = vst [vmem:[%s2422_s6 + $0x2d0] sm:$0xff] %v1490_v46 }
 0x1ef   : > { %v1492_v47 = vld [vmem:[%s2344_s4 + $0x174] sm:$0xff] }
 0x1f0   : > { %1493 = vst [vmem:[%s2422_s6 + $0x2e8] sm:$0xff] %v1492_v47 }
 0x1f1 PF: > { %s12_s13 = sadd.s32 1, %s2133_s13   ;;  %s2565_s9 = smov %s2121_s10 }
 0x1f2   : > { %p9_p9 = scmp.ge.s32.totalorder %s12_s13, 4   ;;  %s2566_s10 = smov %s2191_s19 }
 0x1f3   : > { %s2567_s11 = smov %s2129_s12  ;;  %s2568_s12 = smov %s2570_s15 }
 0x1f4   :  { %11 = sbr.rel (!%p9_p9) target bundleno = 3 (0x3), region = 93 }

// kernel: attention_forward.5
= control target key start
LH: loop header
LB: loop body
LE: loop exit
PB: predicated region body
PF: predicated region fallthrough
CT: control target
= control target key end

     0   :  { %s1201_s0 = inlined_call_operand.vmem [shape: bf16[256,256], index: 0, kind: input, shape index: {}]   ;;  %s1202_s1 = inlined_call_operand.vmem [shape: bf16[256,256], index: 1, kind: input, shape index: {}]   ;;  %s1203_s2 = inlined_call_operand.vmem [shape: f32[1,256], index: 2, kind: input, shape index: {}]   ;;  %s1204_s3 = inlined_call_operand.hbm [shape: f32[256,256], index: 3, kind: output, shape index: {}]  }
   0x1   :  { %v783_v0 = vld [vmem:[%s1202_s1 + $0x4] ss:$8 sps:$4 sm:$0xff]   ;;  %v785_v1 = vld [vmem:[%s1202_s1] ss:$8 sps:$4 sm:$0xff]   ;;  %v786_v2 = vld [vmem:[%s1202_s1 + $0x14] ss:$8 sps:$4 sm:$0xff]  }
   0x2   :  { %411 = vmatprep.subr.bf16.mxu0 %v783_v0  ;;  %748 = vmatprep.subr.bf16.mxu1 %v783_v0  ;;  %v788_v3 = vld [vmem:[%s1202_s1 + $0x10] ss:$8 sps:$4 sm:$0xff]   ;;  %v789_v4 = vld [vmem:[%s1202_s1 + $0x24] ss:$8 sps:$4 sm:$0xff]   ;;  %v791_v5 = vld [vmem:[%s1202_s1 + $0x20] ss:$8 sps:$4 sm:$0xff]  }
   0x3   :  { %412 = vmatpush1.bf16.xpose.msra.mxu0 %v785_v1  ;;  %764 = vmatpush1.bf16.xpose.msra.mxu1 %v785_v1  ;;  %v792_v6 = vld [vmem:[%s1202_s1 + $0x34] ss:$8 sps:$4 sm:$0xff]   ;;  %v833_v7 = vld [vmem:[%s1201_s0 + $0x4] ss:$8 sps:$4 sm:$0xff]   ;;  %v794_v8 = vld [vmem:[%s1202_s1 + $0x30] ss:$8 sps:$4 sm:$0xff]  }
   0x4   :  { %413 = vmatprep.subr.bf16.mxu0 %v786_v2  ;;  %749 = vmatprep.subr.bf16.mxu1 %v786_v2  ;;  %v836_v9 = vld [vmem:[%s1201_s0 + $0x84] ss:$8 sps:$4 sm:$0xff]   ;;  %v797_v11 = vld [vmem:[%s1202_s1 + $0x40] ss:$8 sps:$4 sm:$0xff]   ;;  %v798_v12 = vld [vmem:[%s1202_s1 + $0x54] ss:$8 sps:$4 sm:$0xff]  }
   0x5   :  { %v795_v10 = vld [vmem:[%s1202_s1 + $0x44] ss:$8 sps:$4 sm:$0xff]   ;;  %443 = vmatprep.mubr.bf16.mxu0 %v833_v7  ;;  %523 = vmatprep.mubr.bf16.mxu1 %v836_v9  ;;  %v800_v13 = vld [vmem:[%s1202_s1 + $0x50] ss:$8 sps:$4 sm:$0xff]  }
   0xb   :  { %414 = vmatpush1.bf16.xpose.msra.mxu0 %v788_v3  ;;  %765 = vmatpush1.bf16.xpose.msra.mxu1 %v788_v3 }
   0xc   :  { %415 = vmatprep.subr.bf16.mxu0 %v789_v4  ;;  %750 = vmatprep.subr.bf16.mxu1 %v789_v4 }
  0x13   :  { %416 = vmatpush1.bf16.xpose.msra.mxu0 %v791_v5  ;;  %766 = vmatpush1.bf16.xpose.msra.mxu1 %v791_v5 }
  0x14   :  { %417 = vmatprep.subr.bf16.mxu0 %v792_v6  ;;  %751 = vmatprep.subr.bf16.mxu1 %v792_v6 }
  0x1b   :  { %418 = vmatpush1.bf16.xpose.msra.mxu0 %v794_v8  ;;  %767 = vmatpush1.bf16.xpose.msra.mxu1 %v794_v8 }
  0x1c   :  { %419 = vmatprep.subr.bf16.mxu0 %v795_v10  ;;  %752 = vmatprep.subr.bf16.mxu1 %v795_v10 }
  0x23   :  { %420 = vmatpush1.bf16.xpose.msra.mxu0 %v797_v11  ;;  %768 = vmatpush1.bf16.xpose.msra.mxu1 %v797_v11 }
  0x24   :  { %421 = vmatprep.subr.bf16.mxu0 %v798_v12  ;;  %753 = vmatprep.subr.bf16.mxu1 %v798_v12 }
  0x25   :  { %8 = vsyncpa [#allocation3], 0  ;;  %v801_v14 = vld [vmem:[%s1202_s1 + $0x64] ss:$8 sps:$4 sm:$0xff]   ;;  %v803_v15 = vld [vmem:[%s1202_s1 + $0x60] ss:$8 sps:$4 sm:$0xff]   ;;  %v81_v0 = vlaneseq }
  0x26   :  { %v804_v16 = vld [vmem:[%s1202_s1 + $0x74] ss:$8 sps:$4 sm:$0xff]   ;;  %v806_v17 = vld [vmem:[%s1202_s1 + $0x70] ss:$8 sps:$4 sm:$0xff]   ;;  %v807_v18 = vld [vmem:[%s1202_s1 + $0x84] ss:$8 sps:$4 sm:$0xff]  }
  0x27   :  { %v809_v19 = vld [vmem:[%s1202_s1 + $0x80] ss:$8 sps:$4 sm:$0xff]   ;;  %v810_v20 = vld [vmem:[%s1202_s1 + $0x94] ss:$8 sps:$4 sm:$0xff]   ;;  %v812_v21 = vld [vmem:[%s1202_s1 + $0x90] ss:$8 sps:$4 sm:$0xff]  }
  0x28   :  { %v813_v22 = vld [vmem:[%s1202_s1 + $0xa4] ss:$8 sps:$4 sm:$0xff]   ;;  %v815_v23 = vld [vmem:[%s1202_s1 + $0xa0] ss:$8 sps:$4 sm:$0xff]   ;;  %v816_v24 = vld [vmem:[%s1202_s1 + $0xb4] ss:$8 sps:$4 sm:$0xff]  }
  0x29   :  { %v818_v25 = vld [vmem:[%s1202_s1 + $0xb0] ss:$8 sps:$4 sm:$0xff]   ;;  %v819_v26 = vld [vmem:[%s1202_s1 + $0xc4] ss:$8 sps:$4 sm:$0xff]   ;;  %v821_v27 = vld [vmem:[%s1202_s1 + $0xc0] ss:$8 sps:$4 sm:$0xff]  }
  0x2a   :  { %v822_v28 = vld [vmem:[%s1202_s1 + $0xd4] ss:$8 sps:$4 sm:$0xff]   ;;  %v824_v29 = vld [vmem:[%s1202_s1 + $0xd0] ss:$8 sps:$4 sm:$0xff]   ;;  %v825_v30 = vld [vmem:[%s1202_s1 + $0xe4] ss:$8 sps:$4 sm:$0xff]  }
  0x2b   :  { %422 = vmatpush1.bf16.xpose.msra.mxu0 %v800_v13  ;;  %769 = vmatpush1.bf16.xpose.msra.mxu1 %v800_v13  ;;  %v827_v31 = vld [vmem:[%s1202_s1 + $0xe0] ss:$8 sps:$4 sm:$0xff]   ;;  %v828_v32 = vld [vmem:[%s1202_s1 + $0xf4] ss:$8 sps:$4 sm:$0xff]   ;;  %v830_v33 = vld [vmem:[%s1202_s1 + $0xf0] ss:$8 sps:$4 sm:$0xff]  }
  0x2c   :  { %423 = vmatprep.subr.bf16.mxu0 %v801_v14  ;;  %754 = vmatprep.subr.bf16.mxu1 %v801_v14  ;;  %v831_v34 = vld [vmem:[%s1201_s0] ss:$8 sps:$4 sm:$0xff]   ;;  %v837_v36 = vld [vmem:[%s1201_s0 + $0x14] ss:$8 sps:$4 sm:$0xff]   ;;  %v841_v38 = vld [vmem:[%s1201_s0 + $0x10] ss:$8 sps:$4 sm:$0xff]  }
  0x2d   :  { %v834_v35 = vld [vmem:[%s1201_s0 + $0x80] ss:$8 sps:$4 sm:$0xff]   ;;  %v839_v37 = vld [vmem:[%s1201_s0 + $0x94] ss:$8 sps:$4 sm:$0xff]   ;;  %v842_v39 = vld [vmem:[%s1201_s0 + $0x90] ss:$8 sps:$4 sm:$0xff]  }
  0x2e   :  { %v843_v40 = vld [vmem:[%s1201_s0 + $0x24] ss:$8 sps:$4 sm:$0xff]   ;;  %v847_v42 = vld [vmem:[%s1201_s0 + $0x20] ss:$8 sps:$4 sm:$0xff]   ;;  %v849_v44 = vld [vmem:[%s1201_s0 + $0x34] ss:$8 sps:$4 sm:$0xff]  }
  0x2f   :  { %v845_v41 = vld [vmem:[%s1201_s0 + $0xa4] ss:$8 sps:$4 sm:$0xff]   ;;  %v848_v43 = vld [vmem:[%s1201_s0 + $0xa0] ss:$8 sps:$4 sm:$0xff]   ;;  %v851_v45 = vld [vmem:[%s1201_s0 + $0xb4] ss:$8 sps:$4 sm:$0xff]  }
  0x30   :  { %v853_v46 = vld [vmem:[%s1201_s0 + $0x30] ss:$8 sps:$4 sm:$0xff]   ;;  %v855_v48 = vld [vmem:[%s1201_s0 + $0x44] ss:$8 sps:$4 sm:$0xff]   ;;  %v859_v50 = vld [vmem:[%s1201_s0 + $0x40] ss:$8 sps:$4 sm:$0xff]  }
  0x31   :  { %v854_v47 = vld [vmem:[%s1201_s0 + $0xb0] ss:$8 sps:$4 sm:$0xff]   ;;  %v857_v49 = vld [vmem:[%s1201_s0 + $0xc4] ss:$8 sps:$4 sm:$0xff]   ;;  %v860_v51 = vld [vmem:[%s1201_s0 + $0xc0] ss:$8 sps:$4 sm:$0xff]  }
  0x32   :  { %v861_v52 = vld [vmem:[%s1201_s0 + $0x54] ss:$8 sps:$4 sm:$0xff]   ;;  %v865_v54 = vld [vmem:[%s1201_s0 + $0x50] ss:$8 sps:$4 sm:$0xff]   ;;  %v867_v56 = vld [vmem:[%s1201_s0 + $0x64] ss:$8 sps:$4 sm:$0xff]  }
  0x33   :  { %424 = vmatpush1.bf16.xpose.msra.mxu0 %v803_v15  ;;  %770 = vmatpush1.bf16.xpose.msra.mxu1 %v803_v15  ;;  %v863_v53 = vld [vmem:[%s1201_s0 + $0xd4] ss:$8 sps:$4 sm:$0xff]   ;;  %v866_v55 = vld [vmem:[%s1201_s0 + $0xd0] ss:$8 sps:$4 sm:$0xff]   ;;  %v869_v57 = vld [vmem:[%s1201_s0 + $0xe4] ss:$8 sps:$4 sm:$0xff]  }
  0x34   :  { %425 = vmatprep.subr.bf16.mxu0 %v804_v16  ;;  %755 = vmatprep.subr.bf16.mxu1 %v804_v16  ;;  %v871_v58 = vld [vmem:[%s1201_s0 + $0x60] ss:$8 sps:$4 sm:$0xff]   ;;  %v873_v60 = vld [vmem:[%s1201_s0 + $0x74] ss:$8 sps:$4 sm:$0xff]   ;;  %v877_v62 = vld [vmem:[%s1201_s0 + $0x70] ss:$8 sps:$4 sm:$0xff]  }
  0x35   :  { %v872_v59 = vld [vmem:[%s1201_s0 + $0xe0] ss:$8 sps:$4 sm:$0xff]   ;;  %v875_v61 = vld [vmem:[%s1201_s0 + $0xf4] ss:$8 sps:$4 sm:$0xff]   ;;  %v878_v63 = vld [vmem:[%s1201_s0 + $0xf0] ss:$8 sps:$4 sm:$0xff]  }
  0x36   :  { %v82_v1 = vshrl.u32 %v81_v0, 7  ;;  %v79_v3 = vld [vmem:[%s1203_s2] sm:$0x3]  ;;  %s903_s0 = smov [#allocation2]  }
  0x37   :  { %s673_s2 = sshll.u32 %s903_s0, 4  ;;  %s674_s2 = int_to_ptr.vmem [resolvable:$true] %s673_s2 }
  0x38   :  { %v83_v2 = vsub.s32 0, %v82_v1  ;;  %v87_v4 = vsub.s32 1, %v82_v1  ;;  %s879_s5 = scalar_lea.vmem %s674_s2, 8192  ;;  %p884_p1 = scmp.lt.s32.totalorder %s674_s2, %s674_s2 }
  0x39   :  { %p880_p0 = scmp.ne.s32.totalorder %s674_s2, %s879_s5  ;;  %p885_p2 = scmp.lt.s32.totalorder %s879_s5, %s879_s5 }
  0x3a   :  { %v1121_v5 = vrot.slane %v79_v3, %v83_v2  ;;  %v1123_v6 = vrot.slane %v79_v3, %v87_v4 }
  0x3b   :  { %426 = vmatpush1.bf16.xpose.msra.mxu0 %v806_v17  ;;  %771 = vmatpush1.bf16.xpose.msra.mxu1 %v806_v17  ;;  %p886_p3 = por %p885_p2, %p884_p1 }
  0x3c   :  { %427 = vmatprep.subr.bf16.mxu0 %v807_v18  ;;  %756 = vmatprep.subr.bf16.mxu1 %v807_v18 }
  0x3d   :  { %p887_p4 = pnand %p886_p3, %p880_p0 }
  0x43   :  { %428 = vmatpush1.bf16.xpose.msra.mxu0 %v809_v19  ;;  %772 = vmatpush1.bf16.xpose.msra.mxu1 %v809_v19 }
  0x44   :  { %429 = vmatprep.subr.bf16.mxu0 %v810_v20  ;;  %757 = vmatprep.subr.bf16.mxu1 %v810_v20 }
  0x4b   :  { %430 = vmatpush1.bf16.xpose.msra.mxu0 %v812_v21  ;;  %773 = vmatpush1.bf16.xpose.msra.mxu1 %v812_v21 }
  0x4c   :  { %431 = vmatprep.subr.bf16.mxu0 %v813_v22  ;;  %758 = vmatprep.subr.bf16.mxu1 %v813_v22 }
  0x53   :  { %432 = vmatpush1.bf16.xpose.msra.mxu0 %v815_v23  ;;  %774 = vmatpush1.bf16.xpose.msra.mxu1 %v815_v23 }
  0x54   :  { %433 = vmatprep.subr.bf16.mxu0 %v816_v24  ;;  %759 = vmatprep.subr.bf16.mxu1 %v816_v24 }
  0x5b   :  { %434 = vmatpush1.bf16.xpose.msra.mxu0 %v818_v25  ;;  %775 = vmatpush1.bf16.xpose.msra.mxu1 %v818_v25 }
  0x5c   :  { %435 = vmatprep.subr.bf16.mxu0 %v819_v26  ;;  %760 = vmatprep.subr.bf16.mxu1 %v819_v26 }
  0x63   :  { %436 = vmatpush1.bf16.xpose.msra.mxu0 %v821_v27  ;;  %776 = vmatpush1.bf16.xpose.msra.mxu1 %v821_v27 }
  0x64   :  { %437 = vmatprep.subr.bf16.mxu0 %v822_v28  ;;  %761 = vmatprep.subr.bf16.mxu1 %v822_v28 }
  0x6b   :  { %438 = vmatpush1.bf16.xpose.msra.mxu0 %v824_v29  ;;  %777 = vmatpush1.bf16.xpose.msra.mxu1 %v824_v29 }
  0x6c   :  { %439 = vmatprep.subr.bf16.mxu0 %v825_v30  ;;  %762 = vmatprep.subr.bf16.mxu1 %v825_v30 }
  0x73   :  { %440 = vmatpush1.bf16.xpose.msra.mxu0 %v827_v31  ;;  %778 = vmatpush1.bf16.xpose.msra.mxu1 %v827_v31 }
  0x74   :  { %441 = vmatprep.subr.bf16.mxu0 %v828_v32  ;;  %763 = vmatprep.subr.bf16.mxu1 %v828_v32 }
  0x7b   :  { %442 = vmatpush1.bf16.xpose.msra.mxu0 %v830_v33  ;;  %779 = vmatpush1.bf16.xpose.msra.mxu1 %v830_v33 }
  0x82   :  { %444 = vmatmul.mubr.bf16.vlgmr.msra.gmra.mrb[0].mxu0 %v831_v34  ;;  %524 = vmatmul.mubr.bf16.vlgmr.msra.gmra.mrb[0].mxu1 %v834_v35 }
  0x83   :  { %453 = vmatprep.mubr.bf16.mxu0 %v837_v36  ;;  %533 = vmatprep.mubr.bf16.mxu1 %v839_v37 }
  0x8a   :  { %454 = vmatmul.mubr.bf16.gmra.mrb[4].mxu0 %v841_v38  ;;  %534 = vmatmul.mubr.bf16.gmra.mrb[4].mxu1 %v842_v39 }
  0x8b   :  { %463 = vmatprep.mubr.bf16.mxu0 %v843_v40  ;;  %543 = vmatprep.mubr.bf16.mxu1 %v845_v41 }
  0x92   :  { %464 = vmatmul.mubr.bf16.gmra.mrb[8].mxu0 %v847_v42  ;;  %544 = vmatmul.mubr.bf16.gmra.mrb[8].mxu1 %v848_v43 }
  0x93   :  { %473 = vmatprep.mubr.bf16.mxu0 %v849_v44  ;;  %553 = vmatprep.mubr.bf16.mxu1 %v851_v45 }
  0x9a   :  { %474 = vmatmul.mubr.bf16.gmra.mrb[12].mxu0 %v853_v46  ;;  %554 = vmatmul.mubr.bf16.gmra.mrb[12].mxu1 %v854_v47 }
  0x9b   :  { %483 = vmatprep.mubr.bf16.mxu0 %v855_v48  ;;  %563 = vmatprep.mubr.bf16.mxu1 %v857_v49 }
  0xa2   :  { %484 = vmatmul.mubr.bf16.gmra.mrb[16].mxu0 %v859_v50  ;;  %564 = vmatmul.mubr.bf16.gmra.mrb[16].mxu1 %v860_v51 }
  0xa3   :  { %493 = vmatprep.mubr.bf16.mxu0 %v861_v52  ;;  %573 = vmatprep.mubr.bf16.mxu1 %v863_v53 }
  0xaa   :  { %494 = vmatmul.mubr.bf16.gmra.mrb[20].mxu0 %v865_v54  ;;  %574 = vmatmul.mubr.bf16.gmra.mrb[20].mxu1 %v866_v55 }
  0xab   :  { %503 = vmatprep.mubr.bf16.mxu0 %v867_v56  ;;  %583 = vmatprep.mubr.bf16.mxu1 %v869_v57 }
  0xb2   :  { %504 = vmatmul.mubr.bf16.gmra.mrb[24].mxu0 %v871_v58  ;;  %584 = vmatmul.mubr.bf16.gmra.mrb[24].mxu1 %v872_v59 }
  0xb3   :  { %513 = vmatprep.mubr.bf16.mxu0 %v873_v60  ;;  %593 = vmatprep.mubr.bf16.mxu1 %v875_v61 }
  0xba   :  { %514 = vmatmul.mubr.bf16.gmra.mrb[28].mxu0 %v877_v62  ;;  %594 = vmatmul.mubr.bf16.gmra.mrb[28].mxu1 %v878_v63 }
 0x155   :  { %v445_v7 = vpop.f32.mrb[0].mxu0  ;;  %v525_v8 = vpop.f32.mrb[0].mxu1 }
 0x156   :  { %v446_v9 = vadd.f32 %v445_v7, %v1121_v5  ;;  %v526_v10 = vadd.f32 %v525_v8, %v1121_v5  ;;  %v447_v11 = vpop.f32.mrb[1].mxu0  ;;  %v527_v12 = vpop.f32.mrb[1].mxu1 }
 0x157   :  { %v448_v13 = vadd.f32 %v447_v11, %v1123_v6  ;;  %v528_v14 = vadd.f32 %v527_v12, %v1123_v6  ;;  %v449_v15 = vpop.f32.mrb[2].mxu0  ;;  %v529_v16 = vpop.f32.mrb[2].mxu1 }
 0x158   :  { %604 = vst [vmem:[#allocation2] sm:$0xff] %v446_v9  ;;  %636 = vst [vmem:[#allocation2 + $0x100] sm:$0xff] %v526_v10  ;;  %v450_v17 = vadd.f32 %v449_v15, %v1121_v5  ;;  %v530_v18 = vadd.f32 %v529_v16, %v1121_v5  ;;  %v451_v19 = vpop.f32.mrb[3].mxu0  ;;  %v531_v20 = vpop.f32.mrb[3].mxu1 }
 0x159   :  { %605 = vst [vmem:[#allocation2 + $0x8] sm:$0xff] %v448_v13  ;;  %637 = vst [vmem:[#allocation2 + $0x108] sm:$0xff] %v528_v14  ;;  %v452_v21 = vadd.f32 %v451_v19, %v1123_v6  ;;  %v532_v22 = vadd.f32 %v531_v20, %v1123_v6 }
 0x15a   :  { %606 = vst [vmem:[#allocation2 + $0x10] sm:$0xff] %v450_v17  ;;  %638 = vst [vmem:[#allocation2 + $0x110] sm:$0xff] %v530_v18 }
 0x15b   :  { %607 = vst [vmem:[#allocation2 + $0x18] sm:$0xff] %v452_v21  ;;  %639 = vst [vmem:[#allocation2 + $0x118] sm:$0xff] %v532_v22 }
 0x15d   :  { %v455_v23 = vpop.f32.mrb[4].mxu0  ;;  %v535_v24 = vpop.f32.mrb[4].mxu1 }
 0x15e   :  { %v456_v25 = vadd.f32 %v455_v23, %v1121_v5  ;;  %v536_v26 = vadd.f32 %v535_v24, %v1121_v5  ;;  %v457_v27 = vpop.f32.mrb[5].mxu0  ;;  %v537_v28 = vpop.f32.mrb[5].mxu1 }
 0x15f   :  { %v458_v29 = vadd.f32 %v457_v27, %v1123_v6  ;;  %v538_v30 = vadd.f32 %v537_v28, %v1123_v6  ;;  %v459_v31 = vpop.f32.mrb[6].mxu0  ;;  %v539_v32 = vpop.f32.mrb[6].mxu1 }
 0x160   :  { %608 = vst [vmem:[#allocation2 + $0x20] sm:$0xff] %v456_v25  ;;  %640 = vst [vmem:[#allocation2 + $0x120] sm:$0xff] %v536_v26  ;;  %v460_v33 = vadd.f32 %v459_v31, %v1121_v5  ;;  %v540_v34 = vadd.f32 %v539_v32, %v1121_v5  ;;  %v461_v35 = vpop.f32.mrb[7].mxu0  ;;  %v541_v36 = vpop.f32.mrb[7].mxu1 }
 0x161   :  { %609 = vst [vmem:[#allocation2 + $0x28] sm:$0xff] %v458_v29  ;;  %641 = vst [vmem:[#allocation2 + $0x128] sm:$0xff] %v538_v30  ;;  %v462_v37 = vadd.f32 %v461_v35, %v1123_v6  ;;  %v542_v38 = vadd.f32 %v541_v36, %v1123_v6 }
 0x162   :  { %610 = vst [vmem:[#allocation2 + $0x30] sm:$0xff] %v460_v33  ;;  %642 = vst [vmem:[#allocation2 + $0x130] sm:$0xff] %v540_v34 }
 0x163   :  { %611 = vst [vmem:[#allocation2 + $0x38] sm:$0xff] %v462_v37  ;;  %643 = vst [vmem:[#allocation2 + $0x138] sm:$0xff] %v542_v38 }
 0x165   :  { %v465_v39 = vpop.f32.mrb[8].mxu0  ;;  %v545_v40 = vpop.f32.mrb[8].mxu1 }
 0x166   :  { %v466_v41 = vadd.f32 %v465_v39, %v1121_v5  ;;  %v546_v42 = vadd.f32 %v545_v40, %v1121_v5  ;;  %v467_v43 = vpop.f32.mrb[9].mxu0  ;;  %v547_v44 = vpop.f32.mrb[9].mxu1 }
 0x167   :  { %v468_v45 = vadd.f32 %v467_v43, %v1123_v6  ;;  %v548_v46 = vadd.f32 %v547_v44, %v1123_v6  ;;  %v469_v47 = vpop.f32.mrb[10].mxu0  ;;  %v549_v48 = vpop.f32.mrb[10].mxu1 }
 0x168   :  { %612 = vst [vmem:[#allocation2 + $0x40] sm:$0xff] %v466_v41  ;;  %644 = vst [vmem:[#allocation2 + $0x140] sm:$0xff] %v546_v42  ;;  %v470_v49 = vadd.f32 %v469_v47, %v1121_v5  ;;  %v550_v50 = vadd.f32 %v549_v48, %v1121_v5  ;;  %v471_v51 = vpop.f32.mrb[11].mxu0  ;;  %v551_v52 = vpop.f32.mrb[11].mxu1 }
 0x169   :  { %613 = vst [vmem:[#allocation2 + $0x48] sm:$0xff] %v468_v45  ;;  %645 = vst [vmem:[#allocation2 + $0x148] sm:$0xff] %v548_v46  ;;  %v472_v53 = vadd.f32 %v471_v51, %v1123_v6  ;;  %v552_v54 = vadd.f32 %v551_v52, %v1123_v6 }
 0x16a   :  { %614 = vst [vmem:[#allocation2 + $0x50] sm:$0xff] %v470_v49  ;;  %646 = vst [vmem:[#allocation2 + $0x150] sm:$0xff] %v550_v50 }
 0x16b   :  { %615 = vst [vmem:[#allocation2 + $0x58] sm:$0xff] %v472_v53  ;;  %647 = vst [vmem:[#allocation2 + $0x158] sm:$0xff] %v552_v54 }
 0x16d   :  { %v475_v55 = vpop.f32.mrb[12].mxu0  ;;  %v555_v56 = vpop.f32.mrb[12].mxu1 }
 0x16e   :  { %v476_v57 = vadd.f32 %v475_v55, %v1121_v5  ;;  %v556_v58 = vadd.f32 %v555_v56, %v1121_v5  ;;  %v477_v59 = vpop.f32.mrb[13].mxu0  ;;  %v557_v60 = vpop.f32.mrb[13].mxu1 }
 0x16f   :  { %v478_v61 = vadd.f32 %v477_v59, %v1123_v6  ;;  %v558_v62 = vadd.f32 %v557_v60, %v1123_v6  ;;  %v479_v63 = vpop.f32.mrb[14].mxu0  ;;  %v559_v0 = vpop.f32.mrb[14].mxu1 }
 0x170   :  { %616 = vst [vmem:[#allocation2 + $0x60] sm:$0xff] %v476_v57  ;;  %648 = vst [vmem:[#allocation2 + $0x160] sm:$0xff] %v556_v58  ;;  %v480_v1 = vadd.f32 %v479_v63, %v1121_v5  ;;  %v560_v2 = vadd.f32 %v559_v0, %v1121_v5  ;;  %v481_v3 = vpop.f32.mrb[15].mxu0  ;;  %v561_v4 = vpop.f32.mrb[15].mxu1 }
 0x171   :  { %617 = vst [vmem:[#allocation2 + $0x68] sm:$0xff] %v478_v61  ;;  %649 = vst [vmem:[#allocation2 + $0x168] sm:$0xff] %v558_v62  ;;  %v482_v7 = vadd.f32 %v481_v3, %v1123_v6  ;;  %v562_v8 = vadd.f32 %v561_v4, %v1123_v6 }
 0x172   :  { %618 = vst [vmem:[#allocation2 + $0x70] sm:$0xff] %v480_v1  ;;  %650 = vst [vmem:[#allocation2 + $0x170] sm:$0xff] %v560_v2 }
 0x173   :  { %619 = vst [vmem:[#allocation2 + $0x78] sm:$0xff] %v482_v7  ;;  %651 = vst [vmem:[#allocation2 + $0x178] sm:$0xff] %v562_v8 }
 0x175   :  { %v485_v9 = vpop.f32.mrb[16].mxu0  ;;  %v565_v10 = vpop.f32.mrb[16].mxu1 }
 0x176   :  { %v486_v11 = vadd.f32 %v485_v9, %v1121_v5  ;;  %v566_v12 = vadd.f32 %v565_v10, %v1121_v5  ;;  %v487_v13 = vpop.f32.mrb[17].mxu0  ;;  %v567_v14 = vpop.f32.mrb[17].mxu1 }
 0x177   :  { %v488_v15 = vadd.f32 %v487_v13, %v1123_v6  ;;  %v568_v16 = vadd.f32 %v567_v14, %v1123_v6  ;;  %v489_v17 = vpop.f32.mrb[18].mxu0  ;;  %v569_v18 = vpop.f32.mrb[18].mxu1 }
 0x178   :  { %620 = vst [vmem:[#allocation2 + $0x80] sm:$0xff] %v486_v11  ;;  %652 = vst [vmem:[#allocation2 + $0x180] sm:$0xff] %v566_v12  ;;  %v490_v19 = vadd.f32 %v489_v17, %v1121_v5  ;;  %v570_v20 = vadd.f32 %v569_v18, %v1121_v5  ;;  %v491_v21 = vpop.f32.mrb[19].mxu0  ;;  %v571_v22 = vpop.f32.mrb[19].mxu1 }
 0x179   :  { %621 = vst [vmem:[#allocation2 + $0x88] sm:$0xff] %v488_v15  ;;  %653 = vst [vmem:[#allocation2 + $0x188] sm:$0xff] %v568_v16  ;;  %v492_v23 = vadd.f32 %v491_v21, %v1123_v6  ;;  %v572_v24 = vadd.f32 %v571_v22, %v1123_v6 }
 0x17a   :  { %622 = vst [vmem:[#allocation2 + $0x90] sm:$0xff] %v490_v19  ;;  %654 = vst [vmem:[#allocation2 + $0x190] sm:$0xff] %v570_v20 }
 0x17b   :  { %623 = vst [vmem:[#allocation2 + $0x98] sm:$0xff] %v492_v23  ;;  %655 = vst [vmem:[#allocation2 + $0x198] sm:$0xff] %v572_v24 }
 0x17d   :  { %v495_v25 = vpop.f32.mrb[20].mxu0  ;;  %v575_v26 = vpop.f32.mrb[20].mxu1 }
 0x17e   :  { %v496_v27 = vadd.f32 %v495_v25, %v1121_v5  ;;  %v576_v28 = vadd.f32 %v575_v26, %v1121_v5  ;;  %v497_v29 = vpop.f32.mrb[21].mxu0  ;;  %v577_v30 = vpop.f32.mrb[21].mxu1 }
 0x17f   :  { %v498_v31 = vadd.f32 %v497_v29, %v1123_v6  ;;  %v578_v32 = vadd.f32 %v577_v30, %v1123_v6  ;;  %v499_v33 = vpop.f32.mrb[22].mxu0  ;;  %v579_v34 = vpop.f32.mrb[22].mxu1 }
 0x180   :  { %624 = vst [vmem:[#allocation2 + $0xa0] sm:$0xff] %v496_v27  ;;  %656 = vst [vmem:[#allocation2 + $0x1a0] sm:$0xff] %v576_v28  ;;  %v500_v35 = vadd.f32 %v499_v33, %v1121_v5  ;;  %v580_v36 = vadd.f32 %v579_v34, %v1121_v5  ;;  %v501_v37 = vpop.f32.mrb[23].mxu0  ;;  %v581_v38 = vpop.f32.mrb[23].mxu1 }
 0x181   :  { %625 = vst [vmem:[#allocation2 + $0xa8] sm:$0xff] %v498_v31  ;;  %657 = vst [vmem:[#allocation2 + $0x1a8] sm:$0xff] %v578_v32  ;;  %v502_v39 = vadd.f32 %v501_v37, %v1123_v6  ;;  %v582_v40 = vadd.f32 %v581_v38, %v1123_v6 }
 0x182   :  { %626 = vst [vmem:[#allocation2 + $0xb0] sm:$0xff] %v500_v35  ;;  %658 = vst [vmem:[#allocation2 + $0x1b0] sm:$0xff] %v580_v36 }
 0x183   :  { %627 = vst [vmem:[#allocation2 + $0xb8] sm:$0xff] %v502_v39  ;;  %659 = vst [vmem:[#allocation2 + $0x1b8] sm:$0xff] %v582_v40 }
 0x185   :  { %v505_v41 = vpop.f32.mrb[24].mxu0  ;;  %v585_v42 = vpop.f32.mrb[24].mxu1 }
 0x186   :  { %v506_v43 = vadd.f32 %v505_v41, %v1121_v5  ;;  %v586_v44 = vadd.f32 %v585_v42, %v1121_v5  ;;  %v507_v45 = vpop.f32.mrb[25].mxu0  ;;  %v587_v46 = vpop.f32.mrb[25].mxu1 }
 0x187   :  { %v508_v47 = vadd.f32 %v507_v45, %v1123_v6  ;;  %v588_v48 = vadd.f32 %v587_v46, %v1123_v6  ;;  %v509_v49 = vpop.f32.mrb[26].mxu0  ;;  %v589_v50 = vpop.f32.mrb[26].mxu1 }
 0x188   :  { %628 = vst [vmem:[#allocation2 + $0xc0] sm:$0xff] %v506_v43  ;;  %660 = vst [vmem:[#allocation2 + $0x1c0] sm:$0xff] %v586_v44  ;;  %v510_v51 = vadd.f32 %v509_v49, %v1121_v5  ;;  %v590_v52 = vadd.f32 %v589_v50, %v1121_v5  ;;  %v511_v53 = vpop.f32.mrb[27].mxu0  ;;  %v591_v54 = vpop.f32.mrb[27].mxu1 }
 0x189   :  { %629 = vst [vmem:[#allocation2 + $0xc8] sm:$0xff] %v508_v47  ;;  %661 = vst [vmem:[#allocation2 + $0x1c8] sm:$0xff] %v588_v48  ;;  %v512_v55 = vadd.f32 %v511_v53, %v1123_v6  ;;  %v592_v56 = vadd.f32 %v591_v54, %v1123_v6 }
 0x18a   :  { %630 = vst [vmem:[#allocation2 + $0xd0] sm:$0xff] %v510_v51  ;;  %662 = vst [vmem:[#allocation2 + $0x1d0] sm:$0xff] %v590_v52 }
 0x18b   :  { %631 = vst [vmem:[#allocation2 + $0xd8] sm:$0xff] %v512_v55  ;;  %663 = vst [vmem:[#allocation2 + $0x1d8] sm:$0xff] %v592_v56 }
 0x18d   :  { %v515_v57 = vpop.f32.mrb[28].mxu0  ;;  %v595_v58 = vpop.f32.mrb[28].mxu1 }
 0x18e   :  { %v516_v59 = vadd.f32 %v515_v57, %v1121_v5  ;;  %v596_v60 = vadd.f32 %v595_v58, %v1121_v5  ;;  %v517_v61 = vpop.f32.mrb[29].mxu0  ;;  %v597_v62 = vpop.f32.mrb[29].mxu1 }
 0x18f   :  { %v518_v63 = vadd.f32 %v517_v61, %v1123_v6  ;;  %v598_v0 = vadd.f32 %v597_v62, %v1123_v6  ;;  %v519_v1 = vpop.f32.mrb[30].mxu0  ;;  %v599_v2 = vpop.f32.mrb[30].mxu1 }
 0x190   :  { %632 = vst [vmem:[#allocation2 + $0xe0] sm:$0xff] %v516_v59  ;;  %664 = vst [vmem:[#allocation2 + $0x1e0] sm:$0xff] %v596_v60  ;;  %v520_v3 = vadd.f32 %v519_v1, %v1121_v5  ;;  %v600_v4 = vadd.f32 %v599_v2, %v1121_v5  ;;  %v521_v7 = vpop.f32.mrb[31].mxu0  ;;  %v601_v8 = vpop.f32.mrb[31].mxu1 }
 0x191   :  { %633 = vst [vmem:[#allocation2 + $0xe8] sm:$0xff] %v518_v63  ;;  %665 = vst [vmem:[#allocation2 + $0x1e8] sm:$0xff] %v598_v0  ;;  %v522_v9 = vadd.f32 %v521_v7, %v1123_v6  ;;  %v602_v10 = vadd.f32 %v601_v8, %v1123_v6 }
 0x192   :  { %634 = vst [vmem:[#allocation2 + $0xf0] sm:$0xff] %v520_v3  ;;  %666 = vst [vmem:[#allocation2 + $0x1f0] sm:$0xff] %v600_v4 }
 0x193   :  { %635 = vst [vmem:[#allocation2 + $0xf8] sm:$0xff] %v522_v9  ;;  %667 = vst [vmem:[#allocation2 + $0x1f8] sm:$0xff] %v602_v10 }
 0x194   :  { %890 = shalt.err (!%p887_p4)
}
 0x195   :  { %s891_s7 = scalar_lea.hbm %s1204_s3, 8192 }
 0x196   :  { %p892_p5 = scmp.ne.s32.totalorder %s1204_s3, %s891_s7  ;;  %p895_p6 = scmp.lt.u32.totalorder %s891_s7, %s1204_s3 }
 0x198   :  { %p897_p7 = pnand %p895_p6, %p892_p5 }
 0x19a   :  { %900 = shalt.err (!%p897_p7)
}
 0x19b   :  { %s904_s12 = smov 256   ;;  %s905_s13 = smov 16  }
 0x19c   :  { %679 = dma.vmem_to_hbm [thread:$0]  %s674_s2, 8192, %s1204_s3, [#allocation3], %s904_s12, %s904_s12, %s905_s13  }
 0x19d   :  { %901 = dma.done.wait [#allocation3], 8192  }
 0x19e   :  { %902 = vsyncadd [#allocation3], 4294959104 }
 0x19f   :  { %683 = vsyncpa [#allocation3], 1 }

// kernel: attention_forward.4
= control target key start
LH: loop header
LB: loop body
LE: loop exit
PB: predicated region body
PF: predicated region fallthrough
CT: control target
= control target key end

     0   :  { %s3252_s0 = inlined_call_operand.vmem [shape: bf16[2,128,768], index: 0, kind: input, shape index: {}, may-alias: {0,1,2}]   ;;  %s3253_s1 = inlined_call_operand.vmem [shape: bf16[2,128,768], index: 1, kind: input, shape index: {}, may-alias: {0,1,2}]   ;;  %s3254_s2 = inlined_call_operand.vmem [shape: bf16[2,128,768], index: 2, kind: input, shape index: {}, may-alias: {0,1,2}]   ;;  %s3255_s3 = inlined_call_operand.vmem [shape: bf16[2,128,256], index: 3, kind: output, shape index: {}]  }
   0x1   :  { %3257 = sst [smem:[#allocation10_spill]] %s3255_s3 }
   0x2   :  { %s2558_s12 = smov 0   ;;  %s2560_s13 = smov 0  }
   0x3   :  { %s2562_s14 = smov 0   ;;  %s2564_s15 = smov 0  }
   0x4   :  { %s2566_s16 = smov 0   ;;  %s2568_s17 = smov 0  }
   0x5   :  { %s2570_s18 = smov 0   ;;  %s2572_s19 = smov 0  }
   0x6   :  { %s2574_s20 = smov 0   ;;  %s2576_s21 = smov 0  }
   0x7   :  { %s2578_s22 = smov 0  }
   0x8 LB: > { %s35_s24 = sadd.s32 1, %s2525_s20  ;;  %s39_s25 = sadd.s32 1, %s2529_s21  ;;  %s2533_s22 = sphi %s2578_s22, %s13_s22   ;;  %s2529_s21 = sphi %s2576_s21, %s3291_s21   ;;  %s2525_s20 = sphi %s2574_s20, %s3290_s20   ;;  %s2521_s19 = sphi %s2572_s19, %s3289_s19   ;;  %s2517_s18 = sphi %s2570_s18, %s3288_s18   ;;  %s2513_s17 = sphi %s2568_s17, %s3287_s17   ;;  %s2509_s16 = sphi %s2566_s16, %s3286_s16   ;;  %s2505_s15 = sphi %s2564_s15, %s3285_s15   ;;  %s2501_s14 = sphi %s2562_s14, %s3284_s14   ;;  %s2497_s13 = sphi %s2560_s13, %s3283_s13   ;;  %s2493_s12 = sphi %s2558_s12, %s3282_s12  }
   0x9   : > { %p37_p0 = scmp.ge.s32.totalorder %s35_s24, 2  ;;  %s50_s26 = sadd.s32 1, %s2513_s17 }
   0xa   : > { %p57_p1 = scmp.ne.s32.totalorder %s2513_s17, %s2509_s16  ;;  %p58_p2 = scmp.eq.s32.totalorder %s2533_s22, 0 }
   0xb   : > { %s3293_s24 = smov (%p37_p0, %s35_s24), 0  ;;  %s3295_s25 = smov (!%p37_p0, %s39_s25), %s2529_s21 }
   0xc   : > { %s46_s27 = ssub.s32 %s2525_s20, %s3293_s24  ;;  %p41_p3 = scmp.ge.s32.totalorder %s3295_s25, 2 }
   0xd   : > { %s73_s28 = sadd.s32 2, %s2525_s20  ;;  %p2631_p4 = por %p58_p2, %p57_p1 }
   0xe   : > { %s74_s30 = sadd.s32 2, %s3293_s24  ;;  %s3297_s25 = smov (%p41_p3, %s3295_s25), 0 }
   0xf   : > { %3259 = sst [smem:[#allocation9_spill]] %s3297_s25  ;;  %s78_s4 = ssub.s32 %s73_s28, %s74_s30 }
  0x10   : > { %s82_s5 = sadd.s32 1, %s2505_s15  ;;  %s43_s6 = ssub.s32 %s2529_s21, %s3297_s25 }
  0x11   : > { %p89_p5 = scmp.ne.s32.totalorder %s2505_s15, %s2501_s14  ;;  %s47_s7 = sor.u32 %s46_s27, %s43_s6 }
  0x12   : > { %s79_s8 = sor.u32 %s78_s4, %s43_s6  ;;  %p48_p6 = scmp.eq.s32.totalorder %s47_s7, 0 }
  0x13   : > { %p80_p7 = scmp.eq.s32.totalorder %s79_s8, 0  ;;  %p2645_p8 = por %p89_p5, %p58_p2 }
  0x14   : > { %s105_s10 = sadd.s32 4, %s2525_s20  ;;  %s106_s30 = sadd.s32 4, %s3293_s24 }
  0x15   : > { %s2651_s11 = scalar_select %p48_p6, %s2513_s17, %s50_s26  }
  0x16   : > { %s2654_s28 = scalar_select %p80_p7, %s2505_s15, %s82_s5  }
  0x17   : > { %s114_s23 = sadd.s32 1, %s2497_s13  ;;  %s110_s25 = ssub.s32 %s105_s10, %s106_s30 }
  0x18   : > { %p121_p9 = scmp.ne.s32.totalorder %s2497_s13, %s2493_s12  ;;  %s111_s27 = sor.u32 %s110_s25, %s43_s6 }
  0x19   : > { %s3261_s3 = sadd.s32 4294967295, %s2533_s22   ;;  %p112_p11 = scmp.eq.s32.totalorder %s111_s27, 0 }
  0x1a   : > { %p155_p10 = scmp.eq.s32.totalorder %s3261_s3, 3  ;;  %p2664_p12 = por %p121_p9, %p58_p2 }
  0x1b   : > { %s2676_s26 = scalar_select %p112_p11, %s2497_s13, %s114_s23  }
  0x1c   : > { %p2671_p13 = por %p155_p10, %p57_p1  ;;  %p2001_p0 = scmp.ge.s32.totalorder %s2533_s22, 4 }
  0x1e   : > { %177 = sbr.rel (%p2001_p0) target bundleno = 88 (0x58), region = 16 }
  0x25   : > { %180 = sbr.rel (!%p2631_p4) target bundleno = 54 (0x36), region = 20  ;;  %s182_s3 = sand.u32 (%p2631_p4), 1, %s2513_s17  }
  0x26   : > { %s2249_s25 = smul.u32 (%p2631_p4), 96, %s2529_s21  ;;  %s2002_s5 = sshll.u32 (%p2631_p4), %s182_s3, 6 }
  0x27   : > { %s184_s23 = scalar_lea.vmem (%p2631_p4), [#allocation5], %s2002_s5 }
  0x28   : > { %s189_s6 = sadd.s32 (%p2631_p4), %s2525_s20, %s2249_s25 }
  0x29   : > { %s2003_s8 = sshll.u32 (%p2631_p4), %s189_s6, 2 }
  0x2a   : > { %s2687_s27 = scalar_lea.vmem (%p2631_p4), %s3252_s0, %s2003_s8 }
  0x2b   : > { %v207_v0 = vld [vmem:[%s2687_s27] sm:$0xf] (%p2631_p4)  ;;  %v209_v1 = vld [vmem:[%s2687_s27 + $0x18] sm:$0xf] (%p2631_p4)  ;;  %v211_v2 = vld [vmem:[%s2687_s27 + $0x30] sm:$0xf] (%p2631_p4) }
  0x2c   : > { %208 = vst [vmem:[%s184_s23] sm:$0xf] %v207_v0  ;;  %210 = vst [vmem:[%s184_s23 + $0x4] sm:$0xf] %v209_v1  ;;  %v213_v3 = vld [vmem:[%s2687_s27 + $0x48] sm:$0xf] }
  0x2d   : > { %212 = vst [vmem:[%s184_s23 + $0x8] sm:$0xf] %v211_v2  ;;  %v215_v4 = vld [vmem:[%s2687_s27 + $0x60] sm:$0xf]  ;;  %v217_v5 = vld [vmem:[%s2687_s27 + $0x78] sm:$0xf] }
  0x2e   : > { %214 = vst [vmem:[%s184_s23 + $0xc] sm:$0xf] %v213_v3  ;;  %216 = vst [vmem:[%s184_s23 + $0x10] sm:$0xf] %v215_v4  ;;  %v219_v6 = vld [vmem:[%s2687_s27 + $0x90] sm:$0xf] }
  0x2f   : > { %218 = vst [vmem:[%s184_s23 + $0x14] sm:$0xf] %v217_v5  ;;  %v221_v7 = vld [vmem:[%s2687_s27 + $0xa8] sm:$0xf]  ;;  %v223_v8 = vld [vmem:[%s2687_s27 + $0xc0] sm:$0xf] }
  0x30   : > { %220 = vst [vmem:[%s184_s23 + $0x18] sm:$0xf] %v219_v6  ;;  %222 = vst [vmem:[%s184_s23 + $0x1c] sm:$0xf] %v221_v7  ;;  %v225_v9 = vld [vmem:[%s2687_s27 + $0xd8] sm:$0xf] }
  0x31   : > { %224 = vst [vmem:[%s184_s23 + $0x20] sm:$0xf] %v223_v8  ;;  %v227_v10 = vld [vmem:[%s2687_s27 + $0xf0] sm:$0xf]  ;;  %v229_v11 = vld [vmem:[%s2687_s27 + $0x108] sm:$0xf] }
  0x32   : > { %226 = vst [vmem:[%s184_s23 + $0x24] sm:$0xf] %v225_v9  ;;  %228 = vst [vmem:[%s184_s23 + $0x28] sm:$0xf] %v227_v10  ;;  %v231_v12 = vld [vmem:[%s2687_s27 + $0x120] sm:$0xf] }
  0x33   : > { %230 = vst [vmem:[%s184_s23 + $0x2c] sm:$0xf] %v229_v11  ;;  %v233_v13 = vld [vmem:[%s2687_s27 + $0x138] sm:$0xf]  ;;  %v235_v14 = vld [vmem:[%s2687_s27 + $0x150] sm:$0xf] }
  0x34   : > { %232 = vst [vmem:[%s184_s23 + $0x30] sm:$0xf] %v231_v12  ;;  %234 = vst [vmem:[%s184_s23 + $0x34] sm:$0xf] %v233_v13  ;;  %v237_v15 = vld [vmem:[%s2687_s27 + $0x168] sm:$0xf] }
  0x35   : > { %236 = vst [vmem:[%s184_s23 + $0x38] sm:$0xf] %v235_v14  ;;  %238 = vst [vmem:[%s184_s23 + $0x3c] sm:$0xf] %v237_v15 }
  0x36 PF: > { %293 = sbr.rel (!%p2645_p8) target bundleno = 71 (0x47), region = 61  ;;  %s295_s29 = sand.u32 (%p2645_p8), 1, %s2505_s15  }
  0x37   : > { %s1894_s3 = smul.u32 (%p2645_p8), 96, %s2529_s21  ;;  %s2004_s25 = sshll.u32 (%p2645_p8), %s295_s29, 6 }
  0x38   : > { %s297_s9 = scalar_lea.vmem (%p2645_p8), [#allocation6], %s2004_s25 }
  0x39   : > { %s1895_s5 = sadd.s32 (%p2645_p8), %s2525_s20, %s1894_s3 }
  0x3a   : > { %s2005_s6 = sshll.u32 (%p2645_p8), %s1895_s5, 2 }
  0x3b   : > { %s2713_s30 = scalar_lea.vmem (%p2645_p8), %s3253_s1, %s2005_s6 }
  0x3c   : > { %v2006_v16 = vld [vmem:[%s2713_s30 + $0x8] sm:$0xf] (%p2645_p8)  ;;  %v2007_v17 = vld [vmem:[%s2713_s30 + $0x20] sm:$0xf] (%p2645_p8)  ;;  %v2008_v18 = vld [vmem:[%s2713_s30 + $0x38] sm:$0xf] (%p2645_p8) }
  0x3d   : > { %322 = vst [vmem:[%s297_s9] sm:$0xf] %v2006_v16  ;;  %324 = vst [vmem:[%s297_s9 + $0x4] sm:$0xf] %v2007_v17  ;;  %v2009_v19 = vld [vmem:[%s2713_s30 + $0x50] sm:$0xf] }
  0x3e   : > { %326 = vst [vmem:[%s297_s9 + $0x8] sm:$0xf] %v2008_v18  ;;  %v2010_v20 = vld [vmem:[%s2713_s30 + $0x68] sm:$0xf]  ;;  %v2011_v21 = vld [vmem:[%s2713_s30 + $0x80] sm:$0xf] }
  0x3f   : > { %328 = vst [vmem:[%s297_s9 + $0xc] sm:$0xf] %v2009_v19  ;;  %330 = vst [vmem:[%s297_s9 + $0x10] sm:$0xf] %v2010_v20  ;;  %v2012_v22 = vld [vmem:[%s2713_s30 + $0x98] sm:$0xf] }
  0x40   : > { %332 = vst [vmem:[%s297_s9 + $0x14] sm:$0xf] %v2011_v21  ;;  %v2013_v23 = vld [vmem:[%s2713_s30 + $0xb0] sm:$0xf]  ;;  %v2014_v24 = vld [vmem:[%s2713_s30 + $0xc8] sm:$0xf] }
  0x41   : > { %334 = vst [vmem:[%s297_s9 + $0x18] sm:$0xf] %v2012_v22  ;;  %336 = vst [vmem:[%s297_s9 + $0x1c] sm:$0xf] %v2013_v23  ;;  %v2015_v25 = vld [vmem:[%s2713_s30 + $0xe0] sm:$0xf] }
  0x42   : > { %338 = vst [vmem:[%s297_s9 + $0x20] sm:$0xf] %v2014_v24  ;;  %v2016_v26 = vld [vmem:[%s2713_s30 + $0xf8] sm:$0xf]  ;;  %v2017_v27 = vld [vmem:[%s2713_s30 + $0x110] sm:$0xf] }
  0x43   : > { %340 = vst [vmem:[%s297_s9 + $0x24] sm:$0xf] %v2015_v25  ;;  %342 = vst [vmem:[%s297_s9 + $0x28] sm:$0xf] %v2016_v26  ;;  %v2018_v28 = vld [vmem:[%s2713_s30 + $0x128] sm:$0xf] }
  0x44   : > { %344 = vst [vmem:[%s297_s9 + $0x2c] sm:$0xf] %v2017_v27  ;;  %v2019_v29 = vld [vmem:[%s2713_s30 + $0x140] sm:$0xf]  ;;  %v2020_v30 = vld [vmem:[%s2713_s30 + $0x158] sm:$0xf] }
  0x45   : > { %346 = vst [vmem:[%s297_s9 + $0x30] sm:$0xf] %v2018_v28  ;;  %348 = vst [vmem:[%s297_s9 + $0x34] sm:$0xf] %v2019_v29  ;;  %v2021_v31 = vld [vmem:[%s2713_s30 + $0x170] sm:$0xf] }
  0x46   : > { %350 = vst [vmem:[%s297_s9 + $0x38] sm:$0xf] %v2020_v30  ;;  %352 = vst [vmem:[%s297_s9 + $0x3c] sm:$0xf] %v2021_v31 }
  0x47 PF: > { %407 = sbr.rel (!%p2664_p12) target bundleno = 88 (0x58), region = 102  ;;  %s409_s27 = sand.u32 (%p2664_p12), 1, %s2497_s13  }
  0x48   : > { %s1903_s23 = smul.u32 (%p2664_p12), 96, %s2529_s21  ;;  %s2022_s29 = sshll.u32 (%p2664_p12), %s409_s27, 6 }
  0x49   : > { %s411_s4 = scalar_lea.vmem (%p2664_p12), [#allocation7], %s2022_s29 }
  0x4a   : > { %s1904_s3 = sadd.s32 (%p2664_p12), %s2525_s20, %s1903_s23 }
  0x4b   : > { %s2023_s25 = sshll.u32 (%p2664_p12), %s1904_s3, 2 }
  0x4c   : > { %s2739_s8 = scalar_lea.vmem (%p2664_p12), %s3254_s2, %s2023_s25 }
  0x4d   : > { %v2024_v32 = vld [vmem:[%s2739_s8 + $0x10] sm:$0xf] (%p2664_p12)  ;;  %v2025_v33 = vld [vmem:[%s2739_s8 + $0x28] sm:$0xf] (%p2664_p12)  ;;  %v2026_v34 = vld [vmem:[%s2739_s8 + $0x40] sm:$0xf] (%p2664_p12) }
  0x4e   : > { %436 = vst [vmem:[%s411_s4] sm:$0xf] %v2024_v32  ;;  %438 = vst [vmem:[%s411_s4 + $0x4] sm:$0xf] %v2025_v33  ;;  %v2027_v35 = vld [vmem:[%s2739_s8 + $0x58] sm:$0xf] }
  0x4f   : > { %440 = vst [vmem:[%s411_s4 + $0x8] sm:$0xf] %v2026_v34  ;;  %v2028_v36 = vld [vmem:[%s2739_s8 + $0x70] sm:$0xf]  ;;  %v2029_v37 = vld [vmem:[%s2739_s8 + $0x88] sm:$0xf] }
  0x50   : > { %442 = vst [vmem:[%s411_s4 + $0xc] sm:$0xf] %v2027_v35  ;;  %444 = vst [vmem:[%s411_s4 + $0x10] sm:$0xf] %v2028_v36  ;;  %v2030_v38 = vld [vmem:[%s2739_s8 + $0xa0] sm:$0xf] }
  0x51   : > { %446 = vst [vmem:[%s411_s4 + $0x14] sm:$0xf] %v2029_v37  ;;  %v2031_v39 = vld [vmem:[%s2739_s8 + $0xb8] sm:$0xf]  ;;  %v2032_v40 = vld [vmem:[%s2739_s8 + $0xd0] sm:$0xf] }
  0x52   : > { %448 = vst [vmem:[%s411_s4 + $0x18] sm:$0xf] %v2030_v38  ;;  %450 = vst [vmem:[%s411_s4 + $0x1c] sm:$0xf] %v2031_v39  ;;  %v2033_v41 = vld [vmem:[%s2739_s8 + $0xe8] sm:$0xf] }
  0x53   : > { %452 = vst [vmem:[%s411_s4 + $0x20] sm:$0xf] %v2032_v40  ;;  %v2034_v42 = vld [vmem:[%s2739_s8 + $0x100] sm:$0xf]  ;;  %v2035_v43 = vld [vmem:[%s2739_s8 + $0x118] sm:$0xf] }
  0x54   : > { %454 = vst [vmem:[%s411_s4 + $0x24] sm:$0xf] %v2033_v41  ;;  %456 = vst [vmem:[%s411_s4 + $0x28] sm:$0xf] %v2034_v42  ;;  %v2036_v44 = vld [vmem:[%s2739_s8 + $0x130] sm:$0xf] }
  0x55   : > { %458 = vst [vmem:[%s411_s4 + $0x2c] sm:$0xf] %v2035_v43  ;;  %v2037_v45 = vld [vmem:[%s2739_s8 + $0x148] sm:$0xf]  ;;  %v2038_v46 = vld [vmem:[%s2739_s8 + $0x160] sm:$0xf] }
  0x56   : > { %460 = vst [vmem:[%s411_s4 + $0x30] sm:$0xf] %v2036_v44  ;;  %462 = vst [vmem:[%s411_s4 + $0x34] sm:$0xf] %v2037_v45  ;;  %v2039_v47 = vld [vmem:[%s2739_s8 + $0x178] sm:$0xf] }
  0x57   : > { %464 = vst [vmem:[%s411_s4 + $0x38] sm:$0xf] %v2038_v46  ;;  %466 = vst [vmem:[%s411_s4 + $0x3c] sm:$0xf] %v2039_v47 }
  0x58 PF: > { %p2040_p1 = scmp.ge.s32.totalorder %s2533_s22, 1  ;;  %p520_p2 = scmp.lt.s32.totalorder %s2533_s22, 5 }
  0x5a   : > { %p521_p3 = pnand %p2040_p1, %p520_p2 }
  0x5b   : > { %s534_s10 = sand.u32 (!%p521_p3), 1, %s2501_s14   ;;  %s527_s9 = sand.u32 (!%p521_p3), 1, %s2509_s16   ;;  %vm582_vm0 = vcmask (!%p521_p3), 7168   ;;  %v2535_v0 = vmov (!%p521_p3), -inf   ;;  %v2536_v10 = vmov (!%p521_p3), 0   ;;  %v2537_v15 = vmov (!%p521_p3), 0.0  }
  0x5c   : > { %524 = sbr.rel (%p521_p3) target bundleno = 1017 (0x3f9), region = 143  ;;  %s2042_s30 = sshll.u32 (!%p521_p3), %s534_s10, 6  ;;  %585 = vst.msk [vmem:[#allocation2 + $0x10] sm:$0xff] (!%p521_p3), %vm582_vm0, %v2535_v0  ;;  %583 = vst.msk [vmem:[#allocation2] sm:$0xff] (!%p521_p3), %vm582_vm0, %v2535_v0  ;;  %2342 = vset.pattern.permute.xlu1 (!%p521_p3), %v2536_v10  ;;  %2341 = vset.pattern.permute.xlu0 (!%p521_p3), %v2536_v10 }
  0x5d   : > { %s536_s27 = scalar_lea.vmem (!%p521_p3), [#allocation6], %s2042_s30  ;;  %s2761_s23 = sshll.u32 (!%p521_p3), %s527_s9, 6  ;;  %584 = vst.msk [vmem:[#allocation2 + $0x8] sm:$0xff] (!%p521_p3), %vm582_vm0, %v2535_v0  ;;  %586 = vst.msk [vmem:[#allocation2 + $0x18] sm:$0xff] (!%p521_p3), %vm582_vm0, %v2535_v0 }
  0x5e   : > { %v2343_v48 = vld [vmem:[%s536_s27] sm:$0xff] (!%p521_p3)   ;;  %v2344_v49 = vld [vmem:[%s536_s27 + $0x8] sm:$0xff] (!%p521_p3)   ;;  %v2345_v50 = vld [vmem:[%s536_s27 + $0x10] sm:$0xff] (!%p521_p3)   ;;  %s2764_s29 = scalar_lea.vmem (!%p521_p3), [#allocation5], %s2761_s23  ;;  %587 = vst.msk [vmem:[#allocation2 + $0x20] sm:$0xff] (!%p521_p3), %vm582_vm0, %v2535_v0  ;;  %s541_s14 = sand.u32 (!%p521_p3), 1, %s2493_s12  }
  0x5f   : > { %2185 = vmatprep.subr.bf16.mxu0 (!%p521_p3), %v2343_v48  ;;  %v2351_v51 = vld [vmem:[%s2764_s29] sm:$0xff] (!%p521_p3)   ;;  %v2346_v52 = vld [vmem:[%s536_s27 + $0x18] sm:$0xff] (!%p521_p3)   ;;  %v2348_v54 = vld [vmem:[%s536_s27 + $0x28] sm:$0xff] (!%p521_p3)   ;;  %588 = vst.msk [vmem:[#allocation2 + $0x28] sm:$0xff] (!%p521_p3), %vm582_vm0, %v2535_v0  ;;  %s2043_s16 = sshll.u32 (!%p521_p3), %s541_s14, 6  ;;  %s3174_s12 = scalar_lea.vmem (!%p521_p3), [#allocation8], %s2761_s23 }
  0x60   : > { %2186 = vmatpush3.bf16.xpose.msra.mxu0 (!%p521_p3), %v2343_v48  ;;  %2201 = vmatprep.mubr.bf16.mxu0 (!%p521_p3), %v2351_v51  ;;  %v2347_v53 = vld [vmem:[%s536_s27 + $0x20] sm:$0xff] (!%p521_p3)   ;;  %v2349_v55 = vld [vmem:[%s536_s27 + $0x30] sm:$0xff] (!%p521_p3)   ;;  %v2350_v56 = vld [vmem:[%s536_s27 + $0x38] sm:$0xff] (!%p521_p3)   ;;  %589 = vst.msk [vmem:[#allocation2 + $0x30] sm:$0xff] (!%p521_p3), %vm582_vm0, %v2535_v0  ;;  %s2855_s3 = scalar_lea.vmem (!%p521_p3), [#allocation7], %s2043_s16 }
  0x61   : > { %2187 = vmatprep.subr.bf16.mxu0 (!%p521_p3), %v2344_v49  ;;  %v2352_v57 = vld [vmem:[%s2764_s29 + $0x8] sm:$0xff] (!%p521_p3)   ;;  %v2353_v58 = vld [vmem:[%s2764_s29 + $0x10] sm:$0xff] (!%p521_p3)   ;;  %v2354_v59 = vld [vmem:[%s2764_s29 + $0x18] sm:$0xff] (!%p521_p3)   ;;  %590 = vst.msk [vmem:[#allocation2 + $0x38] sm:$0xff] (!%p521_p3), %vm582_vm0, %v2535_v0 }
  0x62   : > { %v2355_v60 = vld [vmem:[%s2764_s29 + $0x20] sm:$0xff] (!%p521_p3)   ;;  %v2356_v61 = vld [vmem:[%s2764_s29 + $0x28] sm:$0xff] (!%p521_p3)   ;;  %v2357_v62 = vld [vmem:[%s2764_s29 + $0x30] sm:$0xff] (!%p521_p3)   ;;  %591 = vst.msk [vmem:[#allocation2 + $0x40] sm:$0xff] (!%p521_p3), %vm582_vm0, %v2535_v0 }
  0x63   : > { %v2358_v63 = vld [vmem:[%s2764_s29 + $0x38] sm:$0xff]   ;;  %592 = vst.msk [vmem:[#allocation2 + $0x48] sm:$0xff] %vm582_vm0, %v2535_v0  ;;  %593 = vst.msk [vmem:[#allocation2 + $0x50] sm:$0xff] %vm582_vm0, %v2535_v0  ;;  %v2359_v19 = vld [vmem:[%s2855_s3] sm:$0xff]   ;;  %s2086_s25 = sshll.u32 (%p2671_p13), %s2521_s19, 5  ;;  %s3280_s4 = sld [smem:[#allocation10_spill]] (%p2671_p13) }
  0x64   : > { %594 = vst.msk [vmem:[#allocation2 + $0x58] sm:$0xff] %vm582_vm0, %v2535_v0  ;;  %595 = vst.msk [vmem:[#allocation2 + $0x60] sm:$0xff] %vm582_vm0, %v2535_v0  ;;  %v2360_v20 = vld [vmem:[%s2855_s3 + $0x8] sm:$0xff]   ;;  %2217 = vmatprep.subr.bf16.mxu1 %v2359_v19  ;;  %v2859_v21 = vld [vmem:[#allocation2 + $0x10] sm:$0xff]  ;;  %s1768_s5 = sadd.s32 (%p2671_p13), %s2517_s18, %s2086_s25 }
  0x65   : > { %596 = vst.msk [vmem:[#allocation2 + $0x68] sm:$0xff] %vm582_vm0, %v2535_v0  ;;  %597 = vst.msk [vmem:[#allocation2 + $0x70] sm:$0xff] %vm582_vm0, %v2535_v0  ;;  %2218 = vmatpush3.bf16.msra.mxu1 %v2359_v19  ;;  %v2861_v22 = vld [vmem:[#allocation2] sm:$0xff]  ;;  %v2869_v27 = vld [vmem:[#allocation2 + $0x18] sm:$0xff]  ;;  %s2087_s7 = sshll.u32 (%p2671_p13), %s1768_s5, 2 }
  0x66   : > { %598 = vst.msk [vmem:[#allocation2 + $0x78] sm:$0xff] %vm582_vm0, %v2535_v0  ;;  %601 = vst.msk [vmem:[#allocation3 + $0x10] sm:$0xff] %vm582_vm0, %v2537_v15  ;;  %2219 = vmatprep.subr.bf16.mxu1 %v2360_v20  ;;  %v2876_v29 = vld [vmem:[#allocation2 + $0x8] sm:$0xff]  ;;  %v2361_v32 = vld [vmem:[%s2855_s3 + $0x10] sm:$0xff]  }
  0x67   : > { %599 = vst.msk [vmem:[#allocation3] sm:$0xff] %vm582_vm0, %v2537_v15  ;;  %600 = vst.msk [vmem:[#allocation3 + $0x8] sm:$0xff] %vm582_vm0, %v2537_v15  ;;  %v2895_v37 = vld [vmem:[#allocation2 + $0x20] sm:$0xff]  ;;  %v2362_v40 = vld [vmem:[%s2855_s3 + $0x18] sm:$0xff]  }
  0x68   : > { %2188 = vmatpush3.bf16.xpose.msra.mxu0 %v2344_v49  ;;  %602 = vst.msk [vmem:[#allocation3 + $0x18] sm:$0xff] %vm582_vm0, %v2537_v15  ;;  %603 = vst.msk [vmem:[#allocation3 + $0x20] sm:$0xff] %vm582_vm0, %v2537_v15  ;;  %v2901_v39 = vld [vmem:[#allocation2 + $0x38] sm:$0xff]  ;;  %v2911_v45 = vld [vmem:[#allocation2 + $0x30] sm:$0xff] }
  0x69   : > { %2189 = vmatprep.subr.bf16.mxu0 %v2345_v50  ;;  %604 = vst.msk [vmem:[#allocation3 + $0x28] sm:$0xff] %vm582_vm0, %v2537_v15  ;;  %605 = vst.msk [vmem:[#allocation3 + $0x30] sm:$0xff] %vm582_vm0, %v2537_v15  ;;  %2220 = vmatpush3.bf16.msra.mxu1 %v2360_v20  ;;  %v2917_v47 = vld [vmem:[#allocation2 + $0x28] sm:$0xff]  ;;  %v2363_v48 = vld [vmem:[%s2855_s3 + $0x20] sm:$0xff]   ;;  %s1770_s10 = scalar_lea.vmem (%p2671_p13), %s3280_s4, %s2087_s7 }
  0x6a   : > { %606 = vst.msk [vmem:[#allocation3 + $0x38] sm:$0xff] %vm582_vm0, %v2537_v15  ;;  %607 = vst.msk [vmem:[#allocation3 + $0x40] sm:$0xff] %vm582_vm0, %v2537_v15  ;;  %2221 = vmatprep.subr.bf16.mxu1 %v2361_v32  ;;  %v2957_v10 = vld [vmem:[#allocation2 + $0x48] sm:$0xff] }
  0x6b   : > { %608 = vst.msk [vmem:[#allocation3 + $0x48] sm:$0xff] %vm582_vm0, %v2537_v15  ;;  %609 = vst.msk [vmem:[#allocation3 + $0x50] sm:$0xff] %vm582_vm0, %v2537_v15 }
  0x6c   : > { %610 = vst.msk [vmem:[#allocation3 + $0x58] sm:$0xff] %vm582_vm0, %v2537_v15  ;;  %611 = vst.msk [vmem:[#allocation3 + $0x60] sm:$0xff] %vm582_vm0, %v2537_v15 }
  0x6d   : > { %612 = vst.msk [vmem:[#allocation3 + $0x68] sm:$0xff] %vm582_vm0, %v2537_v15  ;;  %613 = vst.msk [vmem:[#allocation3 + $0x70] sm:$0xff] %vm582_vm0, %v2537_v15  ;;  %2222 = vmatpush3.bf16.msra.mxu1 %v2361_v32  ;;  %v2970_v32 = vld [vmem:[#allocation2 + $0x60] sm:$0xff] }
  0x6e   : > { %614 = vst.msk [vmem:[#allocation3 + $0x78] sm:$0xff] %vm582_vm0, %v2537_v15  ;;  %2223 = vmatprep.subr.bf16.mxu1 %v2362_v40  ;;  %v2365_v15 = vld [vmem:[%s2855_s3 + $0x30] sm:$0xff]  }
  0x70   : > { %2190 = vmatpush3.bf16.xpose.msra.mxu0 %v2345_v50 }
  0x71   : > { %2191 = vmatprep.subr.bf16.mxu0 %v2346_v52  ;;  %2224 = vmatpush3.bf16.msra.mxu1 %v2362_v40  ;;  %v2977_v40 = vld [vmem:[#allocation2 + $0x78] sm:$0xff] }
  0x72   : > { %2225 = vmatprep.subr.bf16.mxu1 %v2363_v48 }
  0x75   : > { %2226 = vmatpush3.bf16.msra.mxu1 %v2363_v48 }
  0x78   : > { %2192 = vmatpush3.bf16.xpose.msra.mxu0 %v2346_v52 }
  0x79   : > { %2193 = vmatprep.subr.bf16.mxu0 %v2347_v53 }
  0x80   : > { %2194 = vmatpush3.bf16.xpose.msra.mxu0 %v2347_v53 }
  0x81   : > { %2195 = vmatprep.subr.bf16.mxu0 %v2348_v54 }
  0x88   : > { %2196 = vmatpush3.bf16.xpose.msra.mxu0 %v2348_v54  ;;  %v2930_v54 = vld [vmem:[#allocation2 + $0x40] sm:$0xff] }
  0x89   : > { %2197 = vmatprep.subr.bf16.mxu0 %v2349_v55 }
  0x90   : > { %2198 = vmatpush3.bf16.xpose.msra.mxu0 %v2349_v55 }
  0x91   : > { %2199 = vmatprep.subr.bf16.mxu0 %v2350_v56 }
  0x98   : > { %2200 = vmatpush3.bf16.xpose.msra.mxu0 %v2350_v56  ;;  %v2937_v56 = vld [vmem:[#allocation2 + $0x58] sm:$0xff] }
  0x9f   : > { %2202 = vmatmul.mubr.bf16.vlgmr.msra.gmra.mrb[0].mxu0 %v2352_v57  ;;  %v2364_v57 = vld [vmem:[%s2855_s3 + $0x28] sm:$0xff]  }
  0xa0   : > { %2205 = vmatprep.mubr.bf16.mxu0 %v2353_v58  ;;  %2227 = vmatprep.subr.bf16.mxu1 %v2364_v57 }
  0xa1   : > { %2228 = vmatpush3.bf16.msra.mxu1 %v2364_v57 }
  0xa2   : > { %2229 = vmatprep.subr.bf16.mxu1 %v2365_v15 }
  0xa5   : > { %2230 = vmatpush3.bf16.msra.mxu1 %v2365_v15  ;;  %v2998_v15 = vld [vmem:[#allocation2 + $0x68] sm:$0xff] }
  0xa7   : > { %2206 = vmatmul.mubr.bf16.gmra.mrb[4].mxu0 %v2354_v59 }
  0xa8   : > { %2209 = vmatprep.mubr.bf16.mxu0 %v2355_v60 }
  0xaf   : > { %2210 = vmatmul.mubr.bf16.gmra.mrb[8].mxu0 %v2356_v61 }
  0xb0   : > { %2213 = vmatprep.mubr.bf16.mxu0 %v2357_v62 }
  0xb7   : > { %2214 = vmatmul.mubr.bf16.gmra.mrb[12].mxu0 %v2358_v63  ;;  %v2950_v63 = vld [vmem:[#allocation2 + $0x50] sm:$0xff] }
 0x172   : > { %v2790_v1 = vpop.f32.mrb[0].mxu0 }
 0x173   : > { %892 = vmax.xlane.f32.xlu1 %v2790_v1  ;;  %v2793_v2 = vpop.f32.mrb[1].mxu0 }
 0x174   : > { %888 = vmax.xlane.f32.xlu0 %v2793_v2  ;;  %v2796_v3 = vpop.f32.mrb[2].mxu0 }
 0x175   : > { %v2798_v4 = vpop.f32.mrb[3].mxu0 }
 0x177   : > { %894 = vmax.xlane.f32.xlu1 %v2796_v3 }
 0x178   : > { %890 = vmax.xlane.f32.xlu0 %v2798_v4 }
 0x17a   : > { %v2802_v5 = vpop.f32.mrb[4].mxu0 }
 0x17b   : > { %v2804_v6 = vpop.f32.mrb[5].mxu0 }
 0x17c   : > { %896 = vmax.xlane.f32.xlu0 %v2804_v6  ;;  %v2807_v7 = vpop.f32.mrb[6].mxu0 }
 0x17d   : > { %902 = vmax.xlane.f32.xlu1 %v2807_v7  ;;  %v2810_v8 = vpop.f32.mrb[7].mxu0 }
 0x180   : > { %900 = vmax.xlane.f32.xlu0 %v2802_v5 }
 0x181   : > { %898 = vmax.xlane.f32.xlu1 %v2810_v8 }
 0x182   : > { %v2814_v9 = vpop.f32.mrb[8].mxu0 }
 0x183   : > { %v2816_v11 = vpop.f32.mrb[9].mxu0 }
 0x184   : > { %v2818_v12 = vpop.f32.mrb[10].mxu0  ;;  %904 = vmax.xlane.f32.xlu0 %v2816_v11 }
 0x185   : > { %910 = vmax.xlane.f32.xlu1 %v2818_v12  ;;  %v2822_v13 = vpop.f32.mrb[11].mxu0 }
 0x188   : > { %908 = vmax.xlane.f32.xlu0 %v2814_v9 }
 0x189   : > { %906 = vmax.xlane.f32.xlu1 %v2822_v13 }
 0x18a   : > { %v2826_v14 = vpop.f32.mrb[12].mxu0 }
 0x18b   : > { %v2844_v16 = vpop.f32.mrb[13].mxu0 }
 0x18c   : > { %v2846_v17 = vpop.f32.mrb[14].mxu0  ;;  %912 = vmax.xlane.f32.xlu0 %v2844_v16 }
 0x18d   : > { %918 = vmax.xlane.f32.xlu1 %v2846_v17  ;;  %v2850_v18 = vpop.f32.mrb[15].mxu0 }
 0x190   : > { %916 = vmax.xlane.f32.xlu0 %v2826_v14 }
 0x191   : > { %914 = vmax.xlane.f32.xlu1 %v2850_v18 }
 0x200   : > { %v893_v23 = vpop.xlane.xlu1 %892 }
 0x201   : > { %v2864_v24 = vmax.f32 %v2859_v21, %v893_v23  ;;  %v889_v25 = vpop.xlane.xlu0 %888 }
 0x202   : > { %v2867_v26 = vmax.f32 %v2861_v22, %v889_v25 }
 0x203   : > { %1516 = vst.msk [vmem:[#allocation2 + $0x10] sm:$0xff] %vm582_vm0, %v2864_v24  ;;  %996 = vperm.xlu1 %2342, %v2864_v24  }
 0x204   : > { %1514 = vst.msk [vmem:[#allocation2] sm:$0xff] %vm582_vm0, %v2867_v26  ;;  %v895_v31 = vpop.xlane.xlu1 %894  ;;  %986 = vperm.xlu0 %2341, %v2867_v26  }
 0x205   : > { %v2885_v33 = vmax.f32 %v2869_v27, %v895_v31  ;;  %v891_v34 = vpop.xlane.xlu0 %890 }
 0x206   : > { %v2888_v35 = vmax.f32 %v2876_v29, %v891_v34 }
 0x207   : > { %1517 = vst.msk [vmem:[#allocation2 + $0x18] sm:$0xff] %vm582_vm0, %v2885_v33  ;;  %1001 = vperm.xlu1 %2342, %v2885_v33  }
 0x208   : > { %1515 = vst.msk [vmem:[#allocation2 + $0x8] sm:$0xff] %vm582_vm0, %v2888_v35 }
 0x209   : > { %v897_v41 = vpop.xlane.xlu0 %896 }
 0x20a   : > { %v2905_v42 = vmax.f32 %v2895_v37, %v897_v41  ;;  %v903_v43 = vpop.xlane.xlu1 %902  ;;  %v2366_v41 = vld [vmem:[%s2855_s3 + $0x38] sm:$0xff]  }
 0x20b   : > { %v2908_v44 = vmax.f32 %v2901_v39, %v903_v43  ;;  %991 = vperm.xlu1 %2342, %v2888_v35   ;;  %2231 = vmatprep.subr.bf16.mxu1 %v2366_v41 }
 0x20c   : > { %1518 = vst.msk [vmem:[#allocation2 + $0x20] sm:$0xff] %vm582_vm0, %v2905_v42  ;;  %2232 = vmatpush3.bf16.msra.mxu1 %v2366_v41 }
 0x20d   : > { %1521 = vst.msk [vmem:[#allocation2 + $0x38] sm:$0xff] %vm582_vm0, %v2908_v44  ;;  %v901_v50 = vpop.xlane.xlu0 %900 }
 0x20e   : > { %v2925_v51 = vmax.f32 %v2911_v45, %v901_v50  ;;  %v899_v52 = vpop.xlane.xlu1 %898 }
 0x20f   : > { %v2928_v53 = vmax.f32 %v2917_v47, %v899_v52 }
 0x210   : > { %1520 = vst.msk [vmem:[#allocation2 + $0x30] sm:$0xff] %vm582_vm0, %v2925_v51  ;;  %1016 = vperm.xlu1 %2342, %v2925_v51  }
 0x211   : > { %1519 = vst.msk [vmem:[#allocation2 + $0x28] sm:$0xff] %vm582_vm0, %v2928_v53  ;;  %v905_v59 = vpop.xlane.xlu0 %904 }
 0x212   : > { %v911_v60 = vpop.xlane.xlu1 %910  ;;  %v2945_v61 = vmax.f32 %v2930_v54, %v905_v59  ;;  %v2991_v59 = vld [vmem:[#allocation2 + $0x70] sm:$0xff] }
 0x213   : > { %v2948_v62 = vmax.f32 %v2937_v56, %v911_v60 }
 0x214   : > { %1522 = vst.msk [vmem:[#allocation2 + $0x40] sm:$0xff] %vm582_vm0, %v2945_v61  ;;  %1006 = vperm.xlu1 %2342, %v2905_v42  }
 0x215   : > { %1525 = vst.msk [vmem:[#allocation2 + $0x58] sm:$0xff] %vm582_vm0, %v2948_v62  ;;  %v909_v20 = vpop.xlane.xlu0 %908 }
 0x216   : > { %v907_v23 = vpop.xlane.xlu1 %906  ;;  %v2965_v25 = vmax.f32 %v2950_v63, %v909_v20 }
 0x217   : > { %v2968_v31 = vmax.f32 %v2957_v10, %v907_v23 }
 0x218   : > { %1524 = vst.msk [vmem:[#allocation2 + $0x50] sm:$0xff] %vm582_vm0, %v2965_v25  ;;  %1011 = vperm.xlu1 %2342, %v2928_v53  }
 0x219   : > { %1523 = vst.msk [vmem:[#allocation2 + $0x48] sm:$0xff] %vm582_vm0, %v2968_v31  ;;  %1031 = vperm.xlu0 %2341, %v2968_v31   ;;  %v913_v48 = vpop.xlane.xlu0 %912 }
 0x21a   : > { %v919_v50 = vpop.xlane.xlu1 %918  ;;  %v2986_v52 = vmax.f32 %v2970_v32, %v913_v48 }
 0x21b   : > { %v2989_v57 = vmax.f32 %v2977_v40, %v919_v50 }
 0x21c   : > { %1526 = vst.msk [vmem:[#allocation2 + $0x60] sm:$0xff] %vm582_vm0, %v2986_v52  ;;  %1021 = vperm.xlu1 %2342, %v2908_v44  }
 0x21d   : > { %1529 = vst.msk [vmem:[#allocation2 + $0x78] sm:$0xff] %vm582_vm0, %v2989_v57  ;;  %1041 = vperm.xlu0 %2341, %v2948_v62   ;;  %v917_v23 = vpop.xlane.xlu0 %916 }
 0x21e   : > { %v915_v41 = vpop.xlane.xlu1 %914  ;;  %v3006_v48 = vmax.f32 %v2991_v59, %v917_v23 }
 0x21f   : > { %v3009_v50 = vmax.f32 %v2998_v15, %v915_v41 }
 0x220   : > { %1528 = vst.msk [vmem:[#allocation2 + $0x70] sm:$0xff] %vm582_vm0, %v3006_v48  ;;  %1026 = vperm.xlu1 %2342, %v2945_v61  }
 0x221   : > { %1527 = vst.msk [vmem:[#allocation2 + $0x68] sm:$0xff] %vm582_vm0, %v3009_v50  ;;  %1051 = vperm.xlu0 %2341, %v3009_v50  }
 0x224   : > { %1036 = vperm.xlu1 %2342, %v2965_v25  }
 0x225   : > { %1061 = vperm.xlu0 %2341, %v2989_v57  }
 0x228   : > { %1046 = vperm.xlu1 %2342, %v2986_v52  }
 0x22c   : > { %1056 = vperm.xlu1 %2342, %v3006_v48  }
 0x282   : > { %v997_v23 = vpop.permute.xlu1 %996 }
 0x283   : > { %v1066_v19 = vsub.f32 %v2790_v1, %v997_v23  ;;  %v987_v20 = vpop.permute.xlu0 %986 }
 0x284   : > { %v1064_v49 = vsub.f32 %v2793_v2, %v987_v20 }
 0x286   : > { %v1002_v41 = vpop.permute.xlu1 %1001 }
 0x287   : > { %v1067_v60 = vsub.f32 %v2796_v3, %v1002_v41 }
 0x289   : > { %v1081_v43 = vpack.c.bf16 %v1067_v60, %v1066_v19 }
 0x28a   : > { %v992_v34 = vpop.permute.xlu1 %991 }
 0x28b   : > { %v1092_v0 = vmul.bf16 1069105081, %v1081_v43  ;;  %v1065_v58 = vsub.f32 %v2798_v4, %v992_v34 }
 0x28d   : > { %2367 = vpow.bf16 %v1092_v0  ;;  %v1080_v55 = vpack.c.bf16 %v1065_v58, %v1064_v49 }
 0x28f   : > { %v1089_v36 = vmul.bf16 1069105081, %v1080_v55  ;;  %v1017_v46 = vpop.permute.xlu1 %1016 }
 0x290   : > { %v1070_v49 = vsub.f32 %v2802_v5, %v1017_v46 }
 0x291   : > { %2369 = vpow.bf16 %v1089_v36 }
 0x293   : > { %v1007_v30 = vpop.permute.xlu1 %1006 }
 0x294   : > { %v1068_v1 = vsub.f32 %v2804_v6, %v1007_v30 }
 0x297   : > { %v1012_v28 = vpop.permute.xlu1 %1011 }
 0x298   : > { %v2368_v38 = vpop.eup %2367  ;;  %v1069_v3 = vsub.f32 %v2810_v8, %v1012_v28  ;;  %v1032_v23 = vpop.permute.xlu0 %1031 }
 0x299   : > { %v1147_v19 = vunpack.c.h.bf16 %v2368_v38  ;;  %v1146_v60 = vunpack.c.l.bf16 %v2368_v38  ;;  %v1073_v28 = vsub.f32 %v2822_v13, %v1032_v23 }
 0x29a   : > { %v1082_v41 = vpack.c.bf16 %v1069_v3, %v1068_v1 }
 0x29b   : > { %1166 = vadd.xlane.f32.xlu1 %v1147_v19  ;;  %1164 = vadd.xlane.f32.xlu0 %v1146_v60  ;;  %v1022_v2 = vpop.permute.xlu1 %1021 }
 0x29c   : > { %v2370_v4 = vpop.eup %2369  ;;  %v1095_v55 = vmul.bf16 1069105081, %v1082_v41  ;;  %v1071_v36 = vsub.f32 %v2807_v7, %v1022_v2  ;;  %v1042_v58 = vpop.permute.xlu0 %1041 }
 0x29d   : > { %2233 = vmatprep.mubr.bf16.mxu1 %v2370_v4  ;;  %v1145_v0 = vunpack.c.h.bf16 %v2370_v4  ;;  %v1144_v34 = vunpack.c.l.bf16 %v2370_v4  ;;  %v1075_v7 = vsub.f32 %v2818_v12, %v1042_v58 }
 0x29e   : > { %2371 = vpow.bf16 %v1095_v55  ;;  %v1083_v6 = vpack.c.bf16 %v1071_v36, %v1070_v49  ;;  %2234 = vmatmul.mubr.bf16.vlgmr.msra.gmra.mrb[0].mxu1 %v2368_v38 }
 0x29f   : > { %1162 = vadd.xlane.f32.xlu0 %v1145_v0  ;;  %1160 = vadd.xlane.f32.xlu1 %v1144_v34  ;;  %v1027_v8 = vpop.permute.xlu1 %1026 }
 0x2a0   : > { %v1098_v30 = vmul.bf16 1069105081, %v1083_v6  ;;  %v1072_v43 = vsub.f32 %v2816_v11, %v1027_v8  ;;  %v1052_v46 = vpop.permute.xlu0 %1051 }
 0x2a1   : > { %v1077_v60 = vsub.f32 %v2850_v18, %v1052_v46 }
 0x2a2   : > { %2373 = vpow.bf16 %v1098_v30  ;;  %v1084_v5 = vpack.c.bf16 %v1073_v28, %v1072_v43 }
 0x2a3   : > { %v1037_v20 = vpop.permute.xlu1 %1036 }
 0x2a4   : > { %v1101_v1 = vmul.bf16 1069105081, %v1084_v5  ;;  %v1074_v3 = vsub.f32 %v2814_v9, %v1037_v20  ;;  %v1062_v2 = vpop.permute.xlu0 %1061 }
 0x2a5   : > { %v1079_v49 = vsub.f32 %v2846_v17, %v1062_v2 }
 0x2a6   : > { %2375 = vpow.bf16 %v1101_v1  ;;  %v1085_v19 = vpack.c.bf16 %v1075_v7, %v1074_v3  ;;  %v3264_v3 = vsub.f32 %v2876_v29, %v2888_v35 }
 0x2a7   : > { %v1047_v38 = vpop.permute.xlu1 %1046 }
 0x2a8   : > { %v1104_v41 = vmul.bf16 1069105081, %v1085_v19  ;;  %v1076_v13 = vsub.f32 %v2844_v16, %v1047_v38  ;;  %v954_v19 = vmul.f32 1.442695, %v3264_v3  ;;  %v3265_v38 = vsub.f32 %v2859_v21, %v2864_v24 }
 0x2a9   : > { %v2372_v23 = vpop.eup %2371  ;;  %v3269_v21 = vsub.f32 %v2911_v45, %v2925_v51 }
 0x2aa   : > { %2377 = vpow.bf16 %v1104_v41  ;;  %v1086_v11 = vpack.c.bf16 %v1077_v60, %v1076_v13  ;;  %2237 = vmatprep.mubr.bf16.mxu1 %v2372_v23  ;;  %v1149_v34 = vunpack.c.h.bf16 %v2372_v23  ;;  %v1148_v6 = vunpack.c.l.bf16 %v2372_v23 }
 0x2ab   : > { %v1057_v4 = vpop.permute.xlu1 %1056  ;;  %v956_v60 = vmul.f32 1.442695, %v3265_v38  ;;  %v3266_v41 = vsub.f32 %v2861_v22, %v2867_v26  ;;  %v3267_v23 = vsub.f32 %v2895_v37, %v2905_v42  ;;  %v964_v24 = vmul.f32 1.442695, %v3269_v21 }
 0x2ac   : > { %v1107_v12 = vmul.bf16 1069105081, %v1086_v11  ;;  %v1078_v55 = vsub.f32 %v2826_v14, %v1057_v4  ;;  %v3268_v11 = vsub.f32 %v2869_v27, %v2885_v33  ;;  %v3270_v22 = vsub.f32 %v2917_v47, %v2928_v53 }
 0x2ad   : > { %v2374_v9 = vpop.eup %2373  ;;  %v952_v13 = vmul.f32 1.442695, %v3266_v41  ;;  %v960_v2 = vmul.f32 1.442695, %v3267_v23  ;;  %v3271_v37 = vsub.f32 %v2930_v54, %v2945_v61  ;;  %v3272_v33 = vsub.f32 %v2901_v39, %v2908_v44  ;;  %v1118_v41 = vld [vmem:[#allocation3 + $0x30] sm:$0xff] }
 0x2ae   : > { %2379 = vpow.bf16 %v1107_v12  ;;  %v1087_v36 = vpack.c.bf16 %v1079_v49, %v1078_v55  ;;  %2238 = vmatmul.mubr.bf16.gmra.mrb[4].mxu1 %v2374_v9  ;;  %v1151_v58 = vunpack.c.h.bf16 %v2374_v9  ;;  %v1150_v18 = vunpack.c.l.bf16 %v2374_v9 }
 0x2af   : > { %v958_v29 = vmul.f32 1.442695, %v3268_v11  ;;  %v962_v26 = vmul.f32 1.442695, %v3270_v22  ;;  %v968_v27 = vmul.f32 1.442695, %v3271_v37  ;;  %v3273_v47 = vsub.f32 %v2950_v63, %v2965_v25 }
 0x2b0   : > { %v1110_v0 = vmul.bf16 1069105081, %v1087_v36  ;;  %1174 = vadd.xlane.f32.xlu1 %v1151_v58  ;;  %1172 = vadd.xlane.f32.xlu0 %v1150_v18  ;;  %v966_v42 = vmul.f32 1.442695, %v3272_v33  ;;  %v3274_v4 = vsub.f32 %v2957_v10, %v2968_v31  ;;  %v3275_v39 = vsub.f32 %v2970_v32, %v2986_v52  ;;  %v1114_v18 = vld [vmem:[#allocation3 + $0x10] sm:$0xff]  ;;  %v1117_v22 = vld [vmem:[#allocation3 + $0x28] sm:$0xff] }
 0x2b1   : > { %v2376_v16 = vpop.eup %2375  ;;  %v972_v53 = vmul.f32 1.442695, %v3273_v47  ;;  %v3276_v63 = vsub.f32 %v2937_v56, %v2948_v62  ;;  %v3277_v10 = vsub.f32 %v2991_v59, %v3006_v48  ;;  %v3278_v32 = vsub.f32 %v2998_v15, %v3009_v50  ;;  %v1122_v47 = vld [vmem:[#allocation3 + $0x50] sm:$0xff] }
 0x2b2   : > { %2381 = vpow.bf16 %v1110_v0  ;;  %2241 = vmatprep.mubr.bf16.mxu1 %v2376_v16  ;;  %v1153_v30 = vunpack.c.h.bf16 %v2376_v16  ;;  %v1152_v43 = vunpack.c.l.bf16 %v2376_v16  ;;  %v970_v54 = vmul.f32 1.442695, %v3274_v4  ;;  %v1115_v0 = vld [vmem:[#allocation3 + $0x18] sm:$0xff] }
 0x2b3   : > { %2383 = vpow2.f32 %v954_v19  ;;  %v976_v44 = vmul.f32 1.442695, %v3275_v39  ;;  %v974_v25 = vmul.f32 1.442695, %v3276_v63  ;;  %v980_v31 = vmul.f32 1.442695, %v3277_v10 }
 0x2b4   : > { %1170 = vadd.xlane.f32.xlu1 %v1149_v34  ;;  %1168 = vadd.xlane.f32.xlu0 %v1148_v6  ;;  %2385 = vpow2.f32 %v956_v60  ;;  %v978_v52 = vmul.f32 1.442695, %v3278_v32  ;;  %v3279_v62 = vsub.f32 %v2977_v40, %v2989_v57 }
 0x2b5   : > { %v2378_v17 = vpop.eup %2377  ;;  %2387 = vpow2.f32 %v952_v13  ;;  %v1119_v13 = vld [vmem:[#allocation3 + $0x38] sm:$0xff] }
 0x2b6   : > { %2242 = vmatmul.mubr.bf16.gmra.mrb[8].mxu1 %v2378_v17  ;;  %v1155_v8 = vunpack.c.h.bf16 %v2378_v17  ;;  %v1154_v14 = vunpack.c.l.bf16 %v2378_v17  ;;  %2389 = vpow2.f32 %v960_v2  ;;  %v982_v36 = vmul.f32 1.442695, %v3279_v62 }
 0x2b7   : > { %2391 = vpow2.f32 %v958_v29 }
 0x2b8   : > { %1182 = vadd.xlane.f32.xlu1 %v1155_v8  ;;  %1180 = vadd.xlane.f32.xlu0 %v1154_v14  ;;  %2393 = vpow2.f32 %v964_v24  ;;  %v1113_v8 = vld [vmem:[#allocation3 + $0x8] sm:$0xff]  ;;  %v1112_v14 = vld [vmem:[#allocation3] sm:$0xff] }
 0x2b9   : > { %v2380_v28 = vpop.eup %2379  ;;  %2395 = vpow2.f32 %v962_v26  ;;  %v1116_v24 = vld [vmem:[#allocation3 + $0x20] sm:$0xff] }
 0x2ba   : > { %2245 = vmatprep.mubr.bf16.mxu1 %v2380_v28  ;;  %v1156_v46 = vunpack.c.l.bf16 %v2380_v28  ;;  %v1157_v7 = vunpack.c.h.bf16 %v2380_v28  ;;  %2397 = vpow2.f32 %v968_v27 }
 0x2bb   : > { %2399 = vpow2.f32 %v966_v42 }
 0x2bc   : > { %1178 = vadd.xlane.f32.xlu1 %v1153_v30  ;;  %1176 = vadd.xlane.f32.xlu0 %v1152_v43  ;;  %2401 = vpow2.f32 %v972_v53  ;;  %v1123_v53 = vld [vmem:[#allocation3 + $0x58] sm:$0xff] }
 0x2bd   : > { %v2382_v5 = vpop.eup %2381  ;;  %2403 = vpow2.f32 %v970_v54 }
 0x2be   : > { %2246 = vmatmul.mubr.bf16.gmra.mrb[12].mxu1 %v2382_v5  ;;  %v1159_v20 = vunpack.c.h.bf16 %v2382_v5  ;;  %v1158_v1 = vunpack.c.l.bf16 %v2382_v5  ;;  %v3062_v35 = vpop.eup %2383  ;;  %2405 = vpow2.f32 %v976_v44 }
 0x2bf   : > { %v2386_v45 = vpop.eup %2385  ;;  %2407 = vpow2.f32 %v974_v25  ;;  %v1129_v43 = vmul.f32 %v3062_v35, %v1113_v8  ;;  %v1120_v25 = vld [vmem:[#allocation3 + $0x40] sm:$0xff]  ;;  %v1126_v8 = vld [vmem:[#allocation3 + $0x70] sm:$0xff] }
 0x2c0   : > { %1184 = vadd.xlane.f32.xlu0 %v1156_v46  ;;  %1190 = vadd.xlane.f32.xlu1 %v1159_v20  ;;  %v2388_v51 = vpop.eup %2387  ;;  %2409 = vpow2.f32 %v980_v31  ;;  %v1130_v16 = vmul.f32 %v2386_v45, %v1114_v18 }
 0x2c1   : > { %v3077_v61 = vpop.eup %2389  ;;  %2411 = vpow2.f32 %v978_v52  ;;  %v1128_v5 = vmul.f32 %v2388_v51, %v1112_v14  ;;  %v1125_v14 = vld [vmem:[#allocation3 + $0x68] sm:$0xff] }
 0x2c2   : > { %v2392_v49 = vpop.eup %2391  ;;  %2413 = vpow2.f32 %v982_v36  ;;  %v1132_v27 = vmul.f32 %v3077_v61, %v1116_v24 }
 0x2c3   : > { %v2394_v12 = vpop.eup %2393  ;;  %v1131_v34 = vmul.f32 %v2392_v49, %v1115_v0 }
 0x2c4   : > { %1186 = vadd.xlane.f32.xlu1 %v1157_v7  ;;  %1188 = vadd.xlane.f32.xlu0 %v1158_v1  ;;  %v3086_v55 = vpop.eup %2395  ;;  %v1134_v23 = vmul.f32 %v2394_v12, %v1118_v41 }
 0x2c5   : > { %v3095_v9 = vpop.eup %2397  ;;  %v1133_v33 = vmul.f32 %v3086_v55, %v1117_v22 }
 0x2c6   : > { %v2400_v56 = vpop.eup %2399  ;;  %v1136_v52 = vmul.f32 %v3095_v9, %v1120_v25 }
 0x2c7   : > { %v3101_v59 = vpop.eup %2401  ;;  %v1135_v2 = vmul.f32 %v2400_v56, %v1119_v13 }
 0x2c8   : > { %v3103_v48 = vpop.eup %2403  ;;  %v1138_v39 = vmul.f32 %v3101_v59, %v1122_v47 }
 0x2c9   : > { %v3107_v15 = vpop.eup %2405 }
 0x2ca   : > { %v3109_v50 = vpop.eup %2407 }
 0x2cb   : > { %v3113_v40 = vpop.eup %2409 }
 0x2cc   : > { %v3115_v57 = vpop.eup %2411 }
 0x2cd   : > { %v3119_v58 = vpop.eup %2413 }
 0x2d5   : > { %1248 = vperm.xlu1 %2342, %v3062_v35  }
 0x2d9   : > { %1253 = vperm.xlu1 %2342, %v2386_v45  }
 0x2da   : > { %1243 = vperm.xlu0 %2341, %v2388_v51  }
 0x2dd   : > { %1263 = vperm.xlu1 %2342, %v3077_v61   ;;  %v1139_v61 = vmul.f32 %v3109_v50, %v1123_v53 }
 0x2de   : > { %1258 = vperm.xlu0 %2341, %v2392_v49  }
 0x2e1   : > { %1273 = vperm.xlu1 %2342, %v2394_v12   ;;  %v1121_v12 = vld [vmem:[#allocation3 + $0x48] sm:$0xff] }
 0x2e2   : > { %1268 = vperm.xlu0 %2341, %v3086_v55  }
 0x2e5   : > { %1283 = vperm.xlu1 %2342, %v3095_v9  }
 0x2e6   : > { %1278 = vperm.xlu0 %2341, %v2400_v56   ;;  %v1137_v56 = vmul.f32 %v3103_v48, %v1121_v12 }
 0x2e9   : > { %1293 = vperm.xlu1 %2342, %v3101_v59   ;;  %v1124_v59 = vld [vmem:[#allocation3 + $0x60] sm:$0xff] }
 0x2ea   : > { %1288 = vperm.xlu0 %2341, %v3103_v48  }
 0x2ed   : > { %1303 = vperm.xlu1 %2342, %v3107_v15  }
 0x2ee   : > { %1298 = vperm.xlu0 %2341, %v3109_v50   ;;  %v1127_v50 = vld [vmem:[#allocation3 + $0x78] sm:$0xff] }
 0x2ef   : > { %v1143_v9 = vmul.f32 %v3119_v58, %v1127_v50 }
 0x2f1   : > { %1313 = vperm.xlu1 %2342, %v3113_v40  }
 0x2f2   : > { %1308 = vperm.xlu0 %2341, %v3115_v57  }
 0x2f6   : > { %1318 = vperm.xlu0 %2341, %v3119_v58  }
 0x328   : > { %v1165_v6 = vpop.xlane.xlu0 %1164  ;;  %v1167_v17 = vpop.xlane.xlu1 %1166 }
 0x329   : > { %v1194_v28 = vadd.f32 %v1165_v6, %v1130_v16  ;;  %v1195_v30 = vadd.f32 %v1167_v17, %v1131_v34  ;;  %v1140_v6 = vmul.f32 %v3107_v15, %v1124_v59  ;;  %v1141_v15 = vmul.f32 %v3115_v57, %v1125_v14 }
 0x32b   : > { %1211 = vst.msk [vmem:[#allocation3 + $0x10] sm:$0xff] %vm582_vm0, %v1194_v28  ;;  %1212 = vst.msk [vmem:[#allocation3 + $0x18] sm:$0xff] %vm582_vm0, %v1195_v30 }
 0x32c   : > { %v1163_v46 = vpop.xlane.xlu0 %1162  ;;  %v1161_v20 = vpop.xlane.xlu1 %1160 }
 0x32d   : > { %v1193_v7 = vadd.f32 %v1163_v46, %v1129_v43  ;;  %v1192_v1 = vadd.f32 %v1161_v20, %v1128_v5  ;;  %v1142_v46 = vmul.f32 %v3113_v40, %v1126_v8 }
 0x32f   : > { %1210 = vst.msk [vmem:[#allocation3 + $0x8] sm:$0xff] %vm582_vm0, %v1193_v7  ;;  %1209 = vst.msk [vmem:[#allocation3] sm:$0xff] %vm582_vm0, %v1192_v1 }
 0x332   : > { %v1535_v3 = vld [vmem:[#allocation3 + $0x10] sm:$0xff]  ;;  %v1536_v19 = vld [vmem:[#allocation3 + $0x18] sm:$0xff] }
 0x333   : > { %2415 = vrcp.f32 %v1535_v3 }
 0x334   : > { %2417 = vrcp.f32 %v1536_v19 }
 0x336   : > { %v1534_v38 = vld [vmem:[#allocation3 + $0x8] sm:$0xff]  ;;  %v1533_v60 = vld [vmem:[#allocation3] sm:$0xff] }
 0x337   : > { %2419 = vrcp.f32 %v1534_v38 }
 0x338   : > { %2421 = vrcp.f32 %v1533_v60 }
 0x33d   : > { %v2416_v11 = vpop.eup %2415  ;;  %v1173_v29 = vpop.xlane.xlu0 %1172 }
 0x33e   : > { %v1175_v21 = vpop.xlane.xlu1 %1174  ;;  %v2418_v26 = vpop.eup %2417  ;;  %v1198_v35 = vadd.f32 %v1173_v29, %v1134_v23  ;;  %1593 = vperm.xlu1 %2342, %v2416_v11  }
 0x33f   : > { %v1199_v37 = vadd.f32 %v1175_v21, %v1135_v2  ;;  %1598 = vperm.xlu0 %2341, %v2418_v26  }
 0x340   : > { %1215 = vst.msk [vmem:[#allocation3 + $0x30] sm:$0xff] %vm582_vm0, %v1198_v35 }
 0x341   : > { %1216 = vst.msk [vmem:[#allocation3 + $0x38] sm:$0xff] %vm582_vm0, %v1199_v37  ;;  %v2420_v42 = vpop.eup %2419  ;;  %v1169_v45 = vpop.xlane.xlu0 %1168 }
 0x342   : > { %v1171_v51 = vpop.xlane.xlu1 %1170  ;;  %v2422_v4 = vpop.eup %2421  ;;  %v1196_v54 = vadd.f32 %v1169_v45, %v1132_v27 }
 0x343   : > { %v1197_v49 = vadd.f32 %v1171_v51, %v1133_v33  ;;  %1588 = vperm.xlu0 %2341, %v2420_v42   ;;  %1583 = vperm.xlu1 %2342, %v2422_v4  }
 0x344   : > { %1213 = vst.msk [vmem:[#allocation3 + $0x20] sm:$0xff] %vm582_vm0, %v1196_v54 }
 0x345   : > { %1214 = vst.msk [vmem:[#allocation3 + $0x28] sm:$0xff] %vm582_vm0, %v1197_v49  ;;  %v1181_v44 = vpop.xlane.xlu0 %1180 }
 0x346   : > { %v1183_v63 = vpop.xlane.xlu1 %1182  ;;  %v1202_v55 = vadd.f32 %v1181_v44, %v1138_v39 }
 0x347   : > { %v1203_v10 = vadd.f32 %v1183_v63, %v1139_v61  ;;  %v1539_v31 = vld [vmem:[#allocation3 + $0x30] sm:$0xff] }
 0x348   : > { %v1540_v32 = vld [vmem:[#allocation3 + $0x38] sm:$0xff]  ;;  %1219 = vst.msk [vmem:[#allocation3 + $0x50] sm:$0xff] %vm582_vm0, %v1202_v55  ;;  %2423 = vrcp.f32 %v1539_v31 }
 0x349   : > { %1220 = vst.msk [vmem:[#allocation3 + $0x58] sm:$0xff] %vm582_vm0, %v1203_v10  ;;  %v1177_v62 = vpop.xlane.xlu0 %1176  ;;  %2425 = vrcp.f32 %v1540_v32 }
 0x34a   : > { %v1179_v36 = vpop.xlane.xlu1 %1178  ;;  %v1200_v18 = vadd.f32 %v1177_v62, %v1136_v52 }
 0x34b   : > { %v1201_v0 = vadd.f32 %v1179_v36, %v1137_v56  ;;  %v1537_v16 = vld [vmem:[#allocation3 + $0x20] sm:$0xff] }
 0x34c   : > { %v1538_v34 = vld [vmem:[#allocation3 + $0x28] sm:$0xff]  ;;  %1217 = vst.msk [vmem:[#allocation3 + $0x40] sm:$0xff] %vm582_vm0, %v1200_v18  ;;  %2427 = vrcp.f32 %v1537_v16 }
 0x34d   : > { %1218 = vst.msk [vmem:[#allocation3 + $0x48] sm:$0xff] %vm582_vm0, %v1201_v0  ;;  %v1185_v48 = vpop.xlane.xlu0 %1184  ;;  %2429 = vrcp.f32 %v1538_v34 }
 0x34e   : > { %v1191_v17 = vpop.xlane.xlu1 %1190  ;;  %v1204_v28 = vadd.f32 %v1185_v48, %v1140_v6 }
 0x34f   : > { %v1207_v30 = vadd.f32 %v1191_v17, %v1143_v9  ;;  %v1543_v43 = vld [vmem:[#allocation3 + $0x50] sm:$0xff] }
 0x350   : > { %v1544_v5 = vld [vmem:[#allocation3 + $0x58] sm:$0xff]  ;;  %1221 = vst.msk [vmem:[#allocation3 + $0x60] sm:$0xff] %vm582_vm0, %v1204_v28  ;;  %2431 = vrcp.f32 %v1543_v43 }
 0x351   : > { %1224 = vst.msk [vmem:[#allocation3 + $0x78] sm:$0xff] %vm582_vm0, %v1207_v30  ;;  %v1189_v58 = vpop.xlane.xlu0 %1188  ;;  %2433 = vrcp.f32 %v1544_v5 }
 0x352   : > { %v1187_v20 = vpop.xlane.xlu1 %1186  ;;  %v2424_v7 = vpop.eup %2423  ;;  %v1206_v1 = vadd.f32 %v1189_v58, %v1142_v46 }
 0x353   : > { %v1205_v3 = vadd.f32 %v1187_v20, %v1141_v15  ;;  %v2426_v19 = vpop.eup %2425  ;;  %1613 = vperm.xlu1 %2342, %v2424_v7   ;;  %v1541_v38 = vld [vmem:[#allocation3 + $0x40] sm:$0xff] }
 0x354   : > { %v1542_v60 = vld [vmem:[#allocation3 + $0x48] sm:$0xff]  ;;  %1223 = vst.msk [vmem:[#allocation3 + $0x70] sm:$0xff] %vm582_vm0, %v1206_v1  ;;  %1618 = vperm.xlu0 %2341, %v2426_v19   ;;  %2435 = vrcp.f32 %v1541_v38 }
 0x355   : > { %1222 = vst.msk [vmem:[#allocation3 + $0x68] sm:$0xff] %vm582_vm0, %v1205_v3  ;;  %2437 = vrcp.f32 %v1542_v60 }
 0x356   : > { %v2428_v40 = vpop.eup %2427  ;;  %v1249_v44 = vpop.permute.xlu1 %1248 }
 0x357   : > { %v2430_v57 = vpop.eup %2429  ;;  %1603 = vperm.xlu1 %2342, %v2428_v40   ;;  %v1545_v41 = vld [vmem:[#allocation3 + $0x60] sm:$0xff]  ;;  %v1322_v5 = vmul.f32 0.0, %v1249_v44 }
 0x358   : > { %1608 = vperm.xlu0 %2341, %v2430_v57   ;;  %2439 = vrcp.f32 %v1545_v41  ;;  %v1548_v21 = vld [vmem:[#allocation3 + $0x78] sm:$0xff] }
 0x359   : > { %v1244_v63 = vpop.permute.xlu0 %1243 }
 0x35a   : > { %v2432_v13 = vpop.eup %2431  ;;  %v1254_v31 = vpop.permute.xlu1 %1253  ;;  %v1321_v46 = vmul.f32 0.0, %v1244_v63 }
 0x35b   : > { %v2434_v23 = vpop.eup %2433  ;;  %1633 = vperm.xlu1 %2342, %v2432_v13   ;;  %v1547_v2 = vld [vmem:[#allocation3 + $0x70] sm:$0xff]  ;;  %v1323_v9 = vmul.f32 0.0, %v1254_v31 }
 0x35c   : > { %v1546_v11 = vld [vmem:[#allocation3 + $0x68] sm:$0xff]  ;;  %1638 = vperm.xlu0 %2341, %v2434_v23   ;;  %2441 = vrcp.f32 %v1547_v2 }
 0x35d   : > { %2443 = vrcp.f32 %v1546_v11  ;;  %v1259_v32 = vpop.permute.xlu0 %1258 }
 0x35e   : > { %v2436_v29 = vpop.eup %2435  ;;  %2445 = vrcp.f32 %v1548_v21  ;;  %v1264_v52 = vpop.permute.xlu1 %1263  ;;  %v1324_v17 = vmul.f32 0.0, %v1259_v32 }
 0x35f   : > { %v2438_v24 = vpop.eup %2437  ;;  %1623 = vperm.xlu1 %2342, %v2436_v29   ;;  %v1325_v2 = vmul.f32 0.0, %v1264_v52 }
 0x360   : > { %1628 = vperm.xlu0 %2341, %v2438_v24  }
 0x361   : > { %v1269_v56 = vpop.permute.xlu0 %1268 }
 0x362   : > { %v2440_v22 = vpop.eup %2439  ;;  %v1274_v62 = vpop.permute.xlu1 %1273  ;;  %v1326_v21 = vmul.f32 0.0, %v1269_v56 }
 0x363   : > { %1643 = vperm.xlu1 %2342, %v2440_v22   ;;  %v1327_v40 = vmul.f32 0.0, %v1274_v62 }
 0x365   : > { %v1279_v36 = vpop.permute.xlu0 %1278 }
 0x366   : > { %v2442_v26 = vpop.eup %2441  ;;  %v1284_v59 = vpop.permute.xlu1 %1283  ;;  %v1328_v57 = vmul.f32 0.0, %v1279_v36 }
 0x367   : > { %v2444_v35 = vpop.eup %2443  ;;  %1653 = vperm.xlu1 %2342, %v2442_v26   ;;  %v1329_v32 = vmul.f32 0.0, %v1284_v59 }
 0x368   : > { %1648 = vperm.xlu0 %2341, %v2444_v35   ;;  %v2446_v37 = vpop.eup %2445 }
 0x369   : > { %v1289_v50 = vpop.permute.xlu0 %1288 }
 0x36a   : > { %v1294_v18 = vpop.permute.xlu1 %1293 }
 0x36c   : > { %1658 = vperm.xlu0 %2341, %v2446_v37  }
 0x36d   : > { %v1299_v0 = vpop.permute.xlu0 %1298 }
 0x36e   : > { %v3165_v16 = vpop.permute.xlu1 %1303 }
 0x36f   : > { %v1333_v59 = vmul.f32 0.0, %v3165_v16 }
 0x371   : > { %v2235_v27 = vpop.f32.mrb[0].mxu1  ;;  %v3167_v34 = vpop.permute.xlu0 %1308 }
 0x372   : > { %v1419_v33 = vpop.f32.mrb[1].mxu1  ;;  %v3169_v6 = vpop.permute.xlu1 %1313  ;;  %v1484_v8 = vadd.f32 %v2235_v27, %v1323_v9  ;;  %v1331_v27 = vmul.f32 0.0, %v1294_v18 }
 0x373   : > { %v2236_v42 = vpop.f32.mrb[2].mxu1  ;;  %v1482_v58 = vadd.f32 %v1419_v33, %v1321_v46 }
 0x374   : > { %v1422_v45 = vpop.f32.mrb[3].mxu1  ;;  %v1485_v14 = vadd.f32 %v2236_v42, %v1324_v17 }
 0x375   : > { %v3171_v48 = vpop.permute.xlu0 %1318  ;;  %v1483_v20 = vadd.f32 %v1422_v45, %v1322_v5  ;;  %v1332_v45 = vmul.f32 0.0, %v1299_v0 }
 0x381   : > { %v2239_v51 = vpop.f32.mrb[4].mxu1 }
 0x382   : > { %v1435_v47 = vpop.f32.mrb[5].mxu1  ;;  %v1488_v41 = vadd.f32 %v2239_v51, %v1327_v40 }
 0x383   : > { %v2240_v53 = vpop.f32.mrb[6].mxu1  ;;  %v1486_v22 = vadd.f32 %v1435_v47, %v1325_v2 }
 0x384   : > { %v1438_v4 = vpop.f32.mrb[7].mxu1  ;;  %v1489_v13 = vadd.f32 %v2240_v53, %v1328_v57 }
 0x385   : > { %v1487_v26 = vadd.f32 %v1438_v4, %v1326_v21  ;;  %v1330_v4 = vmul.f32 0.0, %v1289_v50 }
 0x389   : > { %v3149_v54 = vpop.f32.mrb[8].mxu1 }
 0x38a   : > { %v3151_v49 = vpop.f32.mrb[9].mxu1  ;;  %v1492_v51 = vadd.f32 %v3149_v54, %v1331_v27 }
 0x38b   : > { %v3153_v39 = vpop.f32.mrb[10].mxu1  ;;  %v1490_v62 = vadd.f32 %v3151_v49, %v1329_v32 }
 0x38c   : > { %v3155_v61 = vpop.f32.mrb[11].mxu1  ;;  %v1493_v53 = vadd.f32 %v3153_v39, %v1332_v45 }
 0x38d   : > { %v1491_v36 = vadd.f32 %v3155_v61, %v1330_v4 }
 0x391   : > { %v3157_v25 = vpop.f32.mrb[12].mxu1 }
 0x392   : > { %v3159_v12 = vpop.f32.mrb[13].mxu1 }
 0x393   : > { %v3161_v55 = vpop.f32.mrb[14].mxu1  ;;  %v1494_v50 = vadd.f32 %v3159_v12, %v1333_v59 }
 0x394   : > { %v3163_v10 = vpop.f32.mrb[15].mxu1 }
 0x3bd   : > { %v1594_v28 = vpop.permute.xlu1 %1593 }
 0x3be   : > { %v1599_v30 = vpop.permute.xlu0 %1598  ;;  %v1663_v43 = vmul.f32 %v1594_v28, %v1484_v8  ;;  %v1335_v28 = vmul.f32 0.0, %v3169_v6 }
 0x3bf   : > { %v1664_v15 = vmul.f32 %v1599_v30, %v1485_v14  ;;  %v1334_v14 = vmul.f32 0.0, %v3167_v34  ;;  %v1336_v30 = vmul.f32 0.0, %v3171_v48 }
 0x3c1   : > { %v2114_v7 = vpack.c.bf16 %v1664_v15, %v1663_v43  ;;  %v1495_v49 = vadd.f32 %v3163_v10, %v1334_v14  ;;  %v1496_v15 = vadd.f32 %v3157_v25, %v1335_v28  ;;  %v1497_v16 = vadd.f32 %v3161_v55, %v1336_v30 }
 0x3c2   : > { %v1589_v1 = vpop.permute.xlu0 %1588  ;;  %v1584_v3 = vpop.permute.xlu1 %1583 }
 0x3c3   : > { %2146 = vst [vmem:[%s3174_s12 + $0x8] sm:$0xff] %v2114_v7   ;;  %v1662_v19 = vmul.f32 %v1589_v1, %v1483_v20  ;;  %v1661_v38 = vmul.f32 %v1584_v3, %v1482_v58 }
 0x3c5   : > { %v2109_v60 = vpack.c.bf16 %v1662_v19, %v1661_v38 }
 0x3c7   : > { %2110 = vst [vmem:[%s3174_s12] sm:$0xff] %v2109_v60  }
 0x3ca   : > { %v1790_v10 = vld [vmem:[%s3174_s12 + $0x8] sm:$0xf] (%p2671_p13)  ;;  %v1792_v6 = vld [vmem:[%s3174_s12 + $0xc] sm:$0xf] (%p2671_p13) }
 0x3cb   : > { %1791 = vst [vmem:[%s1770_s10 + $0x10] sm:$0xf] (%p2671_p13), %v1790_v10  ;;  %1793 = vst [vmem:[%s1770_s10 + $0x18] sm:$0xf] (%p2671_p13), %v1792_v6 }
 0x3ce   : > { %v1786_v25 = vld [vmem:[%s3174_s12] sm:$0xf] (%p2671_p13)  ;;  %v1788_v55 = vld [vmem:[%s3174_s12 + $0x4] sm:$0xf] (%p2671_p13) }
 0x3cf   : > { %1787 = vst [vmem:[%s1770_s10] sm:$0xf] (%p2671_p13), %v1786_v25  ;;  %1789 = vst [vmem:[%s1770_s10 + $0x8] sm:$0xf] (%p2671_p13), %v1788_v55 }
 0x3d2   : > { %v1614_v23 = vpop.permute.xlu1 %1613 }
 0x3d3   : > { %v1619_v11 = vpop.permute.xlu0 %1618  ;;  %v1667_v29 = vmul.f32 %v1614_v23, %v1488_v41 }
 0x3d4   : > { %v1668_v24 = vmul.f32 %v1619_v11, %v1489_v13 }
 0x3d6   : > { %v2124_v35 = vpack.c.bf16 %v1668_v24, %v1667_v29  ;;  %v1604_v37 = vpop.permute.xlu1 %1603 }
 0x3d7   : > { %v1609_v33 = vpop.permute.xlu0 %1608  ;;  %v1665_v42 = vmul.f32 %v1604_v37, %v1486_v22 }
 0x3d8   : > { %2148 = vst [vmem:[%s3174_s12 + $0x18] sm:$0xff] %v2124_v35   ;;  %v1666_v44 = vmul.f32 %v1609_v33, %v1487_v26 }
 0x3da   : > { %v2119_v63 = vpack.c.bf16 %v1666_v44, %v1665_v42  ;;  %v1634_v31 = vpop.permute.xlu1 %1633 }
 0x3db   : > { %v1639_v52 = vpop.permute.xlu0 %1638  ;;  %v1671_v47 = vmul.f32 %v1634_v31, %v1492_v51 }
 0x3dc   : > { %2147 = vst [vmem:[%s3174_s12 + $0x10] sm:$0xff] %v2119_v63   ;;  %v1672_v56 = vmul.f32 %v1639_v52, %v1493_v53 }
 0x3de   : > { %v2134_v18 = vpack.c.bf16 %v1672_v56, %v1671_v47  ;;  %v1624_v0 = vpop.permute.xlu1 %1623 }
 0x3df   : > { %v1629_v9 = vpop.permute.xlu0 %1628  ;;  %v1669_v54 = vmul.f32 %v1624_v0, %v1490_v62  ;;  %v1798_v3 = vld [vmem:[%s3174_s12 + $0x18] sm:$0xf] (%p2671_p13)  ;;  %v1800_v19 = vld [vmem:[%s3174_s12 + $0x1c] sm:$0xf] (%p2671_p13) }
 0x3e0   : > { %2150 = vst [vmem:[%s3174_s12 + $0x28] sm:$0xff] %v2134_v18   ;;  %v1670_v17 = vmul.f32 %v1629_v9, %v1491_v36  ;;  %1799 = vst [vmem:[%s1770_s10 + $0x30] sm:$0xf] (%p2671_p13), %v1798_v3 }
 0x3e1   : > { %1801 = vst [vmem:[%s1770_s10 + $0x38] sm:$0xf] (%p2671_p13), %v1800_v19 }
 0x3e2   : > { %v2129_v39 = vpack.c.bf16 %v1670_v17, %v1669_v54  ;;  %v1644_v8 = vpop.permute.xlu1 %1643 }
 0x3e3   : > { %v1673_v43 = vmul.f32 %v1644_v8, %v1494_v50  ;;  %v1794_v48 = vld [vmem:[%s3174_s12 + $0x10] sm:$0xf] (%p2671_p13)  ;;  %v1796_v1 = vld [vmem:[%s3174_s12 + $0x14] sm:$0xf] (%p2671_p13) }
 0x3e4   : > { %2149 = vst [vmem:[%s3174_s12 + $0x20] sm:$0xff] %v2129_v39   ;;  %1795 = vst [vmem:[%s1770_s10 + $0x20] sm:$0xf] (%p2671_p13), %v1794_v48 }
 0x3e5   : > { %1797 = vst [vmem:[%s1770_s10 + $0x28] sm:$0xf] (%p2671_p13), %v1796_v1 }
 0x3e6   : > { %v1654_v46 = vpop.permute.xlu1 %1653 }
 0x3e7   : > { %v1649_v61 = vpop.permute.xlu0 %1648  ;;  %v1675_v20 = vmul.f32 %v1654_v46, %v1496_v15  ;;  %v1806_v40 = vld [vmem:[%s3174_s12 + $0x28] sm:$0xf] (%p2671_p13)  ;;  %v1808_v57 = vld [vmem:[%s3174_s12 + $0x2c] sm:$0xf] (%p2671_p13) }
 0x3e8   : > { %v1674_v5 = vmul.f32 %v1649_v61, %v1495_v49  ;;  %1807 = vst [vmem:[%s1770_s10 + $0x50] sm:$0xf] (%p2671_p13), %v1806_v40  ;;  %1809 = vst [vmem:[%s1770_s10 + $0x58] sm:$0xf] (%p2671_p13), %v1808_v57 }
 0x3ea   : > { %v2139_v58 = vpack.c.bf16 %v1674_v5, %v1673_v43  ;;  %1763 = sbr.rel (!%p2671_p13) target bundleno = 1017 (0x3f9), region = 167 }
 0x3eb   : > { %v1659_v34 = vpop.permute.xlu0 %1658  ;;  %v1802_v38 = vld [vmem:[%s3174_s12 + $0x20] sm:$0xf] (%p2671_p13)  ;;  %v1804_v60 = vld [vmem:[%s3174_s12 + $0x24] sm:$0xf] (%p2671_p13) }
 0x3ec   : > { %2151 = vst [vmem:[%s3174_s12 + $0x30] sm:$0xff] %v2139_v58   ;;  %v1676_v12 = vmul.f32 %v1659_v34, %v1497_v16  ;;  %1803 = vst [vmem:[%s1770_s10 + $0x40] sm:$0xf] (%p2671_p13), %v1802_v38 }
 0x3ed   : > { %1805 = vst [vmem:[%s1770_s10 + $0x48] sm:$0xf] (%p2671_p13), %v1804_v60 }
 0x3ee   : > { %v2144_v7 = vpack.c.bf16 %v1676_v12, %v1675_v20 }
 0x3f0   : > { %2152 = vst [vmem:[%s3174_s12 + $0x38] sm:$0xff] %v2144_v7  }
 0x3f3   : > { %v1810_v41 = vld [vmem:[%s3174_s12 + $0x30] sm:$0xf]  ;;  %v1812_v13 = vld [vmem:[%s3174_s12 + $0x34] sm:$0xf] }
 0x3f4   : > { %1811 = vst [vmem:[%s1770_s10 + $0x60] sm:$0xf] %v1810_v41  ;;  %1813 = vst [vmem:[%s1770_s10 + $0x68] sm:$0xf] %v1812_v13 }
 0x3f7   : > { %v1814_v23 = vld [vmem:[%s3174_s12 + $0x38] sm:$0xf]  ;;  %v1816_v2 = vld [vmem:[%s3174_s12 + $0x3c] sm:$0xf] }
 0x3f8   : > { %1815 = vst [vmem:[%s1770_s10 + $0x70] sm:$0xf] %v1814_v23  ;;  %1817 = vst [vmem:[%s1770_s10 + $0x78] sm:$0xf] %v1816_v2 }
 0x3f9 PF: > { %s13_s22 = sadd.s32 1, %s2533_s22   ;;  %s3281_s30 = sld [smem:[#allocation9_spill]] }
 0x3fa   : > { %p10_p4 = scmp.ge.s32.totalorder %s13_s22, 6   ;;  %s3282_s12 = smov %s2497_s13 }
 0x3fb   : > { %s3283_s13 = smov %s2676_s26  ;;  %s3284_s14 = smov %s2505_s15 }
 0x3fc   : > { %s3285_s15 = smov %s2654_s28  ;;  %s3286_s16 = smov %s2513_s17 }
 0x3fd   : > { %s3287_s17 = smov %s2651_s11  ;;  %s3288_s18 = smov %s2525_s20 }
 0x3fe   : > { %s3289_s19 = smov %s2529_s21  ;;  %s3290_s20 = smov %s3293_s24 }
 0x3ff   : > { %s3291_s21 = smov %s3281_s30  ;;  %12 = sbr.rel (!%p10_p4) target bundleno = 8 (0x8), region = 255 }

</bundles_post_ra>
